<compile_context>
chip_gen: v7x
topology: tpu7x:2x2x1
jax: 0.10.0
libtpu: 0.0.40
codegen_flags: <defaults>
</compile_context>

<pallas_src>
import functools

import numpy as np
import jax
import jax.numpy as jnp
from jax import lax
from jax.experimental import pallas as pl
from jax.experimental.pallas import tpu as pltpu

PI = 3.141592653            # matches the torch module's hard-coded pi
IOU_THRESH = 0.1
_NPAD_BUCKETS = (128, 256, 512, 1024)


def _limit_period(val):
    return val - jnp.floor(val / (2.0 * PI) + 0.5) * (2.0 * PI)


# ------------------------------ Pallas kernel --------------------------------

def _matcher_kernel(n_ref, feats_ref, out_ref, adj_ref):
    """One sample per grid step, fully fused.

    n_ref     : SMEM [S] i32    number of valid boxes per sample (scalar prefetch)
    feats_ref : VMEM [8, N]     feature-major rows (x, y, z, h, w, l, yaw, score)
    out_ref   : VMEM [10, N]    cluster-major columns (lane c = cluster id c+1):
                  rows 0-5 fused (x,y,z,h,w,l), row 6 sum(sin*w), row 7 sum(cos*w),
                  row 8 fused score, row 9 cluster validity.
    adj_ref   : VMEM [N, N] f32 scratch: thresholded adjacency (IoU > 0.1) mask
    """
    n_pad = feats_ref.shape[1]
    n_pad_f = jnp.float32(n_pad)
    n = n_ref[pl.program_id(0)]                                   # valid boxes

    bt = feats_ref[...]                                           # [8, N] feature-major
    bc = bt.T                                                     # [N, 8] box-major

    col = lax.broadcasted_iota(jnp.int32, (1, n_pad), 1)          # [1, N] lane index
    row = lax.broadcasted_iota(jnp.int32, (n_pad, 1), 0)          # [N, 1] sublane index
    col_f = col.astype(jnp.float32)
    row_f = row.astype(jnp.float32)
    valid_row = col < n                                           # [1, N]

    # ---------------- pairwise thresholded adjacency --------------------------
    # TODO(synk): boxes_iou3d_gpu uses rotated-BEV polygon clipping (sequential
    # Sutherland-Hodgman); the BEV overlap here is axis-aligned (yaw ignored
    # for the clustering criterion only).
    xi, yi, zi = bc[:, 0:1], bc[:, 1:2], bc[:, 2:3]
    hi, wi, li = bc[:, 3:4], bc[:, 4:5], bc[:, 5:6]
    xj, yj, zj = bt[0:1, :], bt[1:2, :], bt[2:3, :]
    hj, wj, lj = bt[3:4, :], bt[4:5, :], bt[5:6, :]

    ox = jnp.maximum(jnp.minimum(xi + 0.5 * li, xj + 0.5 * lj)
                     - jnp.maximum(xi - 0.5 * li, xj - 0.5 * lj), 0.0)
    oy = jnp.maximum(jnp.minimum(yi + 0.5 * wi, yj + 0.5 * wj)
                     - jnp.maximum(yi - 0.5 * wi, yj - 0.5 * wj), 0.0)
    oz = jnp.maximum(jnp.minimum(zi + 0.5 * hi, zj + 0.5 * hj)
                     - jnp.maximum(zi - 0.5 * hi, zj - 0.5 * hj), 0.0)
    inter = ox * oy * oz                                          # [N, N]
    union = jnp.maximum(hi * wi * li + hj * wj * lj - inter, 1e-7)
    # iou > 0.1  <=>  inter > 0.1 * union : drops the N^2 divide entirely.
    adj_ref[...] = (inter > IOU_THRESH * union).astype(jnp.float32)

    # ---------------- greedy clustering (reference while loop) ----------------
    # ids: 0 = unassigned, -1 = padding lane, k >= 1 = cluster id.  Like the
    # torch loop, a later seed may overwrite boxes already assigned earlier
    # (assignment is intentionally NOT masked by "unassigned").
    ids0 = jnp.where(valid_row, 0, -1).astype(jnp.int32)          # [1, N]

    def _next_seed(ids):
        return jnp.min(jnp.where(ids == 0, col_f, n_pad_f))       # f32 scalar

    def _cond(carry):
        k, seed_f, _ = carry
        return jnp.logical_and(seed_f < n_pad_f, k < n)           # early exit

    def _body(carry):
        k, seed_f, ids = carry
        cur = jnp.minimum(seed_f, n_pad_f - 1.0).astype(jnp.int32)
        adj_row = adj_ref[pl.ds(cur, 1), :]                       # [1, N] dynamic row
        assign = (adj_row > 0.5) & valid_row
        ids = jnp.where(assign, k + 1, ids)                       # ids stay in regs
        return k + 1, _next_seed(ids), ids

    _, _, ids_row = lax.while_loop(
        _cond, _body, (jnp.int32(0), _next_seed(ids0), ids0))
    ids_row_f = ids_row.astype(jnp.float32)                       # [1, N]

    # column-oriented ids via diagonal select + lane reduce (no [N,N] transpose)
    ids_col_f = jnp.sum(jnp.where(col == row, ids_row_f, 0.0),
                        axis=1, keepdims=True)                    # [N, 1]

    # membership: m[j, c] = 1 iff box j belongs to cluster c+1     [N, C] (C = N)
    m = (ids_col_f == (col_f + 1.0)).astype(jnp.float32)

    s_row = bt[7:8, :]                                            # [1, N]
    s_col = bc[:, 7:8]                                            # [N, 1]
    yaw_row = _limit_period(bt[6:7, :])                           # [1, N]
    yaw_col = _limit_period(bc[:, 6:7])                           # [N, 1]

    # ---- per-box rank inside its cluster (for s_fused = sum_i s_i^(rank_i+1))
    same = (ids_col_f == ids_row_f) & (ids_col_f >= 1.0)          # [N, N] same cluster
    before = (s_col > s_row) | ((s_col == s_row) & (row < col))   # box i ranks before j
    # (equal scores give the same s_fused under any ordering, so ties are free)
    m_rank = (same & before).astype(jnp.float32)
    rank_row = jnp.sum(m_rank, axis=0, keepdims=True)             # [1, N]
    log_s = jnp.log(jnp.maximum(s_row, 1e-30))
    powed_row = jnp.where(s_row > 0.0,
                          jnp.exp((rank_row + 1.0) * log_s), 0.0)  # s^(rank+1)

    # ---- per-cluster sums: one MXU matmul  [16, N] @ [N, C] ------------------
    sin_row = jnp.sin(yaw_row)
    cos_row = jnp.cos(yaw_row)
    ones_row = jnp.ones((1, n_pad), jnp.float32)
    lhs = jnp.concatenate(
        [bt[0:6, :] * s_row,        # rows 0-5 : s * (x, y, z, h, w, l)
         s_row * sin_row,           # row  6   : s * sin(yaw)
         s_row * cos_row,           # row  7   : s * cos(yaw)
         s_row,                     # row  8   : s
         ones_row,                  # row  9   : 1  (member count)
         powed_row,                 # row 10   : s^(rank+1)
         jnp.zeros((5, n_pad), jnp.float32)], axis=0)             # rows 11-15 pad
    out1 = jnp.dot(lhs, m, preferred_element_type=jnp.float32)    # [16, C]
    geo_s = out1[0:6, :]
    a_sin, a_cos = out1[6:7, :], out1[7:8, :]
    s_sum, count = out1[8:9, :], out1[9:10, :]
    powed_sum = out1[10:11, :]

    # ---- reference direction = yaw of the highest-score member (first argmax)
    member = m > 0.5
    s_for_max = jnp.where(member, s_col, jnp.float32(-1e30))      # [N, C]
    smax = jnp.max(s_for_max, axis=0, keepdims=True)              # [1, C]
    first_idx = jnp.min(jnp.where(s_for_max >= smax, row_f, n_pad_f),
                        axis=0, keepdims=True)                    # [1, C]
    onehot = (row_f == first_idx).astype(jnp.float32)             # [N, C]
    ref_dir = jnp.sum(yaw_col * onehot, axis=0, keepdims=True)    # [1, C]

    # ---- direction alignment: members with |dyaw| > pi/2 form the "gt" group.
    diff = jnp.abs(yaw_col - ref_dir)                             # [N, C]
    diff = jnp.where(diff > PI, 2.0 * PI - diff, diff)
    gm = jnp.where(diff > (PI / 2.0), m, 0.0)                     # gt-group members
    out2 = jnp.dot(lhs[6:14, :], gm, preferred_element_type=jnp.float32)  # [8, C]
    g_sin, g_cos, s_gt = out2[0:1, :], out2[1:2, :], out2[2:3, :]

    # flip the minority-score group by pi: sin(d+pi) = -sin(d), cos(d+pi) = -cos(d)
    s_le = s_sum - s_gt
    flip_gt = s_gt <= s_le                                        # [1, C]
    f_sin = jnp.where(flip_gt, g_sin, a_sin - g_sin)
    f_cos = jnp.where(flip_gt, g_cos, a_cos - g_cos)

    inv_s = pl.reciprocal(jnp.maximum(s_sum, 1e-12), approx=True)

    out_ref[0:6, :] = geo_s * inv_s
    out_ref[6:7, :] = (a_sin - 2.0 * f_sin) * inv_s
    out_ref[7:8, :] = (a_cos - 2.0 * f_cos) * inv_s
    out_ref[8:9, :] = jnp.minimum(powed_sum, 1.0)
    out_ref[9:10, :] = (count > 0.5).astype(jnp.float32)


# ------------------------------ Pallas wrapper --------------------------------

def _vmem_limit_bytes(n_pad):
    # [N,N] adjacency scratch + headroom for a handful of [N,N]-sized live
    # temporaries/spills + (8+10)-row double-buffered I/O + margin;
    # floored at 32 MiB, capped well under v7x's 64 MiB per-TC VMEM.
    need = 4 * n_pad * n_pad * 8 + 4 * n_pad * (8 + 10) * 2 + (4 << 20)
    return int(min(max(need, 32 << 20), 48 << 20))


def _matcher_pallas(feats, n_valid, n_pad):
    s = feats.shape[0]
    # TODO(synk): for n_pad >~ 1-2k the fusion phase should be tiled over
    # 128/256-lane cluster-column slabs (bounds [N,N] temporaries / VMEM on v7x).
    return pl.pallas_call(
        _matcher_kernel,
        out_shape=jax.ShapeDtypeStruct((s, 10, n_pad), jnp.float32),
        grid_spec=pltpu.PrefetchScalarGridSpec(
            num_scalar_prefetch=1,
            grid=(s,),
            in_specs=[pl.BlockSpec((None, 8, n_pad), lambda i, n: (i, 0, 0))],
            out_specs=pl.BlockSpec((None, 10, n_pad), lambda i, n: (i, 0, 0)),
            scratch_shapes=[pltpu.VMEM((n_pad, n_pad), jnp.float32)],
        ),
        compiler_params=pltpu.CompilerParams(
            dimension_semantics=("parallel",),        # samples -> both TCs on v7x
            vmem_limit_bytes=_vmem_limit_bytes(n_pad)),
    )(n_valid, feats)


@functools.partial(jax.jit, static_argnames=("n_pad", "pc_range"))
def _matcher_batched(feats, n_valid, *, n_pad, pc_range):
    """One device launch for the whole batch; returns padded boxes/scores + keep."""
    out = _matcher_pallas(feats, n_valid, n_pad)                  # [S, 10, N]
    fused6 = jnp.swapaxes(out[:, 0:6, :], 1, 2)                   # [S, N, 6]
    theta = jnp.arctan2(out[:, 6, :], out[:, 7, :])[..., None]    # [S, N, 1]
    boxes = jnp.concatenate([fused6, theta], axis=2)              # [S, N, 7]
    scores = out[:, 8, :]                                         # [S, N]
    valid = out[:, 9, :] > 0.5
    # TODO(synk): get_mask_for_boxes_within_range_torch checks the 8 box corners
    # (needs boxes_to_corners_3d, not provided); box centers are checked instead.
    x, y, z = boxes[..., 0], boxes[..., 1], boxes[..., 2]
    in_range = ((x >= pc_range[0]) & (x <= pc_range[3]) &
                (y >= pc_range[1]) & (y <= pc_range[4]) &
                (z >= pc_range[2]) & (z <= pc_range[5]))
    keep = valid & in_range
    return boxes, scores, keep


def _bucket_n_pad(n_max):
    # fixed ladder so a new batch's max box count does not force a recompile
    for b in _NPAD_BUCKETS:
        if n_max <= b:
            return b
    return -(-n_max // 1024) * 1024


# --------------------------------- Matcher ------------------------------------

class Matcher:
    """JAX/Pallas port of opencood Matcher (no learnable parameters)."""

    def __init__(self, pc_range):
        self.pc_range = tuple(float(v) for v in pc_range)

    def __call__(self, data_dict):
        record_len = [int(l) for l in data_dict['record_len']]
        # TODO(synk): proj_first=False branch needs x1_to_x2 / project_box3d /
        # corner_to_center_torch helpers (not provided); proj_first=True only.
        assert data_dict['proj_first'] is True

        # ---- build one padded, batched, feature-major input (host, numpy) ----
        per_sample = []
        idx = 0
        for l in record_len:
            bs = [np.asarray(b, np.float32) for b in data_dict['det_boxes'][idx:idx + l]
                  if b.shape[0] > 0]
            ss = [np.asarray(s, np.float32).reshape(-1)
                  for s in data_dict['det_scores'][idx:idx + l] if s.shape[0] > 0]
            idx += l
            if len(ss) == 0:
                per_sample.append((np.zeros((0, 7), np.float32),
                                   np.zeros((0,), np.float32)))
            else:
                per_sample.append((np.concatenate(bs, 0), np.concatenate(ss, 0)))

        n_max = max(1, max(b.shape[0] for b, _ in per_sample))
        n_pad = _bucket_n_pad(n_max)
        s_cnt = len(per_sample)
        feats = np.zeros((s_cnt, 8, n_pad), np.float32)
        n_valid = np.zeros((s_cnt,), np.int32)
        for i, (b, s) in enumerate(per_sample):
            n = b.shape[0]
            n_valid[i] = n
            if n:
                feats[i, 0:7, :n] = b.T
                feats[i, 7, :n] = s

        boxes, scores, keep = _matcher_batched(
            jnp.asarray(feats), jnp.asarray(n_valid),
            n_pad=n_pad, pc_range=self.pc_range)
        boxes = np.asarray(boxes)
        scores = np.asarray(scores)
        keep = np.asarray(keep)

        # ---- final variable-length filtering on host (padded + mask on device) ----
        boxes_fused, scores_fused = [], []
        for i in range(s_cnt):
            if n_valid[i] == 0:     # no detections: reference's default proposal
                boxes_fused.append(jnp.array([[0., 0., 0., 1., 1., 1., 1.57]],
                                             jnp.float32))
                scores_fused.append(jnp.array([0.01], jnp.float32))
            else:
                k = keep[i]
                boxes_fused.append(jnp.asarray(boxes[i][k]))
                scores_fused.append(jnp.asarray(scores[i][k]))

        data_dict['boxes_fused'] = boxes_fused
        data_dict['scores_fused'] = scores_fused
        self._merge_keypoints(data_dict, record_len)
        return data_dict

    def _merge_keypoints(self, data_dict, record_len):
        feats, coords = [], []
        idx = 0
        for l in record_len:
            feats.append(jnp.concatenate(data_dict['point_features'][idx:idx + l], axis=0))
            coords.append(jnp.concatenate(data_dict['point_coords'][idx:idx + l], axis=0))
            idx += l
        data_dict['point_features'] = feats
        data_dict['point_coords'] = coords


# ----------------------------------- main --------------------------------------

if __name__ == "__main__":
    key = jax.random.PRNGKey(0)
    pc_range = [-40.0, -40.0, -3.0, 40.0, 40.0, 1.0]
    matcher = Matcher(pc_range)

    n_per_agent = 6
    record_len = [2, 2]                         # 2 samples, 2 agents each
    det_boxes, det_scores, point_feats, point_coords = [], [], [], []
    for s in range(len(record_len)):
        key, k1, k2, k3 = jax.random.split(key, 4)
        centers = jax.random.uniform(k1, (n_per_agent, 3), minval=-20.0, maxval=20.0)
        dims = jax.random.uniform(k2, (n_per_agent, 3), minval=1.5, maxval=4.0)  # h, w, l
        yaws = jax.random.uniform(k3, (n_per_agent, 1), minval=-PI, maxval=PI)
        base = jnp.concatenate([centers, dims, yaws], axis=1)                    # [6, 7]
        for a in range(record_len[s]):
            key, kn, ks, kf, kc = jax.random.split(key, 5)
            noise = jax.random.normal(kn, (n_per_agent, 7)) * 0.05
            det_boxes.append(base + noise)      # agents see (almost) the same objects
            det_scores.append(jax.random.uniform(ks, (n_per_agent,), minval=0.3, maxval=0.95))
            point_feats.append(jax.random.normal(kf, (8, 32)))
            point_coords.append(jax.random.uniform(kc, (8, 4), minval=-20.0, maxval=20.0))

    data_dict = {
        'record_len': record_len,
        'det_boxes': det_boxes,
        'det_scores': det_scores,
        'proj_first': True,
        'lidar_pose': jnp.zeros((sum(record_len), 6), jnp.float32),
        'point_features': point_feats,
        'point_coords': point_coords,
    }

    out = matcher(data_dict)
    for b, s in zip(out['boxes_fused'], out['scores_fused']):
        jax.block_until_ready(b)
        jax.block_until_ready(s)
    jax.block_until_ready(out['point_features'][0])
    jax.block_until_ready(out['point_coords'][0])
    print("KERNEL_OK")
</pallas_src>

<mosaic_0001>
module attributes {stable_mosaic.version = 11 : i64} {
  func.func @_matcher_kernel(%arg0: i32, %arg1: memref<2xi32, #tpu.memory_space<smem>>, %arg2: memref<1x8x128xf32, #tpu.memory_space<vmem>>, %arg3: memref<1x10x128xf32, #tpu.memory_space<vmem>>, %arg4: memref<128x128xf32, #tpu.memory_space<vmem>>) attributes {dimension_semantics = [#tpu.dimension_semantics<parallel>], iteration_bounds = array<i64: 2>, scalar_prefetch = 1 : i64, scratch_operands = 1 : i64, tpu.core_type = #tpu.core_type<tc>, window_params = [{transform_indices = @transform_0, window_bounds = array<i64: 1, 8, 128>}, {transform_indices = @transform_1, window_bounds = array<i64: 1, 10, 128>}]} {
    %0 = arith.index_cast %arg0 : i32 to index
    %1 = memref.load %arg1[%0] : memref<2xi32, #tpu.memory_space<smem>>
    %c0 = arith.constant 0 : index
    %c0_0 = arith.constant 0 : index
    %c0_1 = arith.constant 0 : index
    %2 = vector.load %arg2[%c0, %c0_0, %c0_1] : memref<1x8x128xf32, #tpu.memory_space<vmem>>, vector<1x8x128xf32>
    %3 = vector.shape_cast %2 : vector<1x8x128xf32> to vector<8x128xf32>
    %4 = tpu.transpose %3, [1, 0] : vector<8x128xf32> -> vector<128x8xf32>
    %5 = tpu.iota {dimensions = array<i32: 1>} : vector<1x128xi32>
    %6 = tpu.iota {dimensions = array<i32: 0>} : vector<128x1xi32>
    %7 = arith.sitofp %5 : vector<1x128xi32> to vector<1x128xf32>
    %8 = arith.sitofp %6 : vector<128x1xi32> to vector<128x1xf32>
    %9 = vector.broadcast %1 : i32 to vector<1x128xi32>
    %10 = arith.cmpi slt, %5, %9 : vector<1x128xi32>
    %11 = vector.extract_strided_slice %4 {offsets = [0, 0], sizes = [128, 1], strides = [1, 1]} : vector<128x8xf32> to vector<128x1xf32>
    %12 = vector.extract_strided_slice %4 {offsets = [0, 1], sizes = [128, 1], strides = [1, 1]} : vector<128x8xf32> to vector<128x1xf32>
    %13 = vector.extract_strided_slice %4 {offsets = [0, 2], sizes = [128, 1], strides = [1, 1]} : vector<128x8xf32> to vector<128x1xf32>
    %14 = vector.extract_strided_slice %4 {offsets = [0, 3], sizes = [128, 1], strides = [1, 1]} : vector<128x8xf32> to vector<128x1xf32>
    %15 = vector.extract_strided_slice %4 {offsets = [0, 4], sizes = [128, 1], strides = [1, 1]} : vector<128x8xf32> to vector<128x1xf32>
    %16 = vector.extract_strided_slice %4 {offsets = [0, 5], sizes = [128, 1], strides = [1, 1]} : vector<128x8xf32> to vector<128x1xf32>
    %17 = vector.extract_strided_slice %3 {offsets = [0, 0], sizes = [1, 128], strides = [1, 1]} : vector<8x128xf32> to vector<1x128xf32>
    %18 = vector.extract_strided_slice %3 {offsets = [1, 0], sizes = [1, 128], strides = [1, 1]} : vector<8x128xf32> to vector<1x128xf32>
    %19 = vector.extract_strided_slice %3 {offsets = [2, 0], sizes = [1, 128], strides = [1, 1]} : vector<8x128xf32> to vector<1x128xf32>
    %20 = vector.extract_strided_slice %3 {offsets = [3, 0], sizes = [1, 128], strides = [1, 1]} : vector<8x128xf32> to vector<1x128xf32>
    %21 = vector.extract_strided_slice %3 {offsets = [4, 0], sizes = [1, 128], strides = [1, 1]} : vector<8x128xf32> to vector<1x128xf32>
    %22 = vector.extract_strided_slice %3 {offsets = [5, 0], sizes = [1, 128], strides = [1, 1]} : vector<8x128xf32> to vector<1x128xf32>
    %cst = arith.constant 5.000000e-01 : f32
    %23 = vector.broadcast %cst : f32 to vector<128x1xf32>
    %24 = arith.mulf %23, %16 : vector<128x1xf32>
    %25 = arith.addf %11, %24 : vector<128x1xf32>
    %cst_2 = arith.constant 5.000000e-01 : f32
    %26 = vector.broadcast %cst_2 : f32 to vector<1x128xf32>
    %27 = arith.mulf %26, %22 : vector<1x128xf32>
    %28 = arith.addf %17, %27 : vector<1x128xf32>
    %29 = vector.broadcast %25 : vector<128x1xf32> to vector<128x128xf32>
    %30 = vector.broadcast %28 : vector<1x128xf32> to vector<128x128xf32>
    %31 = arith.minimumf %29, %30 : vector<128x128xf32>
    %cst_3 = arith.constant 5.000000e-01 : f32
    %32 = vector.broadcast %cst_3 : f32 to vector<128x1xf32>
    %33 = arith.mulf %32, %16 : vector<128x1xf32>
    %34 = arith.subf %11, %33 : vector<128x1xf32>
    %cst_4 = arith.constant 5.000000e-01 : f32
    %35 = vector.broadcast %cst_4 : f32 to vector<1x128xf32>
    %36 = arith.mulf %35, %22 : vector<1x128xf32>
    %37 = arith.subf %17, %36 : vector<1x128xf32>
    %38 = vector.broadcast %34 : vector<128x1xf32> to vector<128x128xf32>
    %39 = vector.broadcast %37 : vector<1x128xf32> to vector<128x128xf32>
    %40 = arith.maximumf %38, %39 : vector<128x128xf32>
    %41 = arith.subf %31, %40 : vector<128x128xf32>
    %cst_5 = arith.constant 0.000000e+00 : f32
    %42 = vector.broadcast %cst_5 : f32 to vector<128x128xf32>
    %43 = arith.maximumf %41, %42 : vector<128x128xf32>
    %cst_6 = arith.constant 5.000000e-01 : f32
    %44 = vector.broadcast %cst_6 : f32 to vector<128x1xf32>
    %45 = arith.mulf %44, %15 : vector<128x1xf32>
    %46 = arith.addf %12, %45 : vector<128x1xf32>
    %cst_7 = arith.constant 5.000000e-01 : f32
    %47 = vector.broadcast %cst_7 : f32 to vector<1x128xf32>
    %48 = arith.mulf %47, %21 : vector<1x128xf32>
    %49 = arith.addf %18, %48 : vector<1x128xf32>
    %50 = vector.broadcast %46 : vector<128x1xf32> to vector<128x128xf32>
    %51 = vector.broadcast %49 : vector<1x128xf32> to vector<128x128xf32>
    %52 = arith.minimumf %50, %51 : vector<128x128xf32>
    %cst_8 = arith.constant 5.000000e-01 : f32
    %53 = vector.broadcast %cst_8 : f32 to vector<128x1xf32>
    %54 = arith.mulf %53, %15 : vector<128x1xf32>
    %55 = arith.subf %12, %54 : vector<128x1xf32>
    %cst_9 = arith.constant 5.000000e-01 : f32
    %56 = vector.broadcast %cst_9 : f32 to vector<1x128xf32>
    %57 = arith.mulf %56, %21 : vector<1x128xf32>
    %58 = arith.subf %18, %57 : vector<1x128xf32>
    %59 = vector.broadcast %55 : vector<128x1xf32> to vector<128x128xf32>
    %60 = vector.broadcast %58 : vector<1x128xf32> to vector<128x128xf32>
    %61 = arith.maximumf %59, %60 : vector<128x128xf32>
    %62 = arith.subf %52, %61 : vector<128x128xf32>
    %cst_10 = arith.constant 0.000000e+00 : f32
    %63 = vector.broadcast %cst_10 : f32 to vector<128x128xf32>
    %64 = arith.maximumf %62, %63 : vector<128x128xf32>
    %cst_11 = arith.constant 5.000000e-01 : f32
    %65 = vector.broadcast %cst_11 : f32 to vector<128x1xf32>
    %66 = arith.mulf %65, %14 : vector<128x1xf32>
    %67 = arith.addf %13, %66 : vector<128x1xf32>
    %cst_12 = arith.constant 5.000000e-01 : f32
    %68 = vector.broadcast %cst_12 : f32 to vector<1x128xf32>
    %69 = arith.mulf %68, %20 : vector<1x128xf32>
    %70 = arith.addf %19, %69 : vector<1x128xf32>
    %71 = vector.broadcast %67 : vector<128x1xf32> to vector<128x128xf32>
    %72 = vector.broadcast %70 : vector<1x128xf32> to vector<128x128xf32>
    %73 = arith.minimumf %71, %72 : vector<128x128xf32>
    %cst_13 = arith.constant 5.000000e-01 : f32
    %74 = vector.broadcast %cst_13 : f32 to vector<128x1xf32>
    %75 = arith.mulf %74, %14 : vector<128x1xf32>
    %76 = arith.subf %13, %75 : vector<128x1xf32>
    %cst_14 = arith.constant 5.000000e-01 : f32
    %77 = vector.broadcast %cst_14 : f32 to vector<1x128xf32>
    %78 = arith.mulf %77, %20 : vector<1x128xf32>
    %79 = arith.subf %19, %78 : vector<1x128xf32>
    %80 = vector.broadcast %76 : vector<128x1xf32> to vector<128x128xf32>
    %81 = vector.broadcast %79 : vector<1x128xf32> to vector<128x128xf32>
    %82 = arith.maximumf %80, %81 : vector<128x128xf32>
    %83 = arith.subf %73, %82 : vector<128x128xf32>
    %cst_15 = arith.constant 0.000000e+00 : f32
    %84 = vector.broadcast %cst_15 : f32 to vector<128x128xf32>
    %85 = arith.maximumf %83, %84 : vector<128x128xf32>
    %86 = arith.mulf %43, %64 : vector<128x128xf32>
    %87 = arith.mulf %86, %85 : vector<128x128xf32>
    %88 = arith.mulf %14, %15 : vector<128x1xf32>
    %89 = arith.mulf %88, %16 : vector<128x1xf32>
    %90 = arith.mulf %20, %21 : vector<1x128xf32>
    %91 = arith.mulf %90, %22 : vector<1x128xf32>
    %92 = vector.broadcast %89 : vector<128x1xf32> to vector<128x128xf32>
    %93 = vector.broadcast %91 : vector<1x128xf32> to vector<128x128xf32>
    %94 = arith.addf %92, %93 : vector<128x128xf32>
    %95 = arith.subf %94, %87 : vector<128x128xf32>
    %cst_16 = arith.constant 1.000000e-07 : f32
    %96 = vector.broadcast %cst_16 : f32 to vector<128x128xf32>
    %97 = arith.maximumf %95, %96 : vector<128x128xf32>
    %cst_17 = arith.constant 1.000000e-01 : f32
    %98 = vector.broadcast %cst_17 : f32 to vector<128x128xf32>
    %99 = arith.mulf %98, %97 : vector<128x128xf32>
    %100 = arith.cmpf ogt, %87, %99 : vector<128x128xf32>
    %101 = arith.extui %100 : vector<128x128xi1> to vector<128x128xi32>
    %102 = arith.sitofp %101 : vector<128x128xi32> to vector<128x128xf32>
    %c0_18 = arith.constant 0 : index
    %c0_19 = arith.constant 0 : index
    %103 = vector.load %arg4[%c0_18, %c0_19] : memref<128x128xf32, #tpu.memory_space<vmem>>, vector<128x128xf32>
    tpu.vector_store %arg4[%c0_18, %c0_19], %102 {strides = array<i32>} : memref<128x128xf32, #tpu.memory_space<vmem>>, vector<128x128xf32>,
    %c0_i32 = arith.constant 0 : i32
    %c-1_i32 = arith.constant -1 : i32
    %104 = vector.broadcast %c0_i32 : i32 to vector<1x128xi32>
    %105 = vector.broadcast %c-1_i32 : i32 to vector<1x128xi32>
    %106 = arith.select %10, %104, %105 : vector<1x128xi1>, vector<1x128xi32>
    %c0_i32_20 = arith.constant 0 : i32
    %107 = vector.broadcast %c0_i32_20 : i32 to vector<1x128xi32>
    %108 = arith.cmpi eq, %106, %107 : vector<1x128xi32>
    %cst_21 = arith.constant 1.280000e+02 : f32
    %109 = vector.broadcast %cst_21 : f32 to vector<1x128xf32>
    %110 = arith.select %108, %7, %109 : vector<1x128xi1>, vector<1x128xf32>
    %111 = vector.shape_cast %110 : vector<1x128xf32> to vector<1x1x128xf32>
    %cst_22 = arith.constant dense<0x7F800000> : vector<1xf32>
    %112 = vector.multi_reduction <minimumf>, %111, %cst_22 [1, 2] : vector<1x1x128xf32> to vector<1xf32>
    %113 = vector.shape_cast %112 : vector<1xf32> to vector<1x1x1xf32>
    %114 = vector.extract %113[0, 0, 0] : f32 from vector<1x1x1xf32>
    %cst_23 = arith.constant 1.280000e+02 : f32
    %cst_24 = arith.constant 1.280000e+02 : f32
    %c0_i32_25 = arith.constant 0 : i32
    %115:3 = scf.while (%arg5 = %c0_i32_25, %arg6 = %114, %arg7 = %106) : (i32, f32, vector<1x128xi32>) -> (i32, f32, vector<1x128xi32>) {
      %287 = arith.cmpf olt, %arg6, %cst_23 : f32
      %288 = arith.cmpi slt, %arg5, %1 : i32
      %289 = arith.andi %287, %288 : i1
      scf.condition(%289) %arg5, %arg6, %arg7 : i32, f32, vector<1x128xi32>
    } do {
    ^bb0(%arg5: i32, %arg6: f32, %arg7: vector<1x128xi32>):
      %cst_71 = arith.constant 1.000000e+00 : f32
      %287 = arith.subf %cst_24, %cst_71 : f32
      %288 = arith.minimumf %arg6, %287 : f32
      %289 = arith.fptosi %288 : f32 to i32
      %290 = arith.index_cast %289 : i32 to index
      %c0_72 = arith.constant 0 : index
      %291 = vector.load %arg4[%290, %c0_72] : memref<128x128xf32, #tpu.memory_space<vmem>>, vector<1x128xf32>
      %cst_73 = arith.constant 5.000000e-01 : f32
      %292 = vector.broadcast %cst_73 : f32 to vector<1x128xf32>
      %293 = arith.cmpf ogt, %291, %292 : vector<1x128xf32>
      %294 = arith.andi %293, %10 : vector<1x128xi1>
      %c1_i32 = arith.constant 1 : i32
      %295 = arith.addi %arg5, %c1_i32 : i32
      %296 = vector.broadcast %295 : i32 to vector<1x128xi32>
      %297 = arith.select %294, %296, %arg7 : vector<1x128xi1>, vector<1x128xi32>
      %c1_i32_74 = arith.constant 1 : i32
      %298 = arith.addi %arg5, %c1_i32_74 : i32
      %c0_i32_75 = arith.constant 0 : i32
      %299 = vector.broadcast %c0_i32_75 : i32 to vector<1x128xi32>
      %300 = arith.cmpi eq, %297, %299 : vector<1x128xi32>
      %301 = vector.broadcast %cst_24 : f32 to vector<1x128xf32>
      %302 = arith.select %300, %7, %301 : vector<1x128xi1>, vector<1x128xf32>
      %303 = vector.shape_cast %302 : vector<1x128xf32> to vector<1x1x128xf32>
      %cst_76 = arith.constant dense<0x7F800000> : vector<1xf32>
      %304 = vector.multi_reduction <minimumf>, %303, %cst_76 [1, 2] : vector<1x1x128xf32> to vector<1xf32>
      %305 = vector.shape_cast %304 : vector<1xf32> to vector<1x1x1xf32>
      %306 = vector.extract %305[0, 0, 0] : f32 from vector<1x1x1xf32>
      scf.yield %298, %306, %297 : i32, f32, vector<1x128xi32>
    }
    %116 = arith.sitofp %115#2 : vector<1x128xi32> to vector<1x128xf32>
    %117 = vector.broadcast %5 : vector<1x128xi32> to vector<128x128xi32>
    %118 = vector.broadcast %6 : vector<128x1xi32> to vector<128x128xi32>
    %119 = arith.cmpi eq, %117, %118 : vector<128x128xi32>
    %cst_26 = arith.constant 0.000000e+00 : f32
    %120 = vector.shape_cast %116 : vector<1x128xf32> to vector<1x128xf32>
    %121 = vector.broadcast %120 : vector<1x128xf32> to vector<128x128xf32>
    %122 = vector.broadcast %cst_26 : f32 to vector<128x128xf32>
    %123 = arith.select %119, %121, %122 : vector<128x128xi1>, vector<128x128xf32>
    %cst_27 = arith.constant dense<0.000000e+00> : vector<128xf32>
    %124 = vector.multi_reduction <add>, %123, %cst_27 [1] : vector<128x128xf32> to vector<128xf32>
    %125 = vector.shape_cast %124 : vector<128xf32> to vector<128x1xf32>
    %cst_28 = arith.constant 1.000000e+00 : f32
    %126 = vector.broadcast %cst_28 : f32 to vector<1x128xf32>
    %127 = arith.addf %7, %126 : vector<1x128xf32>
    %128 = vector.broadcast %125 : vector<128x1xf32> to vector<128x128xf32>
    %129 = vector.broadcast %127 : vector<1x128xf32> to vector<128x128xf32>
    %130 = arith.cmpf oeq, %128, %129 : vector<128x128xf32>
    %131 = arith.extui %130 : vector<128x128xi1> to vector<128x128xi32>
    %132 = arith.sitofp %131 : vector<128x128xi32> to vector<128x128xf32>
    %133 = vector.extract_strided_slice %3 {offsets = [7, 0], sizes = [1, 128], strides = [1, 1]} : vector<8x128xf32> to vector<1x128xf32>
    %134 = vector.extract_strided_slice %4 {offsets = [0, 7], sizes = [128, 1], strides = [1, 1]} : vector<128x8xf32> to vector<128x1xf32>
    %135 = vector.extract_strided_slice %3 {offsets = [6, 0], sizes = [1, 128], strides = [1, 1]} : vector<8x128xf32> to vector<1x128xf32>
    %cst_29 = arith.constant 6.28318548 : f32
    %136 = vector.broadcast %cst_29 : f32 to vector<1x128xf32>
    %137 = arith.divf %135, %136 : vector<1x128xf32>
    %cst_30 = arith.constant 5.000000e-01 : f32
    %138 = vector.broadcast %cst_30 : f32 to vector<1x128xf32>
    %139 = arith.addf %137, %138 : vector<1x128xf32>
    %140 = math.floor %139 : vector<1x128xf32>
    %cst_31 = arith.constant 6.28318548 : f32
    %141 = vector.broadcast %cst_31 : f32 to vector<1x128xf32>
    %142 = arith.mulf %140, %141 : vector<1x128xf32>
    %143 = arith.subf %135, %142 : vector<1x128xf32>
    %144 = vector.extract_strided_slice %4 {offsets = [0, 6], sizes = [128, 1], strides = [1, 1]} : vector<128x8xf32> to vector<128x1xf32>
    %cst_32 = arith.constant 6.28318548 : f32
    %145 = vector.broadcast %cst_32 : f32 to vector<128x1xf32>
    %146 = arith.divf %144, %145 : vector<128x1xf32>
    %cst_33 = arith.constant 5.000000e-01 : f32
    %147 = vector.broadcast %cst_33 : f32 to vector<128x1xf32>
    %148 = arith.addf %146, %147 : vector<128x1xf32>
    %149 = math.floor %148 : vector<128x1xf32>
    %cst_34 = arith.constant 6.28318548 : f32
    %150 = vector.broadcast %cst_34 : f32 to vector<128x1xf32>
    %151 = arith.mulf %149, %150 : vector<128x1xf32>
    %152 = arith.subf %144, %151 : vector<128x1xf32>
    %153 = vector.broadcast %125 : vector<128x1xf32> to vector<128x128xf32>
    %154 = vector.broadcast %116 : vector<1x128xf32> to vector<128x128xf32>
    %155 = arith.cmpf oeq, %153, %154 : vector<128x128xf32>
    %cst_35 = arith.constant 1.000000e+00 : f32
    %156 = vector.broadcast %cst_35 : f32 to vector<128x1xf32>
    %157 = arith.cmpf oge, %125, %156 : vector<128x1xf32>
    %158 = vector.broadcast %157 : vector<128x1xi1> to vector<128x128xi1>
    %159 = arith.andi %155, %158 : vector<128x128xi1>
    %160 = vector.broadcast %134 : vector<128x1xf32> to vector<128x128xf32>
    %161 = vector.broadcast %133 : vector<1x128xf32> to vector<128x128xf32>
    %162 = arith.cmpf ogt, %160, %161 : vector<128x128xf32>
    %163 = vector.broadcast %134 : vector<128x1xf32> to vector<128x128xf32>
    %164 = vector.broadcast %133 : vector<1x128xf32> to vector<128x128xf32>
    %165 = arith.cmpf oeq, %163, %164 : vector<128x128xf32>
    %166 = vector.broadcast %6 : vector<128x1xi32> to vector<128x128xi32>
    %167 = vector.broadcast %5 : vector<1x128xi32> to vector<128x128xi32>
    %168 = arith.cmpi slt, %166, %167 : vector<128x128xi32>
    %169 = arith.andi %165, %168 : vector<128x128xi1>
    %170 = arith.ori %162, %169 : vector<128x128xi1>
    %171 = arith.andi %159, %170 : vector<128x128xi1>
    %172 = arith.extui %171 : vector<128x128xi1> to vector<128x128xi32>
    %173 = arith.sitofp %172 : vector<128x128xi32> to vector<128x128xf32>
    %cst_36 = arith.constant dense<0.000000e+00> : vector<128xf32>
    %174 = vector.multi_reduction <add>, %173, %cst_36 [0] : vector<128x128xf32> to vector<128xf32>
    %175 = vector.shape_cast %174 : vector<128xf32> to vector<1x128xf32>
    %cst_37 = arith.constant 1.000000e-30 : f32
    %176 = vector.broadcast %cst_37 : f32 to vector<1x128xf32>
    %177 = arith.maximumf %133, %176 : vector<1x128xf32>
    %178 = math.log %177 : vector<1x128xf32>
    %cst_38 = arith.constant 0.000000e+00 : f32
    %179 = vector.broadcast %cst_38 : f32 to vector<1x128xf32>
    %180 = arith.cmpf ogt, %133, %179 : vector<1x128xf32>
    %cst_39 = arith.constant 1.000000e+00 : f32
    %181 = vector.broadcast %cst_39 : f32 to vector<1x128xf32>
    %182 = arith.addf %175, %181 : vector<1x128xf32>
    %183 = arith.mulf %182, %178 : vector<1x128xf32>
    %184 = math.exp %183 : vector<1x128xf32>
    %cst_40 = arith.constant 0.000000e+00 : f32
    %185 = vector.broadcast %cst_40 : f32 to vector<1x128xf32>
    %186 = arith.select %180, %184, %185 : vector<1x128xi1>, vector<1x128xf32>
    %187 = math.sin %143 : vector<1x128xf32>
    %188 = math.cos %143 : vector<1x128xf32>
    %cst_41 = arith.constant 1.000000e+00 : f32
    %189 = vector.broadcast %cst_41 : f32 to vector<1x128xf32>
    %190 = vector.extract_strided_slice %3 {offsets = [0, 0], sizes = [6, 128], strides = [1, 1]} : vector<8x128xf32> to vector<6x128xf32>
    %191 = vector.broadcast %133 : vector<1x128xf32> to vector<6x128xf32>
    %192 = arith.mulf %190, %191 : vector<6x128xf32>
    %193 = arith.mulf %133, %187 : vector<1x128xf32>
    %194 = arith.mulf %133, %188 : vector<1x128xf32>
    %cst_42 = arith.constant 0.000000e+00 : f32
    %195 = vector.broadcast %cst_42 : f32 to vector<5x128xf32>
    %196 = tpu.concatenate %192, %193, %194, %133, %189, %186, %195 in 0 : vector<6x128xf32>, vector<1x128xf32>, vector<1x128xf32>, vector<1x128xf32>, vector<1x128xf32>, vector<1x128xf32>, vector<5x128xf32> -> vector<16x128xf32>
    %cst_43 = arith.constant dense<0.000000e+00> : vector<16x128xf32>
    %197 = tpu.matmul %196, %132, %cst_43 {dimension_numbers = #tpu.dot_dimension_numbers<[1], [0], [0], [1], [0, 0, 1, 1], [], []>} : vector<16x128xf32>, vector<128x128xf32>, vector<16x128xf32> -> vector<16x128xf32>
    %198 = vector.extract_strided_slice %197 {offsets = [0, 0], sizes = [6, 128], strides = [1, 1]} : vector<16x128xf32> to vector<6x128xf32>
    %199 = vector.extract_strided_slice %197 {offsets = [6, 0], sizes = [1, 128], strides = [1, 1]} : vector<16x128xf32> to vector<1x128xf32>
    %200 = vector.extract_strided_slice %197 {offsets = [7, 0], sizes = [1, 128], strides = [1, 1]} : vector<16x128xf32> to vector<1x128xf32>
    %201 = vector.extract_strided_slice %197 {offsets = [8, 0], sizes = [1, 128], strides = [1, 1]} : vector<16x128xf32> to vector<1x128xf32>
    %202 = vector.extract_strided_slice %197 {offsets = [9, 0], sizes = [1, 128], strides = [1, 1]} : vector<16x128xf32> to vector<1x128xf32>
    %203 = vector.extract_strided_slice %197 {offsets = [10, 0], sizes = [1, 128], strides = [1, 1]} : vector<16x128xf32> to vector<1x128xf32>
    %cst_44 = arith.constant 5.000000e-01 : f32
    %204 = vector.broadcast %cst_44 : f32 to vector<128x128xf32>
    %205 = arith.cmpf ogt, %132, %204 : vector<128x128xf32>
    %cst_45 = arith.constant -1.000000e+30 : f32
    %206 = vector.shape_cast %134 : vector<128x1xf32> to vector<128x1xf32>
    %207 = vector.broadcast %206 : vector<128x1xf32> to vector<128x128xf32>
    %208 = vector.broadcast %cst_45 : f32 to vector<128x128xf32>
    %209 = arith.select %205, %207, %208 : vector<128x128xi1>, vector<128x128xf32>
    %cst_46 = arith.constant dense<0xFF800000> : vector<128xf32>
    %210 = vector.multi_reduction <maximumf>, %209, %cst_46 [0] : vector<128x128xf32> to vector<128xf32>
    %211 = vector.shape_cast %210 : vector<128xf32> to vector<1x128xf32>
    %212 = vector.broadcast %211 : vector<1x128xf32> to vector<128x128xf32>
    %213 = arith.cmpf oge, %209, %212 : vector<128x128xf32>
    %cst_47 = arith.constant 1.280000e+02 : f32
    %214 = vector.shape_cast %8 : vector<128x1xf32> to vector<128x1xf32>
    %215 = vector.broadcast %214 : vector<128x1xf32> to vector<128x128xf32>
    %216 = vector.broadcast %cst_47 : f32 to vector<128x128xf32>
    %217 = arith.select %213, %215, %216 : vector<128x128xi1>, vector<128x128xf32>
    %cst_48 = arith.constant dense<0x7F800000> : vector<128xf32>
    %218 = vector.multi_reduction <minimumf>, %217, %cst_48 [0] : vector<128x128xf32> to vector<128xf32>
    %219 = vector.shape_cast %218 : vector<128xf32> to vector<1x128xf32>
    %220 = vector.broadcast %8 : vector<128x1xf32> to vector<128x128xf32>
    %221 = vector.broadcast %219 : vector<1x128xf32> to vector<128x128xf32>
    %222 = arith.cmpf oeq, %220, %221 : vector<128x128xf32>
    %223 = arith.extui %222 : vector<128x128xi1> to vector<128x128xi32>
    %224 = arith.sitofp %223 : vector<128x128xi32> to vector<128x128xf32>
    %225 = vector.broadcast %152 : vector<128x1xf32> to vector<128x128xf32>
    %226 = arith.mulf %225, %224 : vector<128x128xf32>
    %cst_49 = arith.constant dense<0.000000e+00> : vector<128xf32>
    %227 = vector.multi_reduction <add>, %226, %cst_49 [0] : vector<128x128xf32> to vector<128xf32>
    %228 = vector.shape_cast %227 : vector<128xf32> to vector<1x128xf32>
    %229 = vector.broadcast %152 : vector<128x1xf32> to vector<128x128xf32>
    %230 = vector.broadcast %228 : vector<1x128xf32> to vector<128x128xf32>
    %231 = arith.subf %229, %230 : vector<128x128xf32>
    %232 = math.absf %231 : vector<128x128xf32>
    %cst_50 = arith.constant 3.14159274 : f32
    %233 = vector.broadcast %cst_50 : f32 to vector<128x128xf32>
    %234 = arith.cmpf ogt, %232, %233 : vector<128x128xf32>
    %cst_51 = arith.constant 6.28318548 : f32
    %235 = vector.broadcast %cst_51 : f32 to vector<128x128xf32>
    %236 = arith.subf %235, %232 : vector<128x128xf32>
    %237 = arith.select %234, %236, %232 : vector<128x128xi1>, vector<128x128xf32>
    %cst_52 = arith.constant 1.57079637 : f32
    %238 = vector.broadcast %cst_52 : f32 to vector<128x128xf32>
    %239 = arith.cmpf ogt, %237, %238 : vector<128x128xf32>
    %cst_53 = arith.constant 0.000000e+00 : f32
    %240 = vector.broadcast %cst_53 : f32 to vector<128x128xf32>
    %241 = arith.select %239, %132, %240 : vector<128x128xi1>, vector<128x128xf32>
    %242 = vector.extract_strided_slice %196 {offsets = [6, 0], sizes = [8, 128], strides = [1, 1]} : vector<16x128xf32> to vector<8x128xf32>
    %cst_54 = arith.constant dense<0.000000e+00> : vector<8x128xf32>
    %243 = tpu.matmul %242, %241, %cst_54 {dimension_numbers = #tpu.dot_dimension_numbers<[1], [0], [0], [1], [0, 0, 1, 1], [], []>} : vector<8x128xf32>, vector<128x128xf32>, vector<8x128xf32> -> vector<8x128xf32>
    %244 = vector.extract_strided_slice %243 {offsets = [0, 0], sizes = [1, 128], strides = [1, 1]} : vector<8x128xf32> to vector<1x128xf32>
    %245 = vector.extract_strided_slice %243 {offsets = [1, 0], sizes = [1, 128], strides = [1, 1]} : vector<8x128xf32> to vector<1x128xf32>
    %246 = vector.extract_strided_slice %243 {offsets = [2, 0], sizes = [1, 128], strides = [1, 1]} : vector<8x128xf32> to vector<1x128xf32>
    %247 = arith.subf %201, %246 : vector<1x128xf32>
    %248 = arith.cmpf ole, %246, %247 : vector<1x128xf32>
    %249 = arith.subf %199, %244 : vector<1x128xf32>
    %250 = arith.select %248, %244, %249 : vector<1x128xi1>, vector<1x128xf32>
    %251 = arith.subf %200, %245 : vector<1x128xf32>
    %252 = arith.select %248, %245, %251 : vector<1x128xi1>, vector<1x128xf32>
    %cst_55 = arith.constant 9.99999996E-13 : f32
    %253 = vector.broadcast %cst_55 : f32 to vector<1x128xf32>
    %254 = arith.maximumf %201, %253 : vector<1x128xf32>
    %255 = tpu.reciprocal %254 {approx = true} : vector<1x128xf32> -> vector<1x128xf32>
    %256 = vector.broadcast %255 : vector<1x128xf32> to vector<6x128xf32>
    %257 = arith.mulf %198, %256 : vector<6x128xf32>
    %c0_56 = arith.constant 0 : index
    %c0_57 = arith.constant 0 : index
    %c0_58 = arith.constant 0 : index
    %258 = vector.load %arg3[%c0_56, %c0_57, %c0_58] : memref<1x10x128xf32, #tpu.memory_space<vmem>>, vector<1x6x128xf32>
    %259 = vector.shape_cast %258 : vector<1x6x128xf32> to vector<6x128xf32>
    %260 = vector.shape_cast %257 : vector<6x128xf32> to vector<1x6x128xf32>
    tpu.vector_store %arg3[%c0_56, %c0_57, %c0_58], %260 {strides = array<i32>} : memref<1x10x128xf32, #tpu.memory_space<vmem>>, vector<1x6x128xf32>,
    %cst_59 = arith.constant 2.000000e+00 : f32
    %261 = vector.broadcast %cst_59 : f32 to vector<1x128xf32>
    %262 = arith.mulf %261, %250 : vector<1x128xf32>
    %263 = arith.subf %199, %262 : vector<1x128xf32>
    %264 = arith.mulf %263, %255 : vector<1x128xf32>
    %c0_60 = arith.constant 0 : index
    %c6 = arith.constant 6 : index
    %c0_61 = arith.constant 0 : index
    %265 = vector.load %arg3[%c0_60, %c6, %c0_61] : memref<1x10x128xf32, #tpu.memory_space<vmem>>, vector<1x1x128xf32>
    %266 = vector.shape_cast %265 : vector<1x1x128xf32> to vector<1x128xf32>
    %267 = vector.shape_cast %264 : vector<1x128xf32> to vector<1x1x128xf32>
    tpu.vector_store %arg3[%c0_60, %c6, %c0_61], %267 {strides = array<i32>} : memref<1x10x128xf32, #tpu.memory_space<vmem>>, vector<1x1x128xf32>,
    %cst_62 = arith.constant 2.000000e+00 : f32
    %268 = vector.broadcast %cst_62 : f32 to vector<1x128xf32>
    %269 = arith.mulf %268, %252 : vector<1x128xf32>
    %270 = arith.subf %200, %269 : vector<1x128xf32>
    %271 = arith.mulf %270, %255 : vector<1x128xf32>
    %c0_63 = arith.constant 0 : index
    %c7 = arith.constant 7 : index
    %c0_64 = arith.constant 0 : index
    %272 = vector.load %arg3[%c0_63, %c7, %c0_64] : memref<1x10x128xf32, #tpu.memory_space<vmem>>, vector<1x1x128xf32>
    %273 = vector.shape_cast %272 : vector<1x1x128xf32> to vector<1x128xf32>
    %274 = vector.shape_cast %271 : vector<1x128xf32> to vector<1x1x128xf32>
    tpu.vector_store %arg3[%c0_63, %c7, %c0_64], %274 {strides = array<i32>} : memref<1x10x128xf32, #tpu.memory_space<vmem>>, vector<1x1x128xf32>,
    %cst_65 = arith.constant 1.000000e+00 : f32
    %275 = vector.broadcast %cst_65 : f32 to vector<1x128xf32>
    %276 = arith.minimumf %203, %275 : vector<1x128xf32>
    %c0_66 = arith.constant 0 : index
    %c8 = arith.constant 8 : index
    %c0_67 = arith.constant 0 : index
    %277 = vector.load %arg3[%c0_66, %c8, %c0_67] : memref<1x10x128xf32, #tpu.memory_space<vmem>>, vector<1x1x128xf32>
    %278 = vector.shape_cast %277 : vector<1x1x128xf32> to vector<1x128xf32>
    %279 = vector.shape_cast %276 : vector<1x128xf32> to vector<1x1x128xf32>
    tpu.vector_store %arg3[%c0_66, %c8, %c0_67], %279 {strides = array<i32>} : memref<1x10x128xf32, #tpu.memory_space<vmem>>, vector<1x1x128xf32>,
    %cst_68 = arith.constant 5.000000e-01 : f32
    %280 = vector.broadcast %cst_68 : f32 to vector<1x128xf32>
    %281 = arith.cmpf ogt, %202, %280 : vector<1x128xf32>
    %282 = arith.extui %281 : vector<1x128xi1> to vector<1x128xi32>
    %283 = arith.sitofp %282 : vector<1x128xi32> to vector<1x128xf32>
    %c0_69 = arith.constant 0 : index
    %c9 = arith.constant 9 : index
    %c0_70 = arith.constant 0 : index
    %284 = vector.load %arg3[%c0_69, %c9, %c0_70] : memref<1x10x128xf32, #tpu.memory_space<vmem>>, vector<1x1x128xf32>
    %285 = vector.shape_cast %284 : vector<1x1x128xf32> to vector<1x128xf32>
    %286 = vector.shape_cast %283 : vector<1x128xf32> to vector<1x1x128xf32>
    tpu.vector_store %arg3[%c0_69, %c9, %c0_70], %286 {strides = array<i32>} : memref<1x10x128xf32, #tpu.memory_space<vmem>>, vector<1x1x128xf32>,
    return
  }
  func.func @transform_0(%arg0: i32, %arg1: memref<2xi32, #tpu.memory_space<smem>>) -> (i32, i32, i32) {
    %c0_i32 = arith.constant 0 : i32
    %c0_i32_0 = arith.constant 0 : i32
    %c0_i32_1 = arith.constant 0 : i32
    return %arg0, %c0_i32, %c0_i32_0 : i32, i32, i32
  }
  func.func @transform_1(%arg0: i32, %arg1: memref<2xi32, #tpu.memory_space<smem>>) -> (i32, i32, i32) {
    %c0_i32 = arith.constant 0 : i32
    %c0_i32_0 = arith.constant 0 : i32
    %c0_i32_1 = arith.constant 0 : i32
    return %arg0, %c0_i32, %c0_i32_0 : i32, i32, i32
  }
}

</mosaic_0001>

<bundles_post_ra>
// kernel: _matcher_batched.1
= control target key start
LH: loop header
LB: loop body
LE: loop exit
PB: predicated region body
PF: predicated region fallthrough
CT: control target
= control target key end

     0   :  { %s6006_s0 = inlined_call_operand.vmem [shape: s32[2], index: 0, kind: input, shape index: {}]   ;;  %s6007_s1 = inlined_call_operand.hbm [shape: f32[2,8,128], index: 1, kind: input, shape index: {}]   ;;  %s6008_s2 = inlined_call_operand.vmem [shape: f32[2,10,128], index: 2, kind: output, shape index: {}]  }
   0x1   :  { %s7_s11 = sshll.u32 %s6006_s0, 4  ;;  %s8_s11 = int_to_ptr.vmem [resolvable:$true] %s7_s11 }
   0x2   :  { %s3490_s12 = scalar_lea.vmem %s8_s11, 16  ;;  %p3495_p1 = scmp.lt.s32.totalorder %s8_s11, %s8_s11 }
   0x3   :  { %p3491_p0 = scmp.ne.s32.totalorder %s8_s11, %s3490_s12  ;;  %p3496_p2 = scmp.lt.s32.totalorder %s3490_s12, %s3490_s12 }
   0x5   :  { %p3497_p3 = por %p3496_p2, %p3495_p1 }
   0x7   :  { %p3498_p4 = pnand %p3497_p3, %p3491_p0 }
   0x9   :  { %3501 = shalt.err (!%p3498_p4)  }
   0xa   :  { %s3602_s13 = smov [#allocation4]  }
   0xb   :  { %10 = dma.vmem_to_smem %s8_s11, 16, %s3602_s13, [#allocation3] }
   0xc   :  { %3564 = dma.done.wait [#allocation3], 16 }
   0xd   :  { %3565 = vsyncadd [#allocation3], 4294967280 }
   0xe   :  { %12 = sfence }
   0xf   :  { %13 = vsyncpa [#allocation6], 0 }
  0x10   :  { %15 = vsyncpa [#allocation6 + $0x1], 0  ;;  %s3644_s14 = smov 0   ;;  %s3646_s15 = smov 0  }
  0x11   :  { %s3648_s0 = smov 0   ;;  %s3650_s16 = smov 0  }
  0x12 LB: > { %s3663_s17 = sadd.s32 4294967295, %s3584_s16   ;;  %s3666_s18 = sadd.s32 1, %s3584_s16   ;;  %s3584_s16 = sphi %s3650_s16, %s6469_s16   ;;  %s3580_s0 = sphi %s3648_s0, %s6468_s0   ;;  %s3576_s15 = sphi %s3646_s15, %s6467_s15   ;;  %s3572_s14 = sphi %s3644_s14, %s6466_s14  }
  0x13   : > { %s25_s19 = ssub.s32 %s3584_s16, %s3666_s18  ;;  %s28_s20 = sadd.s32 1, %s3580_s0 }
  0x14   : > { %p26_p5 = scmp.eq.s32.totalorder %s25_s19, 0  ;;  %p35_p6 = scmp.ne.s32.totalorder %s3580_s0, %s3576_s15 }
  0x15   : > { %p36_p7 = scmp.eq.s32.totalorder %s3584_s16, 0  ;;  %p41_p8 = scmp.ne.s32.totalorder %s3576_s15, %s3572_s14 }
  0x16   : > { %s3676_s21 = scalar_select %p26_p5, %s3580_s0, %s28_s20  }
  0x17   : > { %p37_p9 = por %p36_p7, %p35_p6  ;;  %p42_p10 = scmp.eq.s32.totalorder %s3663_s17, 0 }
  0x18   : > { %p3347_p11 = scmp.lt.s32.totalorder %s3584_s16, 2  ;;  %s91_s23 = sand.u32 1, %s3580_s0  }
  0x19   : > { %p3680_p12 = por %p42_p10, %p41_p8  ;;  %s3043_s24 = sshll.u32 %s91_s23, 3 }
  0x1a   : > { %s3044_s25 = sshll.u32 %s3584_s16, 7  ;;  %s95_s29 = scalar_lea.vmem [#allocation5], %s3043_s24 }
  0x1b   : > { %s3689_s28 = scalar_lea.hbm %s6007_s1, %s3044_s25  ;;  %s102_s30 = sshll.u32 %s95_s29, 4  ;;  %s3691_s30 = int_to_ptr.vmem [resolvable:$true] %s102_s30 }
  0x1c   : > { %p3693_p13 = pnand %p3347_p11, %p37_p9  ;;  %s92_s4 = scalar_lea.sflag [#allocation6], %s91_s23 }
  0x1d   : > { %s3502_s5 = scalar_lea.hbm %s3689_s28, 128  ;;  %s3507_s8 = scalar_lea.hbm %s6007_s1, 256 }
  0x1e   : > { %p3503_p2 = scmp.ne.s32.totalorder %s3689_s28, %s3502_s5  ;;  %p3504_p3 = pneg %p3693_p13 }
  0x1f   : > { %p3508_p6 = scmp.lt.u32.totalorder %s3689_s28, %s6007_s1  ;;  %p3509_p7 = scmp.lt.u32.totalorder %s3507_s8, %s3502_s5 }
  0x20   : > { %p3505_p4 = pnand %p3504_p3, %p3503_p2  ;;  %p3511_p9 = scmp.lt.u32.totalorder %s3502_s5, %s3689_s28 }
  0x21   : > { %p3510_p8 = por %p3509_p7, %p3508_p6 }
  0x22   : > { %p3506_p5 = pneg %p3505_p4 }
  0x23   : > { %p3512_p10 = por %p3511_p9, %p3510_p8 }
  0x25   : > { %p3513_p11 = pnand %p3512_p10, %p3506_p5 }
  0x27   : > { %3516 = shalt.err (!%p3513_p11)
}
  0x28   : > { %s3517_s11 = scalar_lea.vmem %s3691_s30, 128  ;;  %s3603_s12 = smov [#allocation5]  }
  0x29   : > { %p3518_p2 = scmp.ne.s32.totalorder %s3691_s30, %s3517_s11  ;;  %s3522_s13 = sshll.u32 %s3603_s12, 4  ;;  %s3523_s13 = int_to_ptr.vmem [resolvable:$false] %s3522_s13 }
  0x2a   : > { %s3524_s14 = scalar_lea.vmem %s3523_s13, 256  ;;  %p3525_p1 = scmp.lt.s32.totalorder %s3691_s30, %s3523_s13 }
  0x2b   : > { %p3520_p4 = pnand %p3518_p2, %p3504_p3  ;;  %p3526_p6 = scmp.lt.s32.totalorder %s3524_s14, %s3517_s11 }
  0x2d   : > { %p3521_p0 = pneg %p3520_p4  ;;  %p3527_p7 = por %p3526_p6, %p3525_p1 }
  0x2f   : > { %p3528_p8 = pnand %p3527_p7, %p3521_p0 }
  0x31   : > { %3531 = shalt.err (!%p3528_p8)
}
  0x32   : > { %3346 = dma.hbm_to_vmem [thread:$0]  (!%p3693_p13), %s3689_s28, 128, %s3691_s30, %s92_s4  }
  0x33   : > { %p6095_p5 = scmp.lt.s32.totalorder %s3584_s16, 3  ;;  %p6096_p9 = scmp.ge.s32.totalorder %s3584_s16, 1 }
  0x35   : > { %p108_p3 = pnand %p6096_p9, %p6095_p5 }
  0x37   : > { %111 = sbr.rel (%p108_p3) target bundleno = 1848 (0x738), region = 24 }
  0x3e   : > { %s113_s19 = sand.u32 1, %s3576_s15  }
  0x3f   : > { %s3729_s20 = sshll.u32 %s113_s19, 3  ;;  %s114_s23 = scalar_lea.sflag [#allocation6], %s113_s19 }
  0x40   : > { %s117_s24 = scalar_lea.vmem [#allocation5], %s3729_s20 }
  0x41   : > { %3567 = dma.done.wait (%p3680_p12), %s114_s23, 128  }
  0x42   : > { %3569 = vsyncadd (%p3680_p12), %s114_s23, 4294967168  ;;  %v3738_v0 = vld [vmem:[%s117_s24] sm:$0xff]  ;;  %v3604_v1 = vmov 0   ;;  %v3605_v2 = vmov 1   ;;  %s3606_s16 = smov 125   ;;  %s3607_s22 = smov 123  }
  0x43   : > { %6097 = vst [vmem:[#allocation9_spill] sm:$0xff] %v3738_v0  ;;  %143 = vxpose.xlu0.b32.start.end [1/1] (short) %v3738_v0, 128  ;;  %3435 = vset.pattern.permute.xlu1 %v3604_v1  ;;  %s3608_s25 = smov 127   ;;  %s4241_s26 = sld [smem:[#allocation4 + %s3663_s17]] }
  0x44   : > { %s3610_s27 = smov 126   ;;  %p136_p12 = scmp.lt.s32.totalorder %s3663_s17, 1 }
  0x46   : > { %s6471_s17 = smov (!%p136_p12, %s3663_s17), 1 }
  0x47   : > { %s3158_s28 = sshll.u32 %s6471_s17, 4 }
  0x48   : > { %s4522_s3 = scalar_lea.vmem %s6008_s2, %s3158_s28 }
  0x49   : > { %p3065_p0 = scmp.gt.s32.totalorder %s4241_s26, 0 }
  0x6c   : > { %3437 = vset.pattern.permute.xlu0 %v3605_v2 }
  0xc3   : > { %v3743_v3 = vpop.trf.xlu0 }
  0xc4   : > { %6098 = vst [vmem:[#allocation10_spill] sm:$0xff] %v3743_v3  ;;  %v213_v4 = vmul.f32 0.5, %v3743_v3 }
  0xc6   : > { %563 = vrot.lane.b32.xlu1 %v213_v4, %s3606_s16  ;;  %245 = vrot.lane.b32.xlu0 %v213_v4, %s3607_s22 }
  0xc7   : > { %v3748_v5 = vpop.trf.xlu0 }
  0xc8   : > { %v214_v6 = vmul.f32 0.5, %v3748_v5 }
  0xca   : > { %565 = vrot.lane.b32.xlu0 %v214_v6, %s3606_s16  ;;  %247 = vrot.lane.b32.xlu1 %v214_v6, %s3607_s22 }
  0xcb   : > { %v3753_v7 = vpop.trf.xlu0 }
  0xcc   : > { %v215_v8 = vmul.f32 0.5, %v3753_v7 }
  0xce   : > { %249 = vrot.lane.b32.xlu1 %v215_v8, %s3607_s22 }
  0xcf   : > { %v3757_v9 = vpop.trf.xlu0 }
  0xd0   : > { %6099 = vst [vmem:[#allocation11_spill] sm:$0xff] %v3757_v9  ;;  %v216_v10 = vmul.f32 0.5, %v3757_v9 }
  0xd2   : > { %567 = vrot.lane.b32.xlu1 %v215_v8, %s3606_s16  ;;  %569 = vrot.lane.b32.xlu0 %v216_v10, %s3606_s16 }
  0xd3   : > { %v3762_v11 = vpop.trf.xlu0 }
  0xd4   : > { %v217_v12 = vmul.f32 0.5, %v3762_v11 }
  0xd6   : > { %251 = vrot.lane.b32.xlu1 %v216_v10, %s3607_s22 }
  0xd7   : > { %v3766_v13 = vpop.trf.xlu0 }
  0xd8   : > { %6100 = vst [vmem:[#allocation12_spill] sm:$0xff] %v3766_v13  ;;  %v218_v14 = vmul.f32 0.5, %v3766_v13 }
  0xda   : > { %253 = vrot.lane.b32.xlu1 %v217_v12, %s3607_s22  ;;  %573 = vrot.lane.b32.xlu0 %v218_v14, %s3606_s16 }
  0xdb   : > { %v3771_v15 = vpop.trf.xlu0 }
  0xdc   : > { %6101 = vst [vmem:[#allocation13_spill] sm:$0xff] %v3771_v15  ;;  %v3783_v18 = vmul.f32 0.5, %v3771_v15 }
  0xde   : > { %571 = vrot.lane.b32.xlu1 %v217_v12, %s3606_s16 }
  0xdf   : > { %v3774_v16 = vpop.trf.xlu0 }
  0xe0   : > { %6102 = vst [vmem:[#allocation14_spill] sm:$0xff] %v3774_v16  ;;  %v3777_v17 = vmul.f32 0.5, %v3774_v16 }
  0xe2   : > { %255 = vrot.lane.b32.xlu1 %v218_v14, %s3607_s22  ;;  %577 = vrot.lane.b32.xlu0 %v3777_v17, %s3606_s16 }
  0xe3   : > { %v3785_v19 = vpop.trf.xlu0 }
  0xe4   : > { %6103 = vst [vmem:[#allocation15_spill] sm:$0xff] %v3785_v19  ;;  %v3803_v23 = vmul.f32 0.5, %v3785_v19 }
  0xe6   : > { %257 = vrot.lane.b32.xlu1 %v3783_v18, %s3607_s22 }
  0xe7   : > { %v3789_v20 = vpop.trf.xlu0 }
  0xe8   : > { %6104 = vst [vmem:[#allocation16_spill] sm:$0xff] %v3789_v20  ;;  %v3792_v21 = vmul.f32 0.5, %v3789_v20 }
  0xea   : > { %575 = vrot.lane.b32.xlu1 %v3783_v18, %s3606_s16  ;;  %581 = vrot.lane.b32.xlu0 %v3792_v21, %s3606_s16 }
  0xeb   : > { %v3798_v22 = vpop.trf.xlu0 }
  0xec   : > { %6105 = vst [vmem:[#allocation17_spill] sm:$0xff] %v3798_v22  ;;  %v3828_v29 = vmul.f32 0.5, %v3798_v22 }
  0xee   : > { %259 = vrot.lane.b32.xlu1 %v3777_v17, %s3607_s22 }
  0xef   : > { %v3805_v24 = vpop.trf.xlu0 }
  0xf0   : > { %6106 = vst [vmem:[#allocation18_spill] sm:$0xff] %v3805_v24  ;;  %v3808_v25 = vmul.f32 0.5, %v3805_v24 }
  0xf2   : > { %261 = vrot.lane.b32.xlu1 %v3803_v23, %s3607_s22  ;;  %585 = vrot.lane.b32.xlu0 %v3808_v25, %s3606_s16 }
  0xf3   : > { %v3814_v26 = vpop.trf.xlu0 }
  0xf4   : > { %6107 = vst [vmem:[#allocation19_spill] sm:$0xff] %v3814_v26  ;;  %v3848_v33 = vmul.f32 0.5, %v3814_v26 }
  0xf6   : > { %579 = vrot.lane.b32.xlu1 %v3803_v23, %s3606_s16 }
  0xf7   : > { %v3818_v27 = vpop.trf.xlu0 }
  0xf8   : > { %6108 = vst [vmem:[#allocation20_spill] sm:$0xff] %v3818_v27  ;;  %v3821_v28 = vmul.f32 0.5, %v3818_v27 }
  0xfa   : > { %263 = vrot.lane.b32.xlu1 %v3792_v21, %s3607_s22  ;;  %589 = vrot.lane.b32.xlu0 %v3821_v28, %s3606_s16 }
  0xfb   : > { %v3830_v30 = vpop.trf.xlu0 }
  0xfc   : > { %6109 = vst [vmem:[#allocation21_spill] sm:$0xff] %v3830_v30  ;;  %v3859_v34 = vmul.f32 0.5, %v3830_v30 }
  0xfe   : > { %265 = vrot.lane.b32.xlu1 %v3828_v29, %s3607_s22  ;;  %879 = vrot.lane.b32.xlu0 %v213_v4, %s3608_s25 }
  0xff   : > { %v3835_v31 = vpop.trf.xlu0 }
 0x100   : > { %6110 = vst [vmem:[#allocation22_spill] sm:$0xff] %v3835_v31  ;;  %v3838_v32 = vmul.f32 0.5, %v3835_v31 }
 0x102   : > { %583 = vrot.lane.b32.xlu1 %v3828_v29, %s3606_s16  ;;  %593 = vrot.lane.b32.xlu0 %v3838_v32, %s3606_s16 }
 0x106   : > { %267 = vrot.lane.b32.xlu1 %v3808_v25, %s3607_s22  ;;  %883 = vrot.lane.b32.xlu0 %v215_v8, %s3608_s25 }
 0x10a   : > { %269 = vrot.lane.b32.xlu1 %v3848_v33, %s3607_s22  ;;  %887 = vrot.lane.b32.xlu0 %v217_v12, %s3608_s25 }
 0x10e   : > { %587 = vrot.lane.b32.xlu1 %v3848_v33, %s3606_s16 }
 0x112   : > { %271 = vrot.lane.b32.xlu1 %v3821_v28, %s3607_s22 }
 0x116   : > { %881 = vrot.lane.b32.xlu1 %v214_v6, %s3608_s25 }
 0x11a   : > { %273 = vrot.lane.b32.xlu1 %v3859_v34, %s3607_s22 }
 0x11e   : > { %591 = vrot.lane.b32.xlu1 %v3859_v34, %s3606_s16 }
 0x122   : > { %275 = vrot.lane.b32.xlu1 %v3838_v32, %s3607_s22 }
 0x126   : > { %885 = vrot.lane.b32.xlu1 %v216_v10, %s3608_s25 }
 0x12a   : > { %889 = vrot.lane.b32.xlu1 %v218_v14, %s3608_s25 }
 0x138   : > { %v564_v35 = vpop.permute.xlu1 %563  ;;  %v246_v36 = vpop.permute.xlu0 %245 }
 0x139   : > { %v730_v37 = vsub.f32 %v3743_v3, %v564_v35  ;;  %v293_v38 = vadd.f32 %v246_v36, %v3743_v3  ;;  %v414_v40 = vsub.f32 %v3743_v3, %v246_v36  ;;  %v611_v44 = vadd.f32 %v564_v35, %v3743_v3 }
 0x13b   : > { %749 = vperm.xlu0 %3437, %v730_v37   ;;  %316 = vperm.xlu1 %3435, %v293_v38  }
 0x13c   : > { %v248_v39 = vpop.permute.xlu1 %247  ;;  %v566_v42 = vpop.permute.xlu0 %565 }
 0x13d   : > { %v415_v41 = vsub.f32 %v3748_v5, %v248_v39  ;;  %v612_v45 = vadd.f32 %v566_v42, %v3748_v5  ;;  %v294_v47 = vadd.f32 %v248_v39, %v3748_v5  ;;  %v731_v50 = vsub.f32 %v3748_v5, %v566_v42 }
 0x13f   : > { %3439 = vset.pattern.permute.xlu0 %v3604_v1  ;;  %433 = vperm.xlu1 %3435, %v414_v40  }
 0x140   : > { %v250_v43 = vpop.permute.xlu1 %249  ;;  %438 = vperm.xlu0 %3439, %v415_v41  }
 0x141   : > { %v295_v54 = vadd.f32 %v250_v43, %v3753_v7  ;;  %v416_v57 = vsub.f32 %v3753_v7, %v250_v43 }
 0x143   : > { %3436 = vset.pattern.permute.xlu1 %v3605_v2 }
 0x144   : > { %v568_v46 = vpop.permute.xlu1 %567  ;;  %3440 = vset.pattern.permute.xlu0 %v3605_v2  ;;  %632 = vperm.xlu1 %3436, %v611_v44   ;;  %v570_v8 = vpop.permute.xlu0 %569 }
 0x145   : > { %637 = vperm.xlu0 %3440, %v612_v45   ;;  %v732_v48 = vsub.f32 %v3753_v7, %v568_v46  ;;  %v613_v60 = vadd.f32 %v568_v46, %v3753_v7  ;;  %v614_v10 = vadd.f32 %v570_v8, %v3757_v9  ;;  %v733_v35 = vsub.f32 %v3757_v9, %v570_v8 }
 0x148   : > { %v252_v49 = vpop.permute.xlu1 %251  ;;  %3438 = vset.pattern.permute.xlu1 %v3604_v1 }
 0x149   : > { %321 = vperm.xlu1 %3438, %v294_v47   ;;  %759 = vperm.xlu0 %3440, %v732_v48   ;;  %v417_v52 = vsub.f32 %v3757_v9, %v252_v49  ;;  %v296_v63 = vadd.f32 %v252_v49, %v3757_v9 }
 0x14c   : > { %v254_v51 = vpop.permute.xlu1 %253  ;;  %v574_v46 = vpop.permute.xlu0 %573 }
 0x14d   : > { %3441 = vset.pattern.permute.xlu1 %v3605_v2  ;;  %3445 = vset.pattern.permute.xlu0 %v3604_v1  ;;  %v297_v39 = vadd.f32 %v254_v51, %v3762_v11  ;;  %v418_v42 = vsub.f32 %v3762_v11, %v254_v51  ;;  %v616_v49 = vadd.f32 %v574_v46, %v3766_v13 }
 0x14e   : > { %754 = vperm.xlu1 %3441, %v731_v50   ;;  %448 = vperm.xlu0 %3445, %v417_v52   ;;  %v735_v52 = vsub.f32 %v3766_v13, %v574_v46 }
 0x150   : > { %v572_v53 = vpop.permute.xlu1 %571 }
 0x151   : > { %v615_v55 = vadd.f32 %v572_v53, %v3762_v11  ;;  %v734_v58 = vsub.f32 %v3762_v11, %v572_v53 }
 0x152   : > { %3442 = vset.pattern.permute.xlu1 %v3604_v1  ;;  %3448 = vset.pattern.permute.xlu0 %v3605_v2 }
 0x153   : > { %326 = vperm.xlu1 %3442, %v295_v54   ;;  %652 = vperm.xlu0 %3448, %v615_v55  }
 0x154   : > { %v256_v56 = vpop.permute.xlu1 %255 }
 0x155   : > { %v419_v61 = vsub.f32 %v3766_v13, %v256_v56  ;;  %v298_v45 = vadd.f32 %v256_v56, %v3766_v13 }
 0x157   : > { %443 = vperm.xlu1 %3442, %v416_v57   ;;  %769 = vperm.xlu0 %3448, %v734_v58  }
 0x158   : > { %v3891_v59 = vpop.permute.xlu1 %257 }
 0x159   : > { %v299_v55 = vadd.f32 %v3891_v59, %v3771_v15  ;;  %v420_v57 = vsub.f32 %v3771_v15, %v3891_v59 }
 0x15b   : > { %3443 = vset.pattern.permute.xlu1 %v3605_v2  ;;  %3449 = vset.pattern.permute.xlu0 %v3604_v1 }
 0x15c   : > { %v576_v62 = vpop.permute.xlu1 %575  ;;  %642 = vperm.xlu1 %3443, %v613_v60   ;;  %458 = vperm.xlu0 %3449, %v419_v61  }
 0x15d   : > { %v617_v4 = vadd.f32 %v576_v62, %v3771_v15  ;;  %v736_v12 = vsub.f32 %v3771_v15, %v576_v62  ;;  %v578_v62 = vpop.permute.xlu0 %577 }
 0x15e   : > { %v618_v59 = vadd.f32 %v578_v62, %v3774_v16 }
 0x160   : > { %v260_v6 = vpop.permute.xlu1 %259  ;;  %3444 = vset.pattern.permute.xlu1 %v3604_v1  ;;  %3452 = vset.pattern.permute.xlu0 %v3605_v2 }
 0x161   : > { %331 = vperm.xlu1 %3444, %v296_v63   ;;  %662 = vperm.xlu0 %3452, %v617_v4   ;;  %v421_v37 = vsub.f32 %v3774_v16, %v260_v6  ;;  %v300_v61 = vadd.f32 %v260_v6, %v3774_v16  ;;  %v737_v6 = vsub.f32 %v3774_v16, %v578_v62 }
 0x164   : > { %v3903_v14 = vpop.permute.xlu1 %261 }
 0x165   : > { %3446 = vset.pattern.permute.xlu1 %v3605_v2  ;;  %779 = vperm.xlu0 %3452, %v736_v12   ;;  %v582_v12 = vpop.permute.xlu0 %581 }
 0x166   : > { %647 = vperm.xlu1 %3446, %v614_v10  }
 0x168   : > { %v580_v36 = vpop.permute.xlu1 %579 }
 0x169   : > { %3453 = vset.pattern.permute.xlu0 %v3604_v1  ;;  %v619_v40 = vadd.f32 %v580_v36, %v3785_v19  ;;  %v738_v43 = vsub.f32 %v3785_v19, %v580_v36  ;;  %v301_v36 = vadd.f32 %v3903_v14, %v3785_v19 }
 0x16a   : > { %764 = vperm.xlu1 %3446, %v733_v35   ;;  %468 = vperm.xlu0 %3453, %v421_v37  }
 0x16c   : > { %v3909_v38 = vpop.permute.xlu1 %263 }
 0x16d   : > { %v423_v47 = vsub.f32 %v3789_v20, %v3909_v38 }
 0x16e   : > { %3447 = vset.pattern.permute.xlu1 %v3604_v1  ;;  %3456 = vset.pattern.permute.xlu0 %v3605_v2 }
 0x16f   : > { %336 = vperm.xlu1 %3447, %v297_v39   ;;  %672 = vperm.xlu0 %3456, %v619_v40   ;;  %v586_v39 = vpop.permute.xlu0 %585 }
 0x170   : > { %v3915_v41 = vpop.permute.xlu1 %265 }
 0x173   : > { %453 = vperm.xlu1 %3447, %v418_v42   ;;  %789 = vperm.xlu0 %3456, %v738_v43   ;;  %v422_v42 = vsub.f32 %v3785_v19, %v3903_v14  ;;  %v3966_v43 = vpop.permute.xlu0 %589  ;;  %v620_v14 = vadd.f32 %v582_v12, %v3789_v20 }
 0x174   : > { %v584_v44 = vpop.permute.xlu1 %583 }
 0x175   : > { %v621_v50 = vadd.f32 %v584_v44, %v3798_v22  ;;  %v740_v53 = vsub.f32 %v3798_v22, %v584_v44 }
 0x177   : > { %341 = vperm.xlu1 %3447, %v298_v45   ;;  %3457 = vset.pattern.permute.xlu0 %v3604_v1  ;;  %v302_v45 = vadd.f32 %v3909_v38, %v3789_v20 }
 0x178   : > { %v3923_v48 = vpop.permute.xlu1 %267  ;;  %478 = vperm.xlu0 %3457, %v423_v47   ;;  %v3971_v47 = vpop.permute.xlu0 %879 }
 0x179   : > { %v425_v56 = vsub.f32 %v3805_v24, %v3923_v48 }
 0x17b   : > { %3450 = vset.pattern.permute.xlu1 %v3605_v2 }
 0x17c   : > { %v3928_v51 = vpop.permute.xlu1 %269  ;;  %657 = vperm.xlu1 %3450, %v616_v49   ;;  %3460 = vset.pattern.permute.xlu0 %v3605_v2  ;;  %v3979_v38 = vpop.permute.xlu0 %593 }
 0x17d   : > { %682 = vperm.xlu0 %3460, %v621_v50   ;;  %v305_v60 = vadd.f32 %v3928_v51, %v3814_v26 }
 0x180   : > { %774 = vperm.xlu1 %3450, %v735_v52   ;;  %v588_v54 = vpop.permute.xlu1 %587  ;;  %v739_v52 = vsub.f32 %v3789_v20, %v582_v12 }
 0x181   : > { %799 = vperm.xlu0 %3460, %v740_v53   ;;  %v623_v4 = vadd.f32 %v588_v54, %v3814_v26  ;;  %v742_v8 = vsub.f32 %v3814_v26, %v588_v54  ;;  %v303_v53 = vadd.f32 %v3915_v41, %v3798_v22  ;;  %v3985_v54 = vpop.permute.xlu0 %883 }
 0x184   : > { %3451 = vset.pattern.permute.xlu1 %v3604_v1  ;;  %v3941_v58 = vpop.permute.xlu1 %271 }
 0x185   : > { %346 = vperm.xlu1 %3451, %v299_v55   ;;  %3461 = vset.pattern.permute.xlu0 %v3604_v1  ;;  %v427_v35 = vsub.f32 %v3818_v27, %v3941_v58 }
 0x186   : > { %488 = vperm.xlu0 %3461, %v425_v56   ;;  %v3609_v56 = vmov 2  }
 0x188   : > { %v3946_v63 = vpop.permute.xlu1 %881 }
 0x189   : > { %463 = vperm.xlu1 %3451, %v420_v57   ;;  %v424_v57 = vsub.f32 %v3798_v22, %v3915_v41 }
 0x18a   : > { %376 = vperm.xlu0 %3461, %v305_v60   ;;  %v3995_v60 = vpop.permute.xlu0 %887 }
 0x18c   : > { %v3953_v10 = vpop.permute.xlu1 %273 }
 0x18d   : > { %351 = vperm.xlu1 %3451, %v300_v61   ;;  %v304_v61 = vadd.f32 %v3923_v48, %v3805_v24 }
 0x18e   : > { %3464 = vset.pattern.permute.xlu0 %v3605_v2 }
 0x18f   : > { %692 = vperm.xlu0 %3464, %v623_v4  }
 0x190   : > { %v592_v37 = vpop.permute.xlu1 %591 }
 0x191   : > { %3454 = vset.pattern.permute.xlu1 %v3605_v2  ;;  %v625_v40 = vadd.f32 %v592_v37, %v3830_v30  ;;  %v744_v44 = vsub.f32 %v3830_v30, %v592_v37 }
 0x192   : > { %667 = vperm.xlu1 %3454, %v618_v59   ;;  %v927_v59 = vadd.f32 %v3971_v47, %v3743_v3 }
 0x193   : > { %809 = vperm.xlu0 %3464, %v742_v8  }
 0x194   : > { %v276_v46 = vpop.permute.xlu1 %275 }
 0x195   : > { %v308_v49 = vadd.f32 %v276_v46, %v3835_v31  ;;  %v429_v50 = vsub.f32 %v3835_v31, %v276_v46  ;;  %v307_v46 = vadd.f32 %v3953_v10, %v3830_v30 }
 0x196   : > { %784 = vperm.xlu1 %3454, %v737_v6   ;;  %v426_v6 = vsub.f32 %v3814_v26, %v3928_v51 }
 0x197   : > { %3465 = vset.pattern.permute.xlu0 %v3604_v1 }
 0x198   : > { %498 = vperm.xlu0 %3465, %v427_v35   ;;  %v3987_v55 = vpop.permute.xlu1 %885 }
 0x199   : > { %v930_v12 = vadd.f32 %v3987_v55, %v3757_v9 }
 0x19a   : > { %3455 = vset.pattern.permute.xlu1 %v3604_v1 }
 0x19b   : > { %356 = vperm.xlu1 %3455, %v301_v36   ;;  %v306_v36 = vadd.f32 %v3941_v58, %v3818_v27 }
 0x19c   : > { %3468 = vset.pattern.permute.xlu0 %v3605_v2 }
 0x19d   : > { %702 = vperm.xlu0 %3468, %v625_v40  }
 0x19f   : > { %473 = vperm.xlu1 %3455, %v422_v42   ;;  %v743_v42 = vsub.f32 %v3818_v27, %v3966_v43 }
 0x1a1   : > { %819 = vperm.xlu0 %3468, %v744_v44  }
 0x1a3   : > { %361 = vperm.xlu1 %3455, %v302_v45  }
 0x1a5   : > { %3469 = vset.pattern.permute.xlu0 %v3604_v1 }
 0x1a6   : > { %391 = vperm.xlu0 %3469, %v308_v49  }
 0x1a7   : > { %3458 = vset.pattern.permute.xlu1 %v3605_v2 }
 0x1a8   : > { %677 = vperm.xlu1 %3458, %v620_v14   ;;  %v428_v14 = vsub.f32 %v3830_v30, %v3953_v10 }
 0x1aa   : > { %508 = vperm.xlu0 %3469, %v429_v50  }
 0x1ac   : > { %794 = vperm.xlu1 %3458, %v739_v52   ;;  %v626_v52 = vadd.f32 %v3979_v38, %v3835_v31 }
 0x1ae   : > { %891 = vrot.lane.b32.xlu0 %v3783_v18, %s3608_s25  ;;  %v3997_v18 = vpop.permute.xlu1 %889 }
 0x1af   : > { %3471 = vset.pattern.permute.xlu0 %v3609_v56  ;;  %v932_v37 = vadd.f32 %v3997_v18, %v3766_v13 }
 0x1b0   : > { %3459 = vset.pattern.permute.xlu1 %v3604_v1 }
 0x1b1   : > { %366 = vperm.xlu1 %3459, %v303_v53  }
 0x1b2   : > { %895 = vrot.lane.b32.xlu0 %v3803_v23, %s3608_s25  ;;  %v622_v23 = vadd.f32 %v586_v39, %v3805_v24 }
 0x1b5   : > { %483 = vperm.xlu1 %3459, %v424_v57  }
 0x1b6   : > { %899 = vrot.lane.b32.xlu0 %v3828_v29, %s3608_s25  ;;  %v741_v29 = vsub.f32 %v3805_v24, %v586_v39  ;;  %v624_v39 = vadd.f32 %v3966_v43, %v3818_v27 }
 0x1b9   : > { %371 = vperm.xlu1 %3459, %v304_v61  }
 0x1ba   : > { %v4003_v62 = vpop.permute.xlu1 %316  ;;  %v4005_v4 = vpop.permute.xlu0 %749  ;;  %903 = vrot.lane.b32.xlu0 %v3848_v33, %s3608_s25 }
 0x1bd   : > { %3462 = vset.pattern.permute.xlu1 %v3605_v2 }
 0x1be   : > { %v4011_v41 = vpop.permute.xlu1 %433  ;;  %687 = vperm.xlu1 %3462, %v622_v23   ;;  %907 = vrot.lane.b32.xlu0 %v3859_v34, %s3608_s25 }
 0x1bf   : > { %v4015_v48 = vpop.permute.xlu0 %438 }
 0x1c0   : > { %6111 = vst [vmem:[#allocation23_spill] sm:$0xff] %v4015_v48 }
 0x1c2   : > { %804 = vperm.xlu1 %3462, %v741_v29   ;;  %948 = vperm.xlu0 %3471, %v927_v59  }
 0x1c3   : > { %v4020_v33 = vpop.permute.xlu1 %632 }
 0x1c4   : > { %v4022_v8 = vpop.permute.xlu0 %637 }
 0x1c5   : > { %6112 = vst [vmem:[#allocation24_spill] sm:$0xff] %v4022_v8 }
 0x1c6   : > { %3463 = vset.pattern.permute.xlu1 %v3604_v1  ;;  %963 = vperm.xlu0 %3471, %v930_v12  }
 0x1c7   : > { %493 = vperm.xlu1 %3463, %v426_v6  }
 0x1c8   : > { %v4029_v34 = vpop.permute.xlu1 %321  ;;  %v4031_v35 = vpop.permute.xlu0 %759 }
 0x1c9   : > { %6113 = vst [vmem:[#allocation25_spill] sm:$0xff] %v4029_v34  ;;  %6114 = vst [vmem:[#allocation26_spill] sm:$0xff] %v4031_v35 }
 0x1ca   : > { %973 = vperm.xlu0 %3471, %v932_v37   ;;  %v929_v37 = vadd.f32 %v3985_v54, %v3753_v7 }
 0x1cb   : > { %381 = vperm.xlu1 %3463, %v306_v36  }
 0x1cd   : > { %v4037_v51 = vpop.permute.xlu1 %754  ;;  %v4041_v40 = vpop.permute.xlu0 %448 }
 0x1ce   : > { %6115 = vst [vmem:[#allocation27_spill] sm:$0xff] %v4037_v51  ;;  %6116 = vst [vmem:[#allocation28_spill] sm:$0xff] %v4041_v40 }
 0x1cf   : > { %3466 = vset.pattern.permute.xlu1 %v3605_v2 }
 0x1d0   : > { %697 = vperm.xlu1 %3466, %v624_v39  }
 0x1d2   : > { %v4046_v44 = vpop.permute.xlu1 %326  ;;  %v4048_v58 = vpop.permute.xlu0 %652 }
 0x1d3   : > { %6117 = vst [vmem:[#allocation29_spill] sm:$0xff] %v4046_v44  ;;  %6118 = vst [vmem:[#allocation30_spill] sm:$0xff] %v4048_v58  ;;  %v1046_v58 = vsub.f32 %v3743_v3, %v3971_v47 }
 0x1d4   : > { %814 = vperm.xlu1 %3466, %v743_v42  }
 0x1d6   : > { %v4050_v45 = vpop.permute.xlu1 %443  ;;  %v4054_v49 = vpop.permute.xlu0 %769 }
 0x1d7   : > { %6119 = vst [vmem:[#allocation31_spill] sm:$0xff] %v4050_v45  ;;  %6120 = vst [vmem:[#allocation32_spill] sm:$0xff] %v4054_v49 }
 0x1d8   : > { %3467 = vset.pattern.permute.xlu1 %v3604_v1  ;;  %v745_v1 = vsub.f32 %v3835_v31, %v3979_v38 }
 0x1d9   : > { %386 = vperm.xlu1 %3467, %v307_v46  }
 0x1db   : > { %v4059_v50 = vpop.permute.xlu1 %642  ;;  %v4061_v43 = vpop.permute.xlu0 %458 }
 0x1dc   : > { %6121 = vst [vmem:[#allocation33_spill] sm:$0xff] %v4059_v50  ;;  %6122 = vst [vmem:[#allocation34_spill] sm:$0xff] %v4061_v43 }
 0x1dd   : > { %503 = vperm.xlu1 %3467, %v428_v14  }
 0x1e0   : > { %v4065_v53 = vpop.permute.xlu1 %331  ;;  %v4067_v57 = vpop.permute.xlu0 %662 }
 0x1e1   : > { %6123 = vst [vmem:[#allocation35_spill] sm:$0xff] %v4065_v53  ;;  %6124 = vst [vmem:[#allocation36_spill] sm:$0xff] %v4067_v57  ;;  %3470 = vset.pattern.permute.xlu1 %v3605_v2 }
 0x1e2   : > { %707 = vperm.xlu1 %3470, %v626_v52  }
 0x1e4   : > { %v4072_v61 = vpop.permute.xlu0 %779 }
 0x1e5   : > { %6125 = vst [vmem:[#allocation37_spill] sm:$0xff] %v4072_v61  ;;  %v4074_v10 = vpop.permute.xlu1 %647 }
 0x1e6   : > { %6126 = vst [vmem:[#allocation38_spill] sm:$0xff] %v4074_v10  ;;  %824 = vperm.xlu1 %3470, %v745_v1  }
 0x1e9   : > { %v4076_v23 = vpop.permute.xlu1 %764  ;;  %v4078_v29 = vpop.permute.xlu0 %468 }
 0x1ea   : > { %6127 = vst [vmem:[#allocation39_spill] sm:$0xff] %v4076_v23  ;;  %6128 = vst [vmem:[#allocation40_spill] sm:$0xff] %v4078_v29  ;;  %893 = vrot.lane.b32.xlu1 %v3777_v17, %s3608_s25 }
 0x1eb   : > { %3472 = vset.pattern.permute.xlu1 %v3609_v56  ;;  %v928_v56 = vadd.f32 %v3946_v63, %v3748_v5 }
 0x1ee   : > { %v4083_v59 = vpop.permute.xlu1 %336  ;;  %897 = vrot.lane.b32.xlu1 %v3792_v21, %s3608_s25  ;;  %v4087_v2 = vpop.permute.xlu0 %672 }
 0x1ef   : > { %6129 = vst [vmem:[#allocation41_spill] sm:$0xff] %v4083_v59  ;;  %6130 = vst [vmem:[#allocation42_spill] sm:$0xff] %v4087_v2 }
 0x1f2   : > { %v4089_v38 = vpop.permute.xlu1 %453  ;;  %901 = vrot.lane.b32.xlu1 %v3808_v25, %s3608_s25  ;;  %v4093_v6 = vpop.permute.xlu0 %789 }
 0x1f3   : > { %6131 = vst [vmem:[#allocation43_spill] sm:$0xff] %v4089_v38  ;;  %6132 = vst [vmem:[#allocation44_spill] sm:$0xff] %v4093_v6 }
 0x1f6   : > { %v4095_v12 = vpop.permute.xlu1 %341  ;;  %905 = vrot.lane.b32.xlu1 %v3821_v28, %s3608_s25  ;;  %v931_v28 = vadd.f32 %v3995_v60, %v3762_v11 }
 0x1f7   : > { %6133 = vst [vmem:[#allocation45_spill] sm:$0xff] %v4095_v12  ;;  %v4099_v17 = vpop.permute.xlu0 %478 }
 0x1f8   : > { %6134 = vst [vmem:[#allocation46_spill] sm:$0xff] %v4099_v17 }
 0x1fa   : > { %909 = vrot.lane.b32.xlu1 %v3838_v32, %s3608_s25 }
 0x1fb   : > { %v4103_v21 = vpop.permute.xlu1 %657 }
 0x1fc   : > { %6135 = vst [vmem:[#allocation47_spill] sm:$0xff] %v4103_v21  ;;  %v4107_v36 = vpop.permute.xlu0 %682 }
 0x1fd   : > { %6136 = vst [vmem:[#allocation48_spill] sm:$0xff] %v4107_v36 }
 0x1fe   : > { %953 = vperm.xlu1 %3472, %v928_v56  }
 0x1ff   : > { %v4109_v25 = vpop.permute.xlu1 %774 }
 0x200   : > { %6137 = vst [vmem:[#allocation49_spill] sm:$0xff] %v4109_v25  ;;  %v4113_v39 = vpop.permute.xlu0 %799 }
 0x201   : > { %6138 = vst [vmem:[#allocation50_spill] sm:$0xff] %v4113_v39 }
 0x202   : > { %958 = vperm.xlu1 %3472, %v929_v37  }
 0x204   : > { %v4117_v32 = vpop.permute.xlu1 %346 }
 0x205   : > { %6139 = vst [vmem:[#allocation51_spill] sm:$0xff] %v4117_v32  ;;  %v4119_v42 = vpop.permute.xlu0 %488 }
 0x206   : > { %968 = vperm.xlu1 %3472, %v931_v28  }
 0x208   : > { %v4121_v46 = vpop.permute.xlu1 %463 }
 0x209   : > { %6140 = vst [vmem:[#allocation52_spill] sm:$0xff] %v4121_v46  ;;  %v4123_v14 = vpop.permute.xlu0 %376 }
 0x20c   : > { %v4125_v52 = vpop.permute.xlu1 %351 }
 0x20d   : > { %6141 = vst [vmem:[#allocation53_spill] sm:$0xff] %v4125_v52 }
 0x20e   : > { %v4127_v1 = vpop.permute.xlu0 %692 }
 0x211   : > { %v4129_v56 = vpop.permute.xlu1 %667 }
 0x212   : > { %6142 = vst [vmem:[#allocation54_spill] sm:$0xff] %v4129_v56  ;;  %v4131_v36 = vpop.permute.xlu0 %809 }
 0x215   : > { %v4133_v37 = vpop.permute.xlu1 %784 }
 0x216   : > { %6143 = vst [vmem:[#allocation55_spill] sm:$0xff] %v4133_v37 }
 0x217   : > { %v499_v39 = vpop.permute.xlu0 %498 }
 0x21a   : > { %v4135_v17 = vpop.permute.xlu1 %356 }
 0x21b   : > { %6144 = vst [vmem:[#allocation56_spill] sm:$0xff] %v4135_v17 }
 0x21c   : > { %v4137_v29 = vpop.permute.xlu0 %702 }
 0x21e   : > { %v4139_v28 = vpop.permute.xlu1 %473 }
 0x21f   : > { %6145 = vst [vmem:[#allocation57_spill] sm:$0xff] %v4139_v28 }
 0x220   : > { %v4141_v32 = vpop.permute.xlu0 %819 }
 0x222   : > { %v4143_v46 = vpop.permute.xlu1 %361 }
 0x223   : > { %6146 = vst [vmem:[#allocation58_spill] sm:$0xff] %v4143_v46 }
 0x225   : > { %v4145_v52 = vpop.permute.xlu0 %391 }
 0x227   : > { %v4147_v21 = vpop.permute.xlu1 %677 }
 0x228   : > { %6147 = vst [vmem:[#allocation59_spill] sm:$0xff] %v4147_v21 }
 0x229   : > { %v4149_v56 = vpop.permute.xlu0 %508 }
 0x22b   : > { %v4151_v12 = vpop.permute.xlu1 %794 }
 0x22c   : > { %6148 = vst [vmem:[#allocation60_spill] sm:$0xff] %v4151_v12 }
 0x22d   : > { %v892_v37 = vpop.permute.xlu0 %891 }
 0x22e   : > { %v933_v25 = vadd.f32 %v892_v37, %v3771_v15  ;;  %v1052_v48 = vsub.f32 %v3771_v15, %v892_v37 }
 0x230   : > { %v4154_v43 = vpop.permute.xlu1 %366  ;;  %978 = vperm.xlu1 %3472, %v933_v25  }
 0x231   : > { %6149 = vst [vmem:[#allocation61_spill] sm:$0xff] %v4154_v43  ;;  %v896_v59 = vpop.permute.xlu0 %895 }
 0x232   : > { %v935_v57 = vadd.f32 %v896_v59, %v3785_v19  ;;  %v1054_v51 = vsub.f32 %v3785_v19, %v896_v59 }
 0x234   : > { %v4157_v38 = vpop.permute.xlu1 %483  ;;  %988 = vperm.xlu1 %3472, %v935_v57   ;;  %v4169_v57 = vmul.f32 0.5, %v3738_v0 }
 0x235   : > { %6150 = vst [vmem:[#allocation62_spill] sm:$0xff] %v4157_v38  ;;  %v900_v46 = vpop.permute.xlu0 %899  ;;  %v6009_v38 = vlaneseq }
 0x236   : > { %v937_v61 = vadd.f32 %v900_v46, %v3798_v22  ;;  %v627_v45 = vrot.slane %v4169_v57, 3 }
 0x238   : > { %v4160_v21 = vpop.permute.xlu1 %371  ;;  %998 = vperm.xlu1 %3472, %v937_v61   ;;  %v4174_v61 = vshrl.u32 %v6009_v38, 7  ;;  %v629_v50 = vadd.f32 %v627_v45, %v3738_v0 }
 0x239   : > { %v904_v40 = vpop.permute.xlu0 %903 }
 0x23a   : > { %v939_v12 = vadd.f32 %v904_v40, %v3814_v26  ;;  %v4182_v44 = vsub.s32 0, %v4174_v61 }
 0x23c   : > { %1008 = vperm.xlu1 %3472, %v939_v12   ;;  %v311_v12 = vrot.slane %v4169_v57, 5  ;;  %6151 = vst [vmem:[#allocation63_spill] sm:$0xff] %v4182_v44 }
 0x23d   : > { %v4163_v10 = vpop.permute.xlu1 %687  ;;  %v908_v43 = vpop.permute.xlu0 %907 }
 0x23e   : > { %v941_v25 = vadd.f32 %v908_v43, %v3830_v30  ;;  %v313_v49 = vadd.f32 %v311_v12, %v3738_v0  ;;  %v430_v38 = vsub.f32 %v3738_v0, %v311_v12 }
 0x240   : > { %1018 = vperm.xlu1 %3472, %v941_v25   ;;  %v1048_v25 = vsub.f32 %v3753_v7, %v3985_v54  ;;  %v4190_v35 = vrot.slane %v313_v49, %v4182_v44  ;;  %v712_v54 = vsub.s32 1, %v4174_v61  ;;  %v4197_v8 = vrot.slane %v430_v38, %v4182_v44 }
 0x241   : > { %v4166_v53 = vpop.permute.xlu1 %804  ;;  %v1056_v44 = vsub.f32 %v3798_v22, %v900_v46 }
 0x242   : > { %v528_v49 = vmax.f32 %v499_v39, %v4197_v8  ;;  %v1058_v39 = vsub.f32 %v3814_v26, %v904_v40 }
 0x244   : > { %1065 = vperm.xlu1 %3472, %v1046_v58   ;;  %v1050_v58 = vsub.f32 %v3762_v11, %v3995_v60 }
 0x246   : > { %v4177_v23 = vpop.permute.xlu1 %493 }
 0x248   : > { %1075 = vperm.xlu1 %3472, %v1048_v25   ;;  %v746_v25 = vsub.f32 %v3738_v0, %v627_v45 }
 0x24a   : > { %v382_v47 = vpop.permute.xlu1 %381  ;;  %v4200_v12 = vrot.slane %v746_v25, %v712_v54 }
 0x24b   : > { %v411_v60 = vmin.f32 %v382_v47, %v4190_v35 }
 0x24c   : > { %1085 = vperm.xlu1 %3472, %v1050_v58   ;;  %v4202_v58 = vrot.slane %v629_v50, %v712_v54 }
 0x24d   : > { %v544_v17 = vsub.f32 %v411_v60, %v528_v49 }
 0x24f   : > { %v698_v34 = vpop.permute.xlu1 %697  ;;  %v560_v47 = vmax.f32 %v544_v17, 0.0 }
 0x250   : > { %1095 = vperm.xlu1 %3472, %v1052_v48   ;;  %v727_v45 = vmin.f32 %v698_v34, %v4202_v58  ;;  %v1060_v34 = vsub.f32 %v3830_v30, %v908_v43 }
 0x253   : > { %v815_v2 = vpop.permute.xlu1 %814 }
 0x254   : > { %v844_v37 = vmax.f32 %v815_v2, %v4200_v12  ;;  %1105 = vperm.xlu1 %3472, %v1054_v51  }
 0x256   : > { %v860_v38 = vsub.f32 %v727_v45, %v844_v37 }
 0x258   : > { %v876_v48 = vmax.f32 %v860_v38, 0.0  ;;  %v387_v25 = vpop.permute.xlu1 %386  ;;  %1115 = vperm.xlu1 %3472, %v1056_v44  }
 0x259   : > { %v412_v59 = vmin.f32 %v387_v25, %v4190_v35 }
 0x25a   : > { %v4209_v50 = vmul.f32 %v876_v48, %v560_v47 }
 0x25c   : > { %v504_v54 = vpop.permute.xlu1 %503  ;;  %1125 = vperm.xlu1 %3472, %v1058_v39  }
 0x25d   : > { %v529_v60 = vmax.f32 %v504_v54, %v4197_v8 }
 0x25f   : > { %v4215_v51 = vsub.f32 %v412_v59, %v529_v60  ;;  %v1047_v59 = vsub.f32 %v3748_v5, %v3946_v63  ;;  %v1049_v60 = vsub.f32 %v3757_v9, %v3987_v55  ;;  %v3611_v63 = vmov 3  }
 0x260   : > { %1135 = vperm.xlu1 %3472, %v1060_v34   ;;  %v6152_v34 = vlaneseq  ;;  %v3612_v55 = vmov 4294967295  }
 0x261   : > { %v708_v2 = vpop.permute.xlu1 %707 }
 0x262   : > { %v729_v17 = vmin.f32 %v708_v2, %v4202_v58  ;;  %v4250_v2 = vand.u32 127, %v6152_v34 }
 0x264   : > { %1243 = vrot.lane.b32.xlu1 %v3743_v3, %s3608_s25  ;;  %6153 = vst [vmem:[#allocation64_spill] sm:$0xff] %v4250_v2 }
 0x265   : > { %v825_v44 = vpop.permute.xlu1 %824  ;;  %3474 = vset.pattern.permute.xlu1 %v3611_v63 }
 0x266   : > { %v846_v40 = vmax.f32 %v825_v44, %v4200_v12  ;;  %v211_v44 = vstv %s4241_s26 }
 0x267   : > { %vm4258_vm0 = vcmp.lt.s32.totalorder %v4250_v2, %v211_v44  ;;  %v1028_v44 = vsub.s32 2, %v4174_v61 }
 0x268   : > { %v4221_v46 = vsub.f32 %v729_v17, %v846_v40  ;;  %1247 = vrot.lane.b32.xlu1 %v3753_v7, %s3608_s25  ;;  %v1051_v17 = vsub.f32 %v3766_v13, %v3997_v18  ;;  %v6154_v40 = vmov 0 }
 0x269   : > { %v894_v49 = vpop.permute.xlu1 %893  ;;  %v6155_v40 = vsel %vm4258_vm0, 4294967295, %v6154_v40 }
 0x26a   : > { %v934_v43 = vadd.f32 %v894_v49, %v3774_v16  ;;  %6156 = vst [vmem:[#allocation65_spill] sm:$0xff] %v6155_v40 }
 0x26c   : > { %983 = vperm.xlu0 %3471, %v934_v43   ;;  %1251 = vrot.lane.b32.xlu1 %v3762_v11, %s3608_s25  ;;  %v4266_v43 = vsel %vm4258_vm0, 0, %v3612_v55   ;;  %v4308_v55 = vcvt.s32.f32 %v4250_v2 }
 0x26d   : > { %v898_v45 = vpop.permute.xlu1 %897  ;;  %6157 = vst [vmem:[#allocation66_spill] sm:$0xff] %v4266_v43 }
 0x26e   : > { %v936_v37 = vadd.f32 %v898_v45, %v3789_v20  ;;  %v1055_v18 = vsub.f32 %v3789_v20, %v898_v45  ;;  %6158 = vst [vmem:[#allocation67_spill] sm:$0xff] %v4308_v55 }
 0x270   : > { %993 = vperm.xlu0 %3471, %v936_v37   ;;  %1255 = vrot.lane.b32.xlu1 %v3771_v15, %s3608_s25  ;;  %v1053_v37 = vsub.f32 %v3774_v16, %v894_v49 }
 0x271   : > { %v902_v38 = vpop.permute.xlu1 %901 }
 0x272   : > { %v938_v47 = vadd.f32 %v902_v38, %v3805_v24 }
 0x274   : > { %1003 = vperm.xlu0 %3471, %v938_v47   ;;  %1259 = vrot.lane.b32.xlu1 %v3785_v19, %s3608_s25  ;;  %v1057_v47 = vsub.f32 %v3805_v24, %v902_v38 }
 0x275   : > { %v906_v48 = vpop.permute.xlu1 %905 }
 0x276   : > { %v940_v25 = vadd.f32 %v906_v48, %v3818_v27 }
 0x278   : > { %1013 = vperm.xlu0 %3471, %v940_v25   ;;  %1263 = vrot.lane.b32.xlu1 %v3798_v22, %s3608_s25  ;;  %v1059_v25 = vsub.f32 %v3818_v27, %v906_v48 }
 0x279   : > { %v910_v39 = vpop.permute.xlu1 %909 }
 0x27a   : > { %v942_v54 = vadd.f32 %v910_v39, %v3835_v31  ;;  %v1061_v49 = vsub.f32 %v3835_v31, %v910_v39 }
 0x27c   : > { %1023 = vperm.xlu0 %3471, %v942_v54   ;;  %1267 = vrot.lane.b32.xlu1 %v3814_v26, %s3608_s25 }
 0x27d   : > { %v4283_v45 = vpop.permute.xlu1 %953 }
 0x280   : > { %1070 = vperm.xlu0 %3471, %v1047_v59   ;;  %1271 = vrot.lane.b32.xlu1 %v3830_v30, %s3608_s25 }
 0x281   : > { %v959_v38 = vpop.permute.xlu1 %958 }
 0x284   : > { %1080 = vperm.xlu0 %3471, %v1049_v60   ;;  %1307 = vrot.lane.b32.xlu1 %v3743_v3, %s3610_s27  ;;  %v943_v60 = vrot.slane %v4169_v57, 1 }
 0x285   : > { %v969_v48 = vpop.permute.xlu1 %968 }
 0x288   : > { %1090 = vperm.xlu0 %3471, %v1051_v17   ;;  %1311 = vrot.lane.b32.xlu1 %v3753_v7, %s3610_s27  ;;  %v945_v17 = vadd.f32 %v943_v60, %v3738_v0 }
 0x28c   : > { %1100 = vperm.xlu0 %3471, %v1053_v37   ;;  %1315 = vrot.lane.b32.xlu1 %v3762_v11, %s3610_s27 }
 0x290   : > { %1110 = vperm.xlu0 %3471, %v1055_v18   ;;  %1319 = vrot.lane.b32.xlu1 %v3771_v15, %s3610_s27  ;;  %v4312_v18 = vrot.slane %v945_v17, %v1028_v44 }
 0x294   : > { %1120 = vperm.xlu0 %3471, %v1057_v47   ;;  %1323 = vrot.lane.b32.xlu1 %v3785_v19, %s3610_s27  ;;  %v949_v47 = vpop.permute.xlu0 %948 }
 0x298   : > { %1130 = vperm.xlu0 %3471, %v1059_v25   ;;  %1327 = vrot.lane.b32.xlu1 %v3798_v22, %s3610_s27  ;;  %v1592_v25 = vsel %vm4258_vm0, %v4308_v55, 128.0 }
 0x29c   : > { %1140 = vperm.xlu0 %3471, %v1061_v49   ;;  %1331 = vrot.lane.b32.xlu1 %v3814_v26, %s3610_s27 }
 0x2a0   : > { %1245 = vrot.lane.b32.xlu0 %v3748_v5, %s3608_s25  ;;  %1335 = vrot.lane.b32.xlu1 %v3830_v30, %s3610_s27 }
 0x2a1   : > { %3473 = vset.pattern.permute.xlu0 %v3611_v63  ;;  %v1062_v63 = vsub.f32 %v3738_v0, %v943_v60  ;;  %v1030_v60 = vmin.f32 %v949_v47, %v4312_v18  ;;  %v1034_v47 = vmin.f32 %v969_v48, %v4312_v18 }
 0x2a3   : > { %v4314_v57 = vrot.slane %v1062_v63, %v1028_v44  ;;  %v1032_v44 = vmin.f32 %v959_v38, %v4312_v18 }
 0x2a4   : > { %1249 = vrot.lane.b32.xlu0 %v3757_v9, %s3608_s25 }
 0x2a8   : > { %1253 = vrot.lane.b32.xlu0 %v3766_v13, %s3608_s25 }
 0x2ac   : > { %1257 = vrot.lane.b32.xlu0 %v3774_v16, %s3608_s25 }
 0x2af   : > { %v979_v39 = vpop.permute.xlu1 %978 }
 0x2b0   : > { %1261 = vrot.lane.b32.xlu0 %v3789_v20, %s3608_s25  ;;  %v1036_v38 = vmin.f32 %v979_v39, %v4312_v18  ;;  %v843_v39 = vmax.f32 %v4131_v36, %v4200_v12 }
 0x2b3   : > { %v989_v54 = vpop.permute.xlu1 %988 }
 0x2b4   : > { %1265 = vrot.lane.b32.xlu0 %v3805_v24, %s3608_s25 }
 0x2b7   : > { %v999_v59 = vpop.permute.xlu1 %998 }
 0x2b8   : > { %1269 = vrot.lane.b32.xlu0 %v3818_v27, %s3608_s25 }
 0x2bb   : > { %v1009_v34 = vpop.permute.xlu1 %1008 }
 0x2bc   : > { %1273 = vrot.lane.b32.xlu0 %v3835_v31, %s3608_s25 }
 0x2bf   : > { %v1019_v37 = vpop.permute.xlu1 %1018 }
 0x2c0   : > { %1309 = vrot.lane.b32.xlu0 %v3748_v5, %s3610_s27 }
 0x2c3   : > { %v1066_v49 = vpop.permute.xlu1 %1065 }
 0x2c4   : > { %1313 = vrot.lane.b32.xlu0 %v3757_v9, %s3610_s27  ;;  %v1147_v0 = vmax.f32 %v1066_v49, %v4314_v57  ;;  %1593 = vmin.xlane.f32.xlu1 %v1592_v25 }
 0x2c6   : > { %v4323_v2 = vsub.f32 %v1030_v60, %v1147_v0 }
 0x2c7   : > { %v1076_v17 = vpop.permute.xlu1 %1075 }
 0x2c8   : > { %1317 = vrot.lane.b32.xlu0 %v3766_v13, %s3610_s27  ;;  %v1149_v63 = vmax.f32 %v1076_v17, %v4314_v57 }
 0x2ca   : > { %v4329_v55 = vsub.f32 %v1032_v44, %v1149_v63  ;;  %v527_v44 = vmax.f32 %v4177_v23, %v4197_v8 }
 0x2cb   : > { %v1086_v40 = vpop.permute.xlu1 %1085 }
 0x2cc   : > { %6159 = vst [vmem:[#allocation68_spill] sm:$0xff] %v4329_v55  ;;  %1321 = vrot.lane.b32.xlu0 %v3774_v16, %s3610_s27  ;;  %v1151_v25 = vmax.f32 %v1086_v40, %v4314_v57  ;;  %v1038_v40 = vmin.f32 %v989_v54, %v4312_v18  ;;  %v1040_v54 = vmin.f32 %v999_v59, %v4312_v18 }
 0x2ce   : > { %v4335_v0 = vsub.f32 %v1034_v47, %v1151_v25  ;;  %v410_v47 = vmin.f32 %v4123_v14, %v4190_v35  ;;  %v845_v14 = vmax.f32 %v4141_v32, %v4200_v12  ;;  %v964_v32 = vpop.permute.xlu0 %963 }
 0x2cf   : > { %v1096_v49 = vpop.permute.xlu1 %1095 }
 0x2d0   : > { %6160 = vst [vmem:[#allocation69_spill] sm:$0xff] %v4335_v0  ;;  %1325 = vrot.lane.b32.xlu0 %v3789_v20, %s3610_s27  ;;  %v1153_v60 = vmax.f32 %v1096_v49, %v4314_v57  ;;  %v726_v49 = vmin.f32 %v4127_v1, %v4202_v58  ;;  %v543_v23 = vsub.f32 %v410_v47, %v527_v44 }
 0x2d1   : > { %v728_v1 = vmin.f32 %v4137_v29, %v4202_v58  ;;  %v1042_v44 = vmin.f32 %v1009_v34, %v4312_v18 }
 0x2d2   : > { %v4341_v17 = vsub.f32 %v1036_v38, %v1153_v60  ;;  %v559_v36 = vmax.f32 %v543_v23, 0.0  ;;  %v1044_v23 = vmin.f32 %v1019_v37, %v4312_v18 }
 0x2d3   : > { %v1106_v63 = vpop.permute.xlu1 %1105  ;;  %v861_v47 = vsub.f32 %v728_v1, %v845_v14 }
 0x2d4   : > { %6161 = vst [vmem:[#allocation70_spill] sm:$0xff] %v4341_v17  ;;  %1329 = vrot.lane.b32.xlu0 %v3805_v24, %s3610_s27  ;;  %v1155_v48 = vmax.f32 %v1106_v63, %v4314_v57  ;;  %v859_v63 = vsub.f32 %v726_v49, %v843_v39 }
 0x2d5   : > { %v877_v17 = vmax.f32 %v861_v47, 0.0 }
 0x2d6   : > { %v4353_v25 = vsub.f32 %v1038_v40, %v1155_v48  ;;  %v875_v48 = vmax.f32 %v859_v63, 0.0  ;;  %v4376_v63 = vpop.permute.xlu0 %973 }
 0x2d7   : > { %v1116_v38 = vpop.permute.xlu1 %1115  ;;  %6165 = vst [vmem:[#allocation74_spill] sm:$0xff] %v4376_v63 }
 0x2d8   : > { %6162 = vst [vmem:[#allocation71_spill] sm:$0xff] %v4353_v25  ;;  %1333 = vrot.lane.b32.xlu0 %v3818_v27, %s3610_s27  ;;  %v1157_v60 = vmax.f32 %v1116_v38, %v4314_v57  ;;  %v1207_v49 = vmul.f32 %v875_v48, %v559_v36 }
 0x2da   : > { %v4363_v43 = vsub.f32 %v1040_v54, %v1157_v60  ;;  %v561_v54 = vmax.f32 %v4215_v51, 0.0 }
 0x2db   : > { %v1126_v40 = vpop.permute.xlu1 %1125 }
 0x2dc   : > { %6163 = vst [vmem:[#allocation72_spill] sm:$0xff] %v4363_v43  ;;  %1337 = vrot.lane.b32.xlu0 %v3835_v31, %s3610_s27  ;;  %v1159_v59 = vmax.f32 %v1126_v40, %v4314_v57  ;;  %v1209_v55 = vmul.f32 %v877_v17, %v561_v54 }
 0x2de   : > { %v1175_v39 = vsub.f32 %v1042_v44, %v1159_v59 }
 0x2df   : > { %v1136_v38 = vpop.permute.xlu1 %1135 }
 0x2e0   : > { %v1191_v60 = vmax.f32 %v1175_v39, 0.0  ;;  %v1161_v43 = vmax.f32 %v1136_v38, %v4314_v57 }
 0x2e2   : > { %v1177_v0 = vsub.f32 %v1044_v23, %v1161_v43  ;;  %v4374_v29 = vmul.f32 %v1207_v49, %v1191_v60 }
 0x2e3   : > { %v1244_v34 = vpop.permute.xlu1 %1243 }
 0x2e4   : > { %6164 = vst [vmem:[#allocation73_spill] sm:$0xff] %v4374_v29  ;;  %v1193_v40 = vmax.f32 %v1177_v0, 0.0  ;;  %v1031_v0 = vmin.f32 %v4283_v45, %v4312_v18  ;;  %v1291_v23 = vmul.f32 %v1244_v34, %v3743_v3 }
 0x2e6   : > { %v4378_v14 = vmul.f32 %v1209_v55, %v1193_v40  ;;  %v1033_v40 = vmin.f32 %v964_v32, %v4312_v18 }
 0x2e7   : > { %v4380_v36 = vpop.permute.xlu1 %1247 }
 0x2e8   : > { %6166 = vst [vmem:[#allocation75_spill] sm:$0xff] %v4378_v14 }
 0x2eb   : > { %v984_v1 = vpop.permute.xlu0 %983  ;;  %v4382_v51 = vpop.permute.xlu1 %1251 }
 0x2ec   : > { %v1037_v34 = vmin.f32 %v984_v1, %v4312_v18 }
 0x2ef   : > { %v994_v37 = vpop.permute.xlu0 %993  ;;  %v1256_v44 = vpop.permute.xlu1 %1255 }
 0x2f0   : > { %v1039_v1 = vmin.f32 %v994_v37, %v4312_v18  ;;  %v530_v37 = vmax.f32 %v4149_v56, %v4197_v8 }
 0x2f3   : > { %v1004_v59 = vpop.permute.xlu0 %1003  ;;  %v1260_v48 = vpop.permute.xlu1 %1259 }
 0x2f7   : > { %v1014_v47 = vpop.permute.xlu0 %1013  ;;  %v1264_v43 = vpop.permute.xlu1 %1263 }
 0x2fb   : > { %v4384_v39 = vpop.permute.xlu0 %1023  ;;  %v1268_v49 = vpop.permute.xlu1 %1267 }
 0x2ff   : > { %v1071_v17 = vpop.permute.xlu0 %1070  ;;  %v4388_v55 = vpop.permute.xlu1 %1271 }
 0x300   : > { %v1148_v38 = vmax.f32 %v1071_v17, %v4314_v57  ;;  %v842_v17 = vmax.f32 %v4166_v53, %v4200_v12  ;;  %v526_v53 = vmax.f32 %v4119_v42, %v4197_v8 }
 0x302   : > { %v4391_v54 = vsub.f32 %v1031_v0, %v1148_v38  ;;  %v1297_v38 = vmul.f32 %v1256_v44, %v3771_v15  ;;  %v1041_v44 = vmin.f32 %v1004_v59, %v4312_v18 }
 0x303   : > { %v1081_v60 = vpop.permute.xlu0 %1080  ;;  %v1308_v29 = vpop.permute.xlu1 %1307 }
 0x304   : > { %v1150_v63 = vmax.f32 %v1081_v60, %v4314_v57  ;;  %v1355_v14 = vmul.f32 %v1308_v29, %v1291_v23  ;;  %v409_v29 = vmin.f32 %v4160_v21, %v4190_v35 }
 0x306   : > { %v4396_v25 = vsub.f32 %v1033_v40, %v1150_v63  ;;  %1380 = vperm.xlu0 %3473, %v1355_v14   ;;  %v725_v63 = vmin.f32 %v4163_v10, %v4202_v58  ;;  %v542_v21 = vsub.f32 %v409_v29, %v526_v53  ;;  %v1299_v10 = vmul.f32 %v1260_v48, %v3785_v19 }
 0x307   : > { %v4398_v6 = vpop.permute.xlu0 %1090  ;;  %v4400_v45 = vpop.permute.xlu1 %1311  ;;  %v413_v29 = vmin.f32 %v4145_v52, %v4190_v35 }
 0x308   : > { %6167 = vst [vmem:[#allocation76_spill] sm:$0xff] %v4396_v25  ;;  %v858_v60 = vsub.f32 %v725_v63, %v842_v17  ;;  %v558_v63 = vmax.f32 %v542_v21, 0.0 }
 0x30b   : > { %v1101_v28 = vpop.permute.xlu0 %1100  ;;  %v4405_v0 = vpop.permute.xlu1 %1315 }
 0x30c   : > { %v1154_v32 = vmax.f32 %v1101_v28, %v4314_v57 }
 0x30e   : > { %v4412_v14 = vsub.f32 %v1037_v34, %v1154_v32  ;;  %v874_v32 = vmax.f32 %v858_v60, 0.0  ;;  %v1043_v60 = vmin.f32 %v1014_v47, %v4312_v18 }
 0x30f   : > { %v1111_v23 = vpop.permute.xlu0 %1110  ;;  %v1320_v40 = vpop.permute.xlu1 %1319 }
 0x310   : > { %v1156_v28 = vmax.f32 %v1111_v23, %v4314_v57  ;;  %v4419_v3 = vmul.f32 %v1320_v40, %v1297_v38  ;;  %v1301_v38 = vmul.f32 %v1264_v43, %v3798_v22  ;;  %v1206_v53 = vmul.f32 %v874_v32, %v558_v63 }
 0x311   : > { %v878_v43 = vmax.f32 %v4221_v46, 0.0 }
 0x312   : > { %v4421_v25 = vsub.f32 %v1039_v1, %v1156_v28  ;;  %v546_v28 = vsub.f32 %v413_v29, %v530_v37 }
 0x313   : > { %v1121_v34 = vpop.permute.xlu0 %1120  ;;  %v1324_v15 = vpop.permute.xlu1 %1323 }
 0x314   : > { %v1158_v42 = vmax.f32 %v1121_v34, %v4314_v57  ;;  %v1363_v17 = vmul.f32 %v1324_v15, %v1299_v10  ;;  %v1303_v10 = vmul.f32 %v1268_v49, %v3814_v26  ;;  %v1045_v34 = vmin.f32 %v4384_v39, %v4312_v18 }
 0x315   : > { %v1305_v49 = vmul.f32 %v4388_v55, %v3830_v30 }
 0x316   : > { %v1174_v23 = vsub.f32 %v1041_v44, %v1158_v42  ;;  %1420 = vperm.xlu1 %3474, %v1363_v17   ;;  %v562_v17 = vmax.f32 %v546_v28, 0.0 }
 0x317   : > { %v1131_v48 = vpop.permute.xlu0 %1130  ;;  %v1328_v1 = vpop.permute.xlu1 %1327 }
 0x318   : > { %v1190_v59 = vmax.f32 %v1174_v23, 0.0  ;;  %v1160_v40 = vmax.f32 %v1131_v48, %v4314_v57  ;;  %v4433_v15 = vmul.f32 %v1328_v1, %v1301_v38  ;;  %v1210_v29 = vmul.f32 %v878_v43, %v562_v17 }
 0x31a   : > { %v1176_v56 = vsub.f32 %v1043_v60, %v1160_v40  ;;  %v4435_v21 = vmul.f32 %v1206_v53, %v1190_v59 }
 0x31b   : > { %v1141_v52 = vpop.permute.xlu0 %1140  ;;  %v1332_v47 = vpop.permute.xlu1 %1331 }
 0x31c   : > { %v1192_v32 = vmax.f32 %v1176_v56, 0.0  ;;  %v1162_v44 = vmax.f32 %v1141_v52, %v4314_v57  ;;  %v4442_v42 = vmul.f32 %v1332_v47, %v1303_v10  ;;  %v1293_v52 = vmul.f32 %v4380_v36, %v3753_v7 }
 0x31e   : > { %v1178_v63 = vsub.f32 %v1045_v34, %v1162_v44  ;;  %v4445_v37 = vmul.f32 %v4209_v50, %v1192_v32  ;;  %v1357_v43 = vmul.f32 %v4400_v45, %v1293_v52  ;;  %v1295_v44 = vmul.f32 %v4382_v51, %v3762_v11 }
 0x31f   : > { %v1246_v23 = vpop.permute.xlu0 %1245  ;;  %v1336_v38 = vpop.permute.xlu1 %1335  ;;  %v4470_v51 = vadd.s32 8, %v4174_v61  ;;  %v4502_v52 = vadd.s32 88, %v4174_v61 }
 0x320   : > { %v1194_v46 = vmax.f32 %v1178_v63, 0.0  ;;  %v1369_v48 = vmul.f32 %v1336_v38, %v1305_v49  ;;  %v1292_v55 = vmul.f32 %v1246_v23, %v3748_v5  ;;  %v1359_v63 = vmul.f32 %v4405_v0, %v1295_v44 }
 0x321   : > { %v4473_v0 = vadd.s32 16, %v4174_v61  ;;  %6172 = vst [vmem:[#allocation81_spill] sm:$0xff] %v4502_v52 }
 0x322   : > { %v4449_v39 = vmul.f32 %v1210_v29, %v1194_v46  ;;  %1450 = vperm.xlu1 %3474, %v1369_v48   ;;  %v4476_v48 = vadd.s32 24, %v4174_v61 }
 0x323   : > { %v1250_v53 = vpop.permute.xlu0 %1249 }
 0x324   : > { %v1294_v32 = vmul.f32 %v1250_v53, %v3757_v9  ;;  %v4479_v53 = vadd.s32 32, %v4174_v61 }
 0x327   : > { %v1254_v60 = vpop.permute.xlu0 %1253 }
 0x328   : > { %v1296_v49 = vmul.f32 %v1254_v60, %v3766_v13  ;;  %v4482_v60 = vadd.s32 40, %v4174_v61 }
 0x32b   : > { %v1258_v59 = vpop.permute.xlu0 %1257 }
 0x32c   : > { %v1298_v45 = vmul.f32 %v1258_v59, %v3774_v16  ;;  %v4485_v59 = vadd.s32 48, %v4174_v61 }
 0x32f   : > { %v1262_v1 = vpop.permute.xlu0 %1261 }
 0x330   : > { %v1300_v46 = vmul.f32 %v1262_v1, %v3789_v20  ;;  %v4490_v1 = vadd.s32 56, %v4174_v61 }
 0x332   : > { %6168 = vst [vmem:[#allocation77_spill] sm:$0xff] %v4490_v1 }
 0x333   : > { %v4451_v40 = vpop.permute.xlu0 %1265 }
 0x334   : > { %v1302_v44 = vmul.f32 %v4451_v40, %v3805_v24  ;;  %v3475_v40 = vld [vmem:[%s117_s24] sm:$0xff] }
 0x337   : > { %v4453_v28 = vpop.permute.xlu0 %1269 }
 0x338   : > { %v1304_v30 = vmul.f32 %v4453_v28, %v3818_v27  ;;  %v398_v28 = vmin.f32 %v4003_v62, %v4190_v35  ;;  %v6177_v62 = vld [vmem:[#allocation57_spill] sm:$0xff] }
 0x33b   : > { %v4455_v50 = vpop.permute.xlu0 %1273 }
 0x33f   : > { %v1310_v56 = vpop.permute.xlu0 %1309 }
 0x340   : > { %v1356_v10 = vmul.f32 %v1310_v56, %v1292_v55  ;;  %v4493_v55 = vadd.s32 64, %v4174_v61  ;;  %v4496_v56 = vadd.s32 72, %v4174_v61 }
 0x342   : > { %1385 = vperm.xlu0 %3473, %v1356_v10   ;;  %6169 = vst [vmem:[#allocation78_spill] sm:$0xff] %v4493_v55  ;;  %6170 = vst [vmem:[#allocation79_spill] sm:$0xff] %v4496_v56  ;;  %v4499_v10 = vadd.s32 80, %v4174_v61 }
 0x343   : > { %v1314_v34 = vpop.permute.xlu0 %1313 }
 0x344   : > { %v1358_v47 = vmul.f32 %v1314_v34, %v1294_v32  ;;  %6171 = vst [vmem:[#allocation80_spill] sm:$0xff] %v4499_v10  ;;  %v4511_v34 = vadd.s32 112, %v4174_v61  ;;  %v4514_v32 = vadd.s32 120, %v4174_v61 }
 0x346   : > { %1390 = vperm.xlu0 %3473, %v1357_v43   ;;  %v4505_v43 = vadd.s32 96, %v4174_v61  ;;  %6175 = vst [vmem:[#allocation84_spill] sm:$0xff] %v4511_v34  ;;  %6176 = vst [vmem:[#allocation85_spill] sm:$0xff] %v4514_v32 }
 0x347   : > { %v1318_v17 = vpop.permute.xlu0 %1317 }
 0x348   : > { %v1360_v36 = vmul.f32 %v1318_v17, %v1296_v49  ;;  %6173 = vst [vmem:[#allocation82_spill] sm:$0xff] %v4505_v43 }
 0x34a   : > { %1395 = vperm.xlu0 %3473, %v1358_v47  }
 0x34b   : > { %v1322_v23 = vpop.permute.xlu0 %1321 }
 0x34c   : > { %v1362_v38 = vmul.f32 %v1322_v23, %v1298_v45  ;;  %v1372_v45 = vrot.slane %v3475_v40, 1 }
 0x34e   : > { %1400 = vperm.xlu0 %3473, %v1359_v63  }
 0x34f   : > { %v1326_v63 = vpop.permute.xlu0 %1325 }
 0x350   : > { %v1364_v23 = vmul.f32 %v1326_v63, %v1300_v46  ;;  %v1306_v63 = vmul.f32 %v4455_v50, %v3835_v31 }
 0x351   : > { %v1594_v29 = vpop.xlane.xlu1 %1593 }
 0x352   : > { %1405 = vperm.xlu0 %3473, %v1360_v36   ;;  %3328 = vpush %v1594_v29 }
 0x356   : > { %1410 = vperm.xlu0 %3473, %v4419_v3   ;;  %v4508_v3 = vadd.s32 104, %v4174_v61 }
 0x358   : > { %6174 = vst [vmem:[#allocation83_spill] sm:$0xff] %v4508_v3 }
 0x35a   : > { %1415 = vperm.xlu0 %3473, %v1362_v38   ;;  %v1330_v38 = vpop.permute.xlu0 %1329 }
 0x35b   : > { %v1366_v47 = vmul.f32 %v1330_v38, %v1302_v44 }
 0x35e   : > { %1425 = vperm.xlu0 %3473, %v1364_v23   ;;  %v1334_v16 = vpop.permute.xlu0 %1333 }
 0x35f   : > { %v1368_v36 = vmul.f32 %v1334_v16, %v1304_v30  ;;  %v1374_v16 = vmul.f32 %v3475_v40, %v1372_v45  ;;  %v1375_v30 = vrot.slane %v3475_v40, 2 }
 0x361   : > { %v1377_v38 = vmul.f32 %v1375_v30, %v1374_v16  ;;  %v6179_v30 = vld [vmem:[#allocation56_spill] sm:$0xff] }
 0x362   : > { %1430 = vperm.xlu0 %3473, %v4433_v15   ;;  %v1338_v46 = vpop.permute.xlu0 %1337  ;;  %v714_v15 = vmin.f32 %v4020_v33, %v4202_v58  ;;  %v1179_v33 = vmax.f32 %v4323_v2, 0.0 }
 0x363   : > { %v1370_v23 = vmul.f32 %v1338_v46, %v1306_v63 }
 0x366   : > { %1435 = vperm.xlu0 %3473, %v1366_v47   ;;  %v831_v47 = vmax.f32 %v4005_v4, %v4200_v12 }
 0x368   : > { %v847_v50 = vsub.f32 %v714_v15, %v831_v47  ;;  %v523_v15 = vmax.f32 %v6177_v62, %v4197_v8 }
 0x36a   : > { %1440 = vperm.xlu0 %3473, %v4442_v42   ;;  %v515_v42 = vmax.f32 %v4011_v41, %v4197_v8  ;;  %v863_v46 = vmax.f32 %v847_v50, 0.0  ;;  %v6180_v50 = vld [vmem:[#allocation42_spill] sm:$0xff] }
 0x36c   : > { %v531_v44 = vsub.f32 %v398_v28, %v515_v42  ;;  %v6178_v42 = vld [vmem:[#allocation44_spill] sm:$0xff]  ;;  %v406_v28 = vmin.f32 %v6179_v30, %v4190_v35 }
 0x36d   : > { %v839_v16 = vmax.f32 %v6178_v42, %v4200_v12 }
 0x36e   : > { %1445 = vperm.xlu0 %3473, %v1368_v36   ;;  %v1460_v36 = vsub.s32 3, %v4174_v61  ;;  %v547_v63 = vmax.f32 %v531_v44, 0.0  ;;  %v722_v44 = vmin.f32 %v6180_v50, %v4202_v58 }
 0x370   : > { %v1195_v4 = vmul.f32 %v863_v46, %v547_v63  ;;  %v855_v46 = vsub.f32 %v722_v44, %v839_v16  ;;  %v6028_v63 = vmov 0.0  }
 0x372   : > { %1455 = vperm.xlu0 %3473, %v1370_v23   ;;  %v4557_v23 = vrot.slane %v1377_v38, %v1460_v36  ;;  %v1211_v45 = vmul.f32 %v1195_v4, %v1179_v33  ;;  %v539_v36 = vsub.f32 %v406_v28, %v523_v15  ;;  %v6182_v28 = vld [vmem:[#allocation75_spill] sm:$0xff] }
 0x374   : > { %v555_v4 = vmax.f32 %v539_v36, 0.0 }
 0x383   : > { %s4559_s17 = spop %3328  }
 0x384   : > { %p3006_p13 = scmp.lt.f32.partialorder %s4559_s17, 128.0 }
 0x385   : > { %v1381_v41 = vpop.permute.xlu0 %1380 }
 0x386   : > { %v1462_v40 = vadd.f32 %v4557_v23, %v1381_v41  ;;  %v871_v41 = vmax.f32 %v855_v46, 0.0  ;;  %p3008_p1 = pnand %p3065_p0, %p3006_p13 }
 0x387   : > { %s4706_s4 = smov (!%p3008_p1), 0  }
 0x388   : > { %v1478_v47 = vsub.f32 %v1462_v40, %v1211_v45  ;;  %v6181_v40 = vld [vmem:[#allocation71_spill] sm:$0xff]  ;;  %v1203_v42 = vmul.f32 %v871_v41, %v555_v4 }
 0x389   : > { %v1187_v62 = vmax.f32 %v6181_v40, 0.0  ;;  %v6186_v41 = vld [vmem:[#allocation23_spill] sm:$0xff] }
 0x38a   : > { %v1494_v2 = vmax.f32 %v1478_v47, 1e-07  ;;  %v516_v40 = vmax.f32 %v6186_v41, %v4197_v8 }
 0x38b   : > { %v1219_v17 = vmul.f32 %v1203_v42, %v1187_v62  ;;  %v6187_v42 = vld [vmem:[#allocation33_spill] sm:$0xff] }
 0x38c   : > { %v1510_v38 = vmul.f32 0.1, %v1494_v2 }
 0x38e   : > { %vm1526_vm1 = vcmp.gt.f32.partialorder %v1211_v45, %v1510_v38 }
 0x38f   : > { %v3049_v33 = vsel %vm1526_vm1, 1.0, %v6028_v63 }
 0x390   : > { %1574 = vst [vmem:[#allocation2] sm:$0xff] %v3049_v33  ;;  %v6185_v33 = vld [vmem:[#allocation25_spill] sm:$0xff] }
 0x391   : > { %v399_v4 = vmin.f32 %v6185_v33, %v4190_v35 }
 0x395   : > { %v1421_v49 = vpop.permute.xlu1 %1420 }
 0x396   : > { %v1470_v47 = vadd.f32 %v4557_v23, %v1421_v49  ;;  %v6183_v49 = vld [vmem:[#allocation27_spill] sm:$0xff] }
 0x397   : > { %v832_v46 = vmax.f32 %v6183_v49, %v4200_v12 }
 0x398   : > { %v1486_v30 = vsub.f32 %v1470_v47, %v1219_v17  ;;  %v716_v47 = vmin.f32 %v6187_v42, %v4202_v58 }
 0x39a   : > { %v1502_v29 = vmax.f32 %v1486_v30, 1e-07  ;;  %v532_v30 = vsub.f32 %v399_v4, %v516_v40  ;;  %v6194_v4 = vld [vmem:[#allocation35_spill] sm:$0xff] }
 0x39b   : > { %v401_v41 = vmin.f32 %v6194_v4, %v4190_v35 }
 0x39c   : > { %v1518_v50 = vmul.f32 0.1, %v1502_v29  ;;  %v548_v40 = vmax.f32 %v532_v30, 0.0 }
 0x39e   : > { %vm1534_vm2 = vcmp.gt.f32.partialorder %v1219_v17, %v1518_v50  ;;  %v6184_v17 = vld [vmem:[#allocation24_spill] sm:$0xff]  ;;  %v6188_v50 = vld [vmem:[#allocation26_spill] sm:$0xff] }
 0x39f   : > { %v3057_v15 = vsel %vm1534_vm2, 1.0, %v6028_v63  ;;  %v715_v29 = vmin.f32 %v6184_v17, %v4202_v58 }
 0x3a0   : > { %1582 = vst [vmem:[#allocation2 + $0x40] sm:$0xff] %v3057_v15  ;;  %v833_v15 = vmax.f32 %v6188_v50, %v4200_v12  ;;  %v6195_v50 = vld [vmem:[#allocation38_spill] sm:$0xff] }
 0x3a1   : > { %v1451_v45 = vpop.permute.xlu1 %1450  ;;  %v848_v62 = vsub.f32 %v715_v29, %v832_v46  ;;  %v6192_v46 = vld [vmem:[#allocation39_spill] sm:$0xff]  ;;  %v6193_v29 = vld [vmem:[#allocation30_spill] sm:$0xff] }
 0x3a2   : > { %v1476_v16 = vadd.f32 %v4557_v23, %v1451_v45  ;;  %v6189_v45 = vld [vmem:[#allocation31_spill] sm:$0xff]  ;;  %v849_v49 = vsub.f32 %v716_v47, %v833_v15  ;;  %v834_v17 = vmax.f32 %v6192_v46, %v4200_v12  ;;  %v718_v33 = vmin.f32 %v6193_v29, %v4202_v58  ;;  %v6197_v15 = vld [vmem:[#allocation37_spill] sm:$0xff] }
 0x3a3   : > { %v837_v46 = vmax.f32 %v6197_v15, %v4200_v12 }
 0x3a4   : > { %v1492_v2 = vsub.f32 %v1476_v16, %v6182_v28  ;;  %v517_v16 = vmax.f32 %v6189_v45, %v4197_v8  ;;  %v717_v45 = vmin.f32 %v6195_v50, %v4202_v58  ;;  %v865_v26 = vmax.f32 %v849_v49, 0.0  ;;  %v6200_v50 = vld [vmem:[#allocation41_spill] sm:$0xff] }
 0x3a6   : > { %v1508_v44 = vmax.f32 %v1492_v2, 1e-07  ;;  %v850_v4 = vsub.f32 %v717_v45, %v834_v17  ;;  %v6203_v45 = vld [vmem:[#allocation49_spill] sm:$0xff] }
 0x3a8   : > { %v1524_v36 = vmul.f32 0.1, %v1508_v44  ;;  %v864_v44 = vmax.f32 %v848_v62, 0.0  ;;  %v1180_v62 = vmax.f32 %v4391_v54, 0.0  ;;  %v402_v54 = vmin.f32 %v6200_v50, %v4190_v35 }
 0x3aa   : > { %vm1540_vm3 = vcmp.gt.f32.partialorder %v6182_v28, %v1524_v36  ;;  %v6190_v28 = vld [vmem:[#allocation32_spill] sm:$0xff]  ;;  %v6191_v36 = vld [vmem:[#allocation29_spill] sm:$0xff]  ;;  %v1196_v31 = vmul.f32 %v864_v44, %v548_v40  ;;  %v866_v40 = vmax.f32 %v850_v4, 0.0 }
 0x3ab   : > { %v3063_v38 = vsel %vm1540_vm3, 1.0, %v6028_v63  ;;  %v835_v2 = vmax.f32 %v6190_v28, %v4200_v12  ;;  %v6196_v28 = vld [vmem:[#allocation28_spill] sm:$0xff]  ;;  %v6198_v63 = vld [vmem:[#allocation43_spill] sm:$0xff] }
 0x3ac   : > { %1588 = vst [vmem:[#allocation2 + $0x70] sm:$0xff] %v3063_v38  ;;  %v400_v38 = vmin.f32 %v6191_v36, %v4190_v35  ;;  %v518_v36 = vmax.f32 %v6196_v28, %v4197_v8  ;;  %v519_v29 = vmax.f32 %v6198_v63, %v4197_v8  ;;  %v6201_v28 = vld [vmem:[#allocation68_spill] sm:$0xff]  ;;  %v6202_v63 = vld [vmem:[#allocation34_spill] sm:$0xff] }
 0x3ad   : > { %v851_v47 = vsub.f32 %v718_v33, %v835_v2  ;;  %v1181_v2 = vmax.f32 %v6201_v28, 0.0  ;;  %v1212_v33 = vmul.f32 %v1196_v31, %v1180_v62  ;;  %v520_v44 = vmax.f32 %v6202_v63, %v4197_v8  ;;  %v6205_v31 = vld [vmem:[#allocation47_spill] sm:$0xff]  ;;  %v6208_v63 = vld [vmem:[#allocation74_spill] sm:$0xff] }
 0x3ae   : > { %v533_v42 = vsub.f32 %v400_v38, %v517_v16  ;;  %v534_v30 = vsub.f32 %v401_v41, %v518_v36  ;;  %v6199_v16 = vld [vmem:[#allocation36_spill] sm:$0xff]  ;;  %v535_v17 = vsub.f32 %v402_v54, %v519_v29  ;;  %v836_v36 = vmax.f32 %v6203_v45, %v4200_v12 }
 0x3af   : > { %v720_v38 = vmin.f32 %v6199_v16, %v4202_v58  ;;  %v867_v13 = vmax.f32 %v851_v47, 0.0  ;;  %v1152_v62 = vmax.f32 %v4398_v6, %v4314_v57  ;;  %v1035_v45 = vmin.f32 %v6208_v63, %v4312_v18  ;;  %v6211_v18 = vld [vmem:[#allocation55_spill] sm:$0xff] }
 0x3b0   : > { %v549_v27 = vmax.f32 %v533_v42, 0.0  ;;  %v550_v50 = vmax.f32 %v534_v30, 0.0  ;;  %v6204_v42 = vld [vmem:[#allocation45_spill] sm:$0xff]  ;;  %v551_v54 = vmax.f32 %v535_v17, 0.0  ;;  %v6207_v30 = vld [vmem:[#allocation52_spill] sm:$0xff] }
 0x3b1   : > { %v4619_v49 = vsub.f32 %v720_v38, %v837_v46  ;;  %v403_v28 = vmin.f32 %v6204_v42, %v4190_v35  ;;  %v6206_v46 = vld [vmem:[#allocation76_spill] sm:$0xff] }
 0x3b2   : > { %v1197_v41 = vmul.f32 %v865_v26, %v549_v27  ;;  %v1182_v38 = vmax.f32 %v6206_v46, 0.0  ;;  %v1198_v42 = vmul.f32 %v866_v40, %v550_v50  ;;  %v6209_v46 = vld [vmem:[#allocation51_spill] sm:$0xff]  ;;  %v1199_v20 = vmul.f32 %v867_v13, %v551_v54 }
 0x3b3   : > { %v869_v4 = vmax.f32 %v4619_v49, 0.0  ;;  %v536_v57 = vsub.f32 %v403_v28, %v520_v44  ;;  %v838_v40 = vmax.f32 %v6211_v18, %v4200_v12  ;;  %v6213_v44 = vld [vmem:[#allocation40_spill] sm:$0xff] }
 0x3b4   : > { %v1213_v26 = vmul.f32 %v1197_v41, %v1181_v2  ;;  %v6210_v2 = vld [vmem:[#allocation69_spill] sm:$0xff]  ;;  %v1214_v17 = vmul.f32 %v1198_v42, %v1182_v38  ;;  %v522_v28 = vmax.f32 %v6213_v44, %v4197_v8  ;;  %v6216_v42 = vld [vmem:[#allocation46_spill] sm:$0xff] }
 0x3b5   : > { %v1183_v41 = vmax.f32 %v6210_v2, 0.0  ;;  %v6217_v2 = vld [vmem:[#allocation60_spill] sm:$0xff]  ;;  %v6220_v44 = vld [vmem:[#allocation70_spill] sm:$0xff] }
 0x3b7   : > { %v1215_v54 = vmul.f32 %v1199_v20, %v1183_v41 }
 0x3c1   : > { %v1386_v22 = vpop.permute.xlu0 %1385 }
 0x3c2   : > { %v1463_v15 = vadd.f32 %v4557_v23, %v1386_v22  ;;  %v719_v22 = vmin.f32 %v6205_v31, %v4202_v58 }
 0x3c4   : > { %v1479_v16 = vsub.f32 %v1463_v15, %v1212_v33  ;;  %v521_v15 = vmax.f32 %v6207_v30, %v4197_v8  ;;  %v852_v31 = vsub.f32 %v719_v22, %v836_v36  ;;  %v6212_v36 = vmov 0.0  }
 0x3c5   : > { %v1391_v47 = vpop.permute.xlu0 %1390 }
 0x3c6   : > { %v1495_v29 = vmax.f32 %v1479_v16, 1e-07  ;;  %v1464_v27 = vadd.f32 %v4557_v23, %v1391_v47  ;;  %v404_v16 = vmin.f32 %v6209_v46, %v4190_v35  ;;  %v1168_v47 = vsub.f32 %v1035_v45, %v1152_v62 }
 0x3c7   : > { %v868_v22 = vmax.f32 %v852_v31, 0.0  ;;  %v524_v31 = vmax.f32 %v6216_v42, %v4197_v8 }
 0x3c8   : > { %v1511_v19 = vmul.f32 0.1, %v1495_v29  ;;  %v1480_v6 = vsub.f32 %v1464_v27, %v1213_v26  ;;  %v537_v9 = vsub.f32 %v404_v16, %v521_v15  ;;  %v552_v27 = vmax.f32 %v536_v57, 0.0 }
 0x3c9   : > { %v1396_v24 = vpop.permute.xlu0 %1395  ;;  %v1184_v15 = vmax.f32 %v1168_v47, 0.0  ;;  %v6219_v47 = vld [vmem:[#allocation59_spill] sm:$0xff] }
 0x3ca   : > { %vm1527_vm4 = vcmp.gt.f32.partialorder %v1212_v33, %v1511_v19  ;;  %v1496_v49 = vmax.f32 %v1480_v6, 1e-07  ;;  %v1465_v30 = vadd.f32 %v4557_v23, %v1396_v24  ;;  %v6214_v19 = vld [vmem:[#allocation53_spill] sm:$0xff]  ;;  %v6215_v24 = vld [vmem:[#allocation54_spill] sm:$0xff]  ;;  %v553_v6 = vmax.f32 %v537_v9, 0.0 }
 0x3cb   : > { %v3050_v50 = vsel %vm1527_vm4, 1.0, %v6212_v36  ;;  %v405_v33 = vmin.f32 %v6214_v19, %v4190_v35  ;;  %v721_v13 = vmin.f32 %v6215_v24, %v4202_v58  ;;  %v1200_v16 = vmul.f32 %v868_v22, %v552_v27  ;;  %v6221_v27 = vld [vmem:[#allocation50_spill] sm:$0xff] }
 0x3cc   : > { %1575 = vst [vmem:[#allocation2 + $0x8] sm:$0xff] %v3050_v50  ;;  %v1512_v29 = vmul.f32 0.1, %v1496_v49  ;;  %v1481_v62 = vsub.f32 %v1465_v30, %v1214_v17  ;;  %v840_v49 = vmax.f32 %v6217_v2, %v4200_v12  ;;  %v723_v50 = vmin.f32 %v6219_v47, %v4202_v58 }
 0x3cd   : > { %v1401_v38 = vpop.permute.xlu0 %1400  ;;  %v854_v46 = vsub.f32 %v721_v13, %v838_v40  ;;  %v538_v20 = vsub.f32 %v405_v33, %v522_v28  ;;  %v841_v19 = vmax.f32 %v6221_v27, %v4200_v12  ;;  %v1201_v24 = vmul.f32 %v869_v4, %v553_v6 }
 0x3ce   : > { %vm1528_vm5 = vcmp.gt.f32.partialorder %v1213_v26, %v1512_v29  ;;  %v1497_v63 = vmax.f32 %v1481_v62, 1e-07  ;;  %v1466_v45 = vadd.f32 %v4557_v23, %v1401_v38  ;;  %v6218_v26 = vld [vmem:[#allocation58_spill] sm:$0xff]  ;;  %v1185_v29 = vmax.f32 %v6220_v44, 0.0 }
 0x3cf   : > { %v3051_v57 = vsel %vm1528_vm5, 1.0, %v6212_v36  ;;  %v407_v41 = vmin.f32 %v6218_v26, %v4190_v35  ;;  %v1216_v62 = vmul.f32 %v1200_v16, %v1184_v15  ;;  %v870_v13 = vmax.f32 %v854_v46, 0.0  ;;  %v6222_v38 = vld [vmem:[#allocation62_spill] sm:$0xff]  ;;  %v6223_v15 = vld [vmem:[#allocation61_spill] sm:$0xff]  ;;  %v6224_v46 = vld [vmem:[#allocation48_spill] sm:$0xff] }
 0x3d0   : > { %1576 = vst [vmem:[#allocation2 + $0x10] sm:$0xff] %v3051_v57  ;;  %v1513_v30 = vmul.f32 0.1, %v1497_v63  ;;  %v1482_v18 = vsub.f32 %v1466_v45, %v1215_v54  ;;  %v856_v33 = vsub.f32 %v723_v50, %v840_v49  ;;  %v525_v63 = vmax.f32 %v6222_v38, %v4197_v8 }
 0x3d1   : > { %v1406_v9 = vpop.permute.xlu0 %1405  ;;  %v554_v57 = vmax.f32 %v538_v20, 0.0  ;;  %v408_v16 = vmin.f32 %v6223_v15, %v4190_v35  ;;  %v1186_v2 = vmax.f32 %v4412_v14, 0.0  ;;  %v1217_v4 = vmul.f32 %v1201_v24, %v1185_v29 }
 0x3d2   : > { %vm1529_vm6 = vcmp.gt.f32.partialorder %v1214_v17, %v1513_v30  ;;  %v1498_v40 = vmax.f32 %v1482_v18, 1e-07  ;;  %v1467_v22 = vadd.f32 %v4557_v23, %v1406_v9  ;;  %v540_v17 = vsub.f32 %v407_v41, %v524_v31 }
 0x3d3   : > { %v3052_v28 = vsel %vm1529_vm6, 1.0, %v6212_v36  ;;  %v724_v49 = vmin.f32 %v6224_v46, %v4202_v58  ;;  %v1202_v8 = vmul.f32 %v870_v13, %v554_v57  ;;  %v872_v26 = vmax.f32 %v856_v33, 0.0  ;;  %v6225_v13 = vld [vmem:[#allocation72_spill] sm:$0xff] }
 0x3d4   : > { %1577 = vst [vmem:[#allocation2 + $0x18] sm:$0xff] %v3052_v28  ;;  %v1514_v45 = vmul.f32 0.1, %v1498_v40  ;;  %v1483_v42 = vsub.f32 %v1467_v22, %v1216_v62  ;;  %v541_v20 = vsub.f32 %v408_v16, %v525_v63  ;;  %v556_v47 = vmax.f32 %v540_v17, 0.0 }
 0x3d5   : > { %v1411_v30 = vpop.permute.xlu0 %1410  ;;  %v857_v35 = vsub.f32 %v724_v49, %v841_v19  ;;  %v1218_v50 = vmul.f32 %v1202_v8, %v1186_v2  ;;  %v1189_v28 = vmax.f32 %v6225_v13, 0.0 }
 0x3d6   : > { %vm1530_vm7 = vcmp.gt.f32.partialorder %v1215_v54, %v1514_v45  ;;  %v1499_v12 = vmax.f32 %v1483_v42, 1e-07  ;;  %v1468_v6 = vadd.f32 %v4557_v23, %v1411_v30  ;;  %v1188_v54 = vmax.f32 %v4421_v25, 0.0 }
 0x3d7   : > { %v3053_v18 = vsel %vm1530_vm7, 1.0, %v6212_v36  ;;  %v1204_v9 = vmul.f32 %v872_v26, %v556_v47  ;;  %v557_v40 = vmax.f32 %v541_v20, 0.0  ;;  %v873_v24 = vmax.f32 %v857_v35, 0.0  ;;  %v6226_v47 = vld [vmem:[#allocation73_spill] sm:$0xff] }
 0x3d8   : > { %1578 = vst [vmem:[#allocation2 + $0x20] sm:$0xff] %v3053_v18  ;;  %v1515_v31 = vmul.f32 0.1, %v1499_v12  ;;  %v1484_v41 = vsub.f32 %v1468_v6, %v1217_v4 }
 0x3d9   : > { %v1416_v14 = vpop.permute.xlu0 %1415  ;;  %v1220_v38 = vmul.f32 %v1204_v9, %v1188_v54  ;;  %v1205_v63 = vmul.f32 %v873_v24, %v557_v40 }
 0x3da   : > { %vm1531_vm8 = vcmp.gt.f32.partialorder %v1216_v62, %v1515_v31  ;;  %v1500_v44 = vmax.f32 %v1484_v41, 1e-07  ;;  %v1469_v29 = vadd.f32 %v4557_v23, %v1416_v14 }
 0x3db   : > { %v3054_v58 = vsel %vm1531_vm8, 1.0, %v6212_v36  ;;  %v1221_v15 = vmul.f32 %v1205_v63, %v1189_v28 }
 0x3dc   : > { %1579 = vst [vmem:[#allocation2 + $0x28] sm:$0xff] %v3054_v58  ;;  %v1516_v22 = vmul.f32 0.1, %v1500_v44  ;;  %v1485_v27 = vsub.f32 %v1469_v29, %v1218_v50 }
 0x3dd   : > { %v1426_v19 = vpop.permute.xlu0 %1425 }
 0x3de   : > { %vm1532_vm9 = vcmp.gt.f32.partialorder %v1217_v4, %v1516_v22  ;;  %v1501_v33 = vmax.f32 %v1485_v27, 1e-07  ;;  %v1471_v25 = vadd.f32 %v4557_v23, %v1426_v19 }
 0x3df   : > { %v3055_v62 = vsel %vm1532_vm9, 1.0, %v6212_v36 }
 0x3e0   : > { %1580 = vst [vmem:[#allocation2 + $0x30] sm:$0xff] %v3055_v62  ;;  %v1517_v45 = vmul.f32 0.1, %v1501_v33  ;;  %v1487_v42 = vsub.f32 %v1471_v25, %v1220_v38  ;;  %v6228_v62 = vld [vmem:[#allocation66_spill] sm:$0xff] (!%p3008_p1) }
 0x3e1   : > { %v1431_v57 = vpop.permute.xlu0 %1430 }
 0x3e2   : > { %vm1533_vm10 = vcmp.gt.f32.partialorder %v1218_v50, %v1517_v45  ;;  %v1503_v17 = vmax.f32 %v1487_v42, 1e-07  ;;  %v1472_v16 = vadd.f32 %v4557_v23, %v1431_v57 }
 0x3e3   : > { %v3056_v2 = vsel %vm1533_vm10, 1.0, %v6212_v36 }
 0x3e4   : > { %1581 = vst [vmem:[#allocation2 + $0x38] sm:$0xff] %v3056_v2  ;;  %v1519_v30 = vmul.f32 0.1, %v1503_v17  ;;  %v1488_v12 = vsub.f32 %v1472_v16, %v1221_v15 }
 0x3e5   : > { %v1436_v4 = vpop.permute.xlu0 %1435 }
 0x3e6   : > { %vm1535_vm11 = vcmp.gt.f32.partialorder %v1220_v38, %v1519_v30  ;;  %v1504_v6 = vmax.f32 %v1488_v12, 1e-07  ;;  %v1473_v46 = vadd.f32 %v4557_v23, %v1436_v4 }
 0x3e7   : > { %v3058_v49 = vsel %vm1535_vm11, 1.0, %v6212_v36 }
 0x3e8   : > { %1583 = vst [vmem:[#allocation2 + $0x48] sm:$0xff] %v3058_v49  ;;  %v1520_v8 = vmul.f32 0.1, %v1504_v6  ;;  %v1489_v18 = vsub.f32 %v1473_v46, %v4435_v21 }
 0x3e9   : > { %v1441_v26 = vpop.permute.xlu0 %1440 }
 0x3ea   : > { %vm1536_vm12 = vcmp.gt.f32.partialorder %v1221_v15, %v1520_v8  ;;  %v1505_v20 = vmax.f32 %v1489_v18, 1e-07  ;;  %v1474_v31 = vadd.f32 %v4557_v23, %v1441_v26 }
 0x3eb   : > { %v3059_v41 = vsel %vm1536_vm12, 1.0, %v6212_v36 }
 0x3ec   : > { %1584 = vst [vmem:[#allocation2 + $0x50] sm:$0xff] %v3059_v41  ;;  %v1521_v35 = vmul.f32 0.1, %v1505_v20  ;;  %v1490_v14 = vsub.f32 %v1474_v31, %v6226_v47 }
 0x3ed   : > { %v1446_v50 = vpop.permute.xlu0 %1445 }
 0x3ee   : > { %vm1537_vm13 = vcmp.gt.f32.partialorder %v4435_v21, %v1521_v35  ;;  %v1506_v54 = vmax.f32 %v1490_v14, 1e-07  ;;  %v1475_v44 = vadd.f32 %v4557_v23, %v1446_v50 }
 0x3ef   : > { %v3060_v29 = vsel %vm1537_vm13, 1.0, %v6212_v36 }
 0x3f0   : > { %1585 = vst [vmem:[#allocation2 + $0x58] sm:$0xff] %v3060_v29  ;;  %v1522_v58 = vmul.f32 0.1, %v1506_v54  ;;  %v1491_v9 = vsub.f32 %v1475_v44, %v4445_v37 }
 0x3f1   : > { %v1456_v40 = vpop.permute.xlu0 %1455 }
 0x3f2   : > { %vm1538_vm14 = vcmp.gt.f32.partialorder %v6226_v47, %v1522_v58  ;;  %v1507_v22 = vmax.f32 %v1491_v9, 1e-07  ;;  %v1477_v27 = vadd.f32 %v4557_v23, %v1456_v40  ;;  %v6227_v23 = vld [vmem:[#allocation66_spill] sm:$0xff] }
 0x3f3   : > { %v3061_v24 = vsel %vm1538_vm14, 1.0, %v6212_v36  ;;  %v3598_v25 = vmov %v6227_v23  }
 0x3f4   : > { %1586 = vst [vmem:[#allocation2 + $0x60] sm:$0xff] %v3061_v24  ;;  %v1523_v13 = vmul.f32 0.1, %v1507_v22  ;;  %v1493_v21 = vsub.f32 %v1477_v27, %v4449_v39 }
 0x3f6   : > { %vm1539_vm15 = vcmp.gt.f32.partialorder %v4445_v37, %v1523_v13  ;;  %v1509_v28 = vmax.f32 %v1493_v21, 1e-07  ;;  %3009 = sbr.rel (%p3008_p1) target bundleno = 1251 (0x4e3), region = 66  ;;  %v3586_v37 = vmov (!%p3008_p1), %v6228_v62  }
 0x3f7   : > { %v3062_v19 = vsel %vm1539_vm15, 1.0, %v6212_v36 }
 0x3f8   : > { %1587 = vst [vmem:[#allocation2 + $0x68] sm:$0xff] %v3062_v19  ;;  %v1525_v33 = vmul.f32 0.1, %v1509_v28 }
 0x3fa   : > { %vm1541_vm1 = vcmp.gt.f32.partialorder %v4449_v39, %v1525_v33 }
 0x3fb   : > { %v3064_v38 = vsel %vm1541_vm1, 1.0, %v6212_v36 }
 0x3fc   : > { %1589 = vst [vmem:[#allocation2 + $0x78] sm:$0xff] %v3064_v38 }
 0x3fd LB: >> { %s3614_s5 = smov 127.0   ;;  %s1612_s4 = sadd.s32 1, %s3596_s4   ;;  %vm1617_vm4 = vcmask 1040384   ;;  %v6230_v42 = vld [vmem:[#allocation67_spill] sm:$0xff]  ;;  %s3596_s4 = sphi %s4706_s4, %s1612_s4   ;;  %s3592_s17 = sphi %s4559_s17, %s3336_s17   ;;  %v3588_v37 = vphi %v3586_v37, %v3587_v37  }
 0x3fe   : >> { %s1606_s6 = smin.f32 %s3614_s5, %s3592_s17  ;;  %v1613_v36 = vstv %s1612_s4  ;;  %p1601_p2 = scmp.lt.s32.totalorder %s1612_s4, %s4241_s26 }
 0x3ff   : >> { %p3330_p10 = scmp.lt.s32.totalorder %s1606_s6, 0  ;;  %s3331_s7 = sceil.f32 %s1606_s6 }
 0x400   : >> { %s3332_s8 = sfloor.f32 %s1606_s6 }
 0x401   : >> { %s6473_s7 = smov (!%p3330_p10, %s3331_s7), %s3332_s8 }
 0x402   : >> { %s3334_s9 = scvt.f32.s32 %s6473_s7 }
 0x404   : >> { %s1608_s10 = scalar_lea.vmem [#allocation2], %s3334_s9 }
 0x405   : >> { %v1609_v39 = vld [vmem:[%s1608_s10] sm:$0x1] }
 0x406   : >> { %vm1610_vm2 = vcmp.gt.f32.partialorder %v1609_v39, 0.5 }
 0x407   : >> { %vm1611_vm3 = vmand %vm1610_vm2, %vm4258_vm0 }
 0x408   : >> { %v1614_v45 = vsel %vm1611_vm3, %v1613_v36, %v3588_v37  }
 0x409   : >> { %vm1615_vm5 = vcmp.eq.s32.totalorder %v1614_v45, 0  ;;  %v3587_v37 = vmov %v1614_v45  }
 0x40a   : >> { %v1616_v57 = vsel %vm1615_vm5, %v6230_v42, 128.0 }
 0x40b   : >> { %v1618_v17 = vsel %vm1617_vm4, %v1616_v57, inf }
 0x40c   : >> { %1619 = vmin.xlane.f32.xlu0 %v1618_v17 }
 0x499   : >> { %v1620_v15 = vpop.xlane.xlu0 %1619 }
 0x49a   : >> { %v1621_v16 = vrot.slane %v1620_v15, 4 }
 0x49c   : >> { %v1622_v2 = vmin.f32 %v1620_v15, %v1621_v16 }
 0x49e   : >> { %v1623_v30 = vrot.slane %v1622_v2, 2 }
 0x4a0   : >> { %v1624_v12 = vmin.f32 %v1622_v2, %v1623_v30 }
 0x4a2   : >> { %v1625_v4 = vrot.slane %v1624_v12, 1 }
 0x4a4   : >> { %v1626_v6 = vmin.f32 %v1624_v12, %v1625_v4 }
 0x4a6   : >> { %3335 = vpush %v1626_v6 }
 0x4d7   : >> { %s3336_s17 = spop %3335  }
 0x4d8   : >> { %p1600_p11 = scmp.lt.f32.partialorder %s3336_s17, 128.0 }
 0x4da   : >> { %p1602_p4 = pnand %p1601_p2, %p1600_p11 }
 0x4db   : > { %v3599_v25 = vmov (%p1602_p4), %v1614_v45  }
 0x4dc   : > { %1605 = sbr.rel (!%p1602_p4) target bundleno = 1021 (0x3fd), region = 72 }
 0x4e3 PF: > { %v1628_v46 = vcvt.s32.f32 %v3600_v25  ;;  %v6231_v49 = vld [vmem:[#allocation64_spill] sm:$0xff]  ;;  %v6232_v8 = vld [vmem:[#allocation63_spill] sm:$0xff]  ;;  %v3615_v14 = vmov 7   ;;  %v6233_v13 = vld [vmem:[#allocation9_spill] sm:$0xff]  ;;  %v1753_v33 = vmul.f32 0.15915494, %v3748_v5  ;;  %v3600_v25 = vphi %v3598_v25, %v3599_v25  }
 0x4e4   : > { %vm1631_vm6 = vcmp.eq.s32.totalorder %v6231_v49, %v4473_v0  ;;  %vm1629_vm7 = vcmp.eq.s32.totalorder %v6231_v49, %v4174_v61  ;;  %vm1632_vm8 = vcmp.eq.s32.totalorder %v6231_v49, %v4476_v48  ;;  %vm1630_vm9 = vcmp.eq.s32.totalorder %v6231_v49, %v4470_v51  ;;  %3477 = vset.pattern.permute.xlu1 %v3615_v14  ;;  %v6234_v19 = vld [vmem:[#allocation10_spill] sm:$0xff]  ;;  %v6235_v25 = vld [vmem:[#allocation11_spill] sm:$0xff]  ;;  %v6236_v37 = vld [vmem:[#allocation16_spill] sm:$0xff] }
 0x4e5   : > { %v4723_v18 = vrot.slane %v1628_v46, %v6232_v8  ;;  %vm1634_vm0 = vcmp.eq.s32.totalorder %v6231_v49, %v4482_v60  ;;  %vm1633_vm10 = vcmp.eq.s32.totalorder %v6231_v49, %v4479_v53  ;;  %3476 = vset.pattern.permute.xlu0 %v3615_v14  ;;  %vm1636_vm11 = vcmp.eq.s32.totalorder %v6231_v49, %v4490_v1  ;;  %v6237_v45 = vld [vmem:[#allocation13_spill] sm:$0xff]  ;;  %v6238_v17 = vld [vmem:[#allocation18_spill] sm:$0xff]  ;;  %v6239_v12 = vld [vmem:[#allocation15_spill] sm:$0xff] }
 0x4e6   : > { %vm1635_vm12 = vcmp.eq.s32.totalorder %v6231_v49, %v4485_v59  ;;  %vm1638_vm13 = vcmp.eq.s32.totalorder %v6231_v49, %v4496_v56  ;;  %vm1637_vm14 = vcmp.eq.s32.totalorder %v6231_v49, %v4493_v55  ;;  %vm1640_vm15 = vcmp.eq.s32.totalorder %v6231_v49, %v4502_v52  ;;  %v6240_v6 = vld [vmem:[#allocation12_spill] sm:$0xff] }
 0x4e7   : > { %v1651_v26 = vsel %vm1631_vm6, %v4723_v18, 0.0  ;;  %v1649_v20 = vsel %vm1629_vm7, %v4723_v18, 0.0  ;;  %v1652_v31 = vsel %vm1632_vm8, %v4723_v18, 0.0  ;;  %v1650_v41 = vsel %vm1630_vm9, %v4723_v18, 0.0 }
 0x4e8   : > { %1669 = vadd.xlane.f32.xlu1 %v1651_v26  ;;  %1665 = vadd.xlane.f32.xlu0 %v1649_v20  ;;  %v1654_v35 = vsel %vm1634_vm0, %v4723_v18, 0.0  ;;  %v1653_v47 = vsel %vm1633_vm10, %v4723_v18, 0.0  ;;  %v1656_v50 = vsel %vm1636_vm11, %v4723_v18, 0.0  ;;  %v1655_v54 = vsel %vm1635_vm12, %v4723_v18, 0.0  ;;  %v6241_v20 = vld [vmem:[#allocation20_spill] sm:$0xff] }
 0x4e9   : > { %v1658_v44 = vsel %vm1638_vm13, %v4723_v18, 0.0  ;;  %v1657_v29 = vsel %vm1637_vm14, %v4723_v18, 0.0  ;;  %vm1639_vm1 = vcmp.eq.s32.totalorder %v6231_v49, %v4499_v10  ;;  %v1660_v58 = vsel %vm1640_vm15, %v4723_v18, 0.0 }
 0x4ea   : > { %v1659_v9 = vsel %vm1639_vm1, %v4723_v18, 0.0  ;;  %vm1642_vm2 = vcmp.eq.s32.totalorder %v6231_v49, %v4508_v3  ;;  %vm1641_vm3 = vcmp.eq.s32.totalorder %v6231_v49, %v4505_v43  ;;  %vm1644_vm4 = vcmp.eq.s32.totalorder %v6231_v49, %v4514_v32 }
 0x4eb   : > { %v1662_v40 = vsel %vm1642_vm2, %v4723_v18, 0.0  ;;  %v1661_v22 = vsel %vm1641_vm3, %v4723_v18, 0.0  ;;  %vm1643_vm5 = vcmp.eq.s32.totalorder %v6231_v49, %v4511_v34  ;;  %v1664_v27 = vsel %vm1644_vm4, %v4723_v18, 0.0 }
 0x4ec   : > { %1671 = vadd.xlane.f32.xlu1 %v1652_v31  ;;  %1667 = vadd.xlane.f32.xlu0 %v1650_v41  ;;  %v1663_v24 = vsel %vm1643_vm5, %v4723_v18, 0.0  ;;  %v1747_v21 = vmul.f32 0.15915494, %v6233_v13  ;;  %v1756_v23 = vmul.f32 0.15915494, %v3762_v11  ;;  %v1769_v39 = vadd.f32 0.5, %v1753_v33 }
 0x4ed   : > { %v1758_v42 = vmul.f32 0.15915494, %v6237_v45  ;;  %v1752_v2 = vmul.f32 0.15915494, %v6234_v19  ;;  %v1760_v4 = vmul.f32 0.15915494, %v6239_v12 }
 0x4ee   : > { %v1748_v28 = vadd.f32 0.5, %v1747_v21  ;;  %v1772_v63 = vadd.f32 0.5, %v1756_v23  ;;  %v1785_v15 = vfloor.f32 %v1769_v39  ;;  %v6242_v31 = vld [vmem:[#allocation17_spill] sm:$0xff]  ;;  %v3621_v34 = vmov 920167782  }
 0x4ef   : > { %v1774_v46 = vadd.f32 0.5, %v1758_v42  ;;  %v1762_v41 = vmul.f32 0.15915494, %v6242_v31 }
 0x4f0   : > { %1675 = vadd.xlane.f32.xlu1 %v1654_v35  ;;  %1673 = vadd.xlane.f32.xlu0 %v1653_v47  ;;  %v1749_v38 = vfloor.f32 %v1748_v28  ;;  %v1788_v30 = vfloor.f32 %v1772_v63  ;;  %v1754_v35 = vmul.f32 0.15915494, %v3753_v7  ;;  %v1801_v47 = vmul.f32 6.2831855, %v1785_v15  ;;  %v6246_v15 = vld [vmem:[#allocation14_spill] sm:$0xff] }
 0x4f1   : > { %v1778_v21 = vadd.f32 0.5, %v1762_v41  ;;  %v3617_v41 = vmov 2102212464  }
 0x4f2   : > { %v1750_v62 = vmul.f32 6.2831855, %v1749_v38  ;;  %v4797_v33 = vadd.f32 0.5, %v1754_v35  ;;  %v4800_v38 = vmul.f32 0.15915494, %v6240_v6  ;;  %v1817_v23 = vsub.f32 %v3748_v5, %v1801_v47 }
 0x4f4   : > { %1679 = vadd.xlane.f32.xlu1 %v1656_v50  ;;  %1677 = vadd.xlane.f32.xlu0 %v1655_v54  ;;  %v4778_v36 = vsub.f32 %v6233_v13, %v1750_v62  ;;  %v4790_v50 = vadd.f32 0.5, %v1752_v2  ;;  %v1755_v54 = vmul.f32 0.15915494, %v6235_v25 }
 0x4f6   : > { %v2141_v57 = vand.u32 2139095040, %v4778_v36  ;;  %v1784_v39 = vfloor.f32 %v4790_v50  ;;  %v4804_v63 = vadd.f32 0.5, %v1755_v54  ;;  %v3619_v54 = vmov 2475754826  }
 0x4f7   : > { %vm2140_vm12 = vcmp.lt.s32.totalorder %v4778_v36, 0  ;;  %vm2230_vm5 = vweird.f32 %v4778_v36 }
 0x4f8   : > { %1683 = vadd.xlane.f32.xlu1 %v1658_v44  ;;  %1681 = vadd.xlane.f32.xlu0 %v1657_v29  ;;  %v2142_v16 = vshrl.u32 %v2141_v57, 23  ;;  %v1804_v44 = vmul.f32 6.2831855, %v1788_v30  ;;  %v1776_v29 = vadd.f32 0.5, %v1760_v4 }
 0x4fa   : > { %v3098_v26 = vadd.s32 4294967169, %v2142_v16  ;;  %v1820_v42 = vsub.f32 %v3762_v11, %v1804_v44  ;;  %v1792_v57 = vfloor.f32 %v1776_v29 }
 0x4fc   : > { %1687 = vadd.xlane.f32.xlu1 %v1660_v58  ;;  %1685 = vadd.xlane.f32.xlu0 %v1659_v9  ;;  %v2148_v14 = vadd.s32 1, %v3098_v26  ;;  %v1790_v58 = vfloor.f32 %v1774_v46  ;;  %v6243_v9 = vld [vmem:[#allocation19_spill] sm:$0xff]  ;;  %v6049_v46 = vmov 6   ;;  %v6054_v26 = vand.u32 2147483647, %v4778_v36 }
 0x4fe   : > { %vm2149_vm6 = vcmp.gt.s32.totalorder %v2148_v14, 0  ;;  %v1806_v16 = vmul.f32 6.2831855, %v1790_v58  ;;  %v3620_v58 = vmov 2131351028  }
 0x4ff   : > { %v2150_v28 = vsel %vm2149_vm6, %v2148_v14, 0  ;;  %v3618_v14 = vmov 683565275  }
 0x500   : > { %1691 = vadd.xlane.f32.xlu1 %v1662_v40  ;;  %1689 = vadd.xlane.f32.xlu0 %v1661_v22  ;;  %v1764_v40 = vmul.f32 0.15915494, %v6243_v9  ;;  %v6244_v22 = vld [vmem:[#allocation21_spill] sm:$0xff]  ;;  %v2152_v62 = vand.u32 31, %v2150_v28  ;;  %v2151_v47 = vshrl.u32 %v2150_v28, 5 }
 0x502   : > { %v4808_v2 = vadd.f32 0.5, %v1764_v40  ;;  %v2153_v4 = vsub.s32 32, %v2152_v62  ;;  %v2164_v35 = vshll.u32 %v3617_v41, %v2152_v62  ;;  %v2155_v50 = vshll.u32 %v3618_v14, %v2152_v62 }
 0x503   : > { %v2158_v29 = vshll.u32 %v3619_v54, %v2152_v62  ;;  %v2167_v55 = vshll.u32 %v3621_v34, %v2152_v62  ;;  %vm2170_vm7 = vcmp.lt.s32.totalorder %v2151_v47, 1  ;;  %vm2171_vm8 = vcmp.lt.s32.totalorder %v2151_v47, 2 }
 0x504   : > { %1695 = vadd.xlane.f32.xlu1 %v1664_v27  ;;  %1693 = vadd.xlane.f32.xlu0 %v1663_v24  ;;  %v1766_v27 = vmul.f32 0.15915494, %v6244_v22  ;;  %v6245_v24 = vld [vmem:[#allocation22_spill] sm:$0xff]  ;;  %v2156_v44 = vshrl.u32 %v3619_v54, %v2153_v4  ;;  %v2159_v40 = vshrl.u32 %v3620_v58, %v2153_v4  ;;  %v2165_v43 = vshrl.u32 %v3621_v34, %v2153_v4 }
 0x505   : > { %v3622_v54 = vmov 1326507024   ;;  %vm2172_vm9 = vcmp.lt.s32.totalorder %v2151_v47, 3  ;;  %vm2173_vm0 = vcmp.lt.s32.totalorder %v2151_v47, 4 }
 0x506   : > { %v4810_v30 = vadd.f32 0.5, %v1766_v27  ;;  %v2161_v27 = vshll.u32 %v3620_v58, %v2152_v62  ;;  %v2160_v28 = vor.u32 %v2159_v40, %v2158_v29  ;;  %v2166_v1 = vor.u32 %v2165_v43, %v2164_v35 }
 0x507   : > { %v2168_v32 = vshrl.u32 %v3622_v54, %v2153_v4  ;;  %v2154_v43 = vshrl.u32 %v3618_v14, %v2153_v4  ;;  %v1786_v35 = vfloor.f32 %v4797_v33  ;;  %v1759_v40 = vmul.f32 0.15915494, %v6246_v15 }
 0x508   : > { %v6247_v54 = vmov 6  }
 0x509   : > { %v2169_v62 = vor.u32 %v2168_v32, %v2167_v55  ;;  %v1798_v55 = vfloor.f32 %v4810_v30  ;;  %v1787_v30 = vfloor.f32 %v4804_v63  ;;  %v1775_v63 = vadd.f32 0.5, %v1759_v40 }
 0x515   : > { %1917 = vperm.xlu1 %3477, %v3748_v5   ;;  %v1794_v5 = vfloor.f32 %v1778_v21  ;;  %v2162_v21 = vshrl.u32 %v3617_v41, %v2153_v4 }
 0x517   : > { %v2163_v10 = vor.u32 %v2162_v21, %v2161_v27  ;;  %v1810_v41 = vmul.f32 6.2831855, %v1794_v5  ;;  %v1802_v21 = vmul.f32 6.2831855, %v1786_v35  ;;  %v1763_v35 = vmul.f32 0.15915494, %v6238_v17 }
 0x519   : > { %1921 = vperm.xlu1 %3477, %v3753_v7   ;;  %v2182_v5 = vsel %vm2170_vm7, %v2160_v28, %v2163_v10 }
 0x51a   : > { %1913 = vperm.xlu0 %3476, %v6234_v19  }
 0x51d   : > { %1925 = vperm.xlu1 %3477, %v6235_v25  }
 0x51e   : > { %1949 = vperm.xlu0 %3476, %v6236_v37  }
 0x521   : > { %1929 = vperm.xlu1 %3477, %v3762_v11   ;;  %v2145_v11 = vand.u32 8388607, %v6054_v26  ;;  %v1822_v26 = vsub.f32 %v6237_v45, %v1806_v16 }
 0x522   : > { %1957 = vperm.xlu0 %3476, %v6238_v17  }
 0x523   : > { %v2146_v8 = vor.u32 8388608, %v2145_v11  ;;  %v1796_v11 = vfloor.f32 %v4808_v2  ;;  %v1800_v2 = vmul.f32 6.2831855, %v1784_v39 }
 0x525   : > { %1933 = vperm.xlu1 %3477, %v6240_v6   ;;  %v1816_v27 = vsub.f32 %v6234_v19, %v1800_v2  ;;  %v1818_v19 = vsub.f32 %v3753_v7, %v1802_v21  ;;  %v1765_v7 = vmul.f32 0.15915494, %v6241_v20 }
 0x526   : > { %1965 = vperm.xlu0 %3476, %v6241_v20  }
 0x529   : > { %1937 = vperm.xlu1 %3477, %v6237_v45   ;;  %v2186_v45 = vshll.u32 %v2146_v8, 8 }
 0x52a   : > { %1973 = vperm.xlu0 %3476, %v6245_v24  }
 0x52d   : > { %1941 = vperm.xlu1 %3477, %v6246_v15  }
 0x52e   : > { %3479 = vset.pattern.permute.xlu0 %v6049_v46  ;;  %v1808_v46 = vmul.f32 6.2831855, %v1792_v57 }
 0x52f   : > { %2608 = vperm.xlu0 %3479, %v1817_v23   ;;  %v2157_v23 = vor.u32 %v2156_v44, %v2155_v50  ;;  %v2175_v50 = vsel %vm2173_vm0, %v2163_v10, 2102212464 }
 0x530   : > { %v1824_v34 = vsub.f32 %v6239_v12, %v1808_v46  ;;  %v1812_v46 = vmul.f32 6.2831855, %v1796_v11 }
 0x531   : > { %1945 = vperm.xlu1 %3477, %v6239_v12   ;;  %v2178_v57 = vsel %vm2170_vm7, %v2157_v23, %v2160_v28  ;;  %v2174_v8 = vsel %vm2170_vm7, %v2154_v43, %v2157_v23  ;;  %v2183_v12 = vsel %vm2173_vm0, %v2169_v62, 1326507024 }
 0x532   : > { %v2184_v32 = vsel %vm2172_vm9, %v2166_v1, %v2183_v12  ;;  %v1828_v47 = vsub.f32 %v6243_v9, %v1812_v46 }
 0x533   : > { %2623 = vperm.xlu0 %3479, %v1820_v42   ;;  %v2179_v42 = vsel %vm2173_vm0, %v2166_v1, 920167782  ;;  %v2185_v14 = vsel %vm2171_vm8, %v2182_v5, %v2184_v32  ;;  %v1773_v1 = vadd.f32 0.5, %v4800_v38  ;;  %v1761_v38 = vmul.f32 0.15915494, %v6236_v37 }
 0x534   : > { %v2180_v16 = vsel %vm2172_vm9, %v2163_v10, %v2179_v42  ;;  %v1826_v10 = vsub.f32 %v6242_v31, %v1810_v41  ;;  %v4841_v29 = vmul.u32.u64.low %v2186_v45, %v2185_v14  ;;  %v4842_v58 = vmul.u32.u64.high %v2186_v45, %v2185_v14, %v4841_v29 }
 0x535   : > { %1953 = vperm.xlu1 %3477, %v6242_v31   ;;  %v2181_v44 = vsel %vm2171_vm8, %v2178_v57, %v2180_v16  ;;  %v1803_v41 = vmul.f32 6.2831855, %v1787_v30  ;;  %v1789_v11 = vfloor.f32 %v1773_v1  ;;  %v1777_v43 = vadd.f32 0.5, %v1761_v38 }
 0x536   : > { %v4834_v33 = vmul.u32.u64.low %v2186_v45, %v2181_v44  ;;  %v4835_v4 = vmul.u32.u64.high %v2186_v45, %v2181_v44, %v4834_v33  ;;  %v1767_v32 = vmul.f32 0.15915494, %v6245_v24 }
 0x537   : > { %2633 = vperm.xlu0 %3479, %v1822_v26   ;;  %v2176_v26 = vsel %vm2172_vm9, %v2160_v28, %v2175_v50  ;;  %v1814_v28 = vmul.f32 6.2831855, %v1798_v55  ;;  %v1819_v62 = vsub.f32 %v6235_v25, %v1803_v41  ;;  %v1805_v16 = vmul.f32 6.2831855, %v1789_v11 }
 0x538   : > { %v2177_v39 = vsel %vm2171_vm8, %v2174_v8, %v2176_v26  ;;  %v2196_v23 = vadd.s32 1, %v4835_v4  ;;  %vm2195_vm10 = vc.u32 %v4842_v58, %v4834_v33  ;;  %v1793_v8 = vfloor.f32 %v1777_v43 }
 0x539   : > { %1961 = vperm.xlu1 %3477, %v6243_v9   ;;  %v2193_v31 = vmul.u32 %v2186_v45, %v2177_v39  ;;  %v1830_v9 = vsub.f32 %v6244_v22, %v1814_v28  ;;  %v1821_v2 = vsub.f32 %v6240_v6, %v1805_v16  ;;  %v1781_v55 = vadd.f32 0.5, %v1765_v7 }
 0x53a   : > { %v2197_v57 = vsel %vm2195_vm10, %v2196_v23, %v4835_v4  ;;  %v1809_v4 = vmul.f32 6.2831855, %v1793_v8  ;;  %v1783_v29 = vadd.f32 0.5, %v1767_v32  ;;  %v2194_v40 = vadd.s32 %v4834_v33, %v4842_v58 }
 0x53b   : > { %2643 = vperm.xlu0 %3479, %v1824_v34   ;;  %v2198_v42 = vadd.s32 %v2197_v57, %v2193_v31  ;;  %v1791_v34 = vfloor.f32 %v1775_v63  ;;  %v1797_v14 = vfloor.f32 %v1781_v55  ;;  %vm2362_vm10 = vcmask 1045504  }
 0x53c   : > { %v1825_v30 = vsub.f32 %v6236_v37, %v1809_v4  ;;  %v1799_v21 = vfloor.f32 %v1783_v29 }
 0x53d   : > { %1969 = vperm.xlu1 %3477, %v6244_v22   ;;  %v2199_v45 = vadd.s32 536870912, %v2198_v42  ;;  %v1807_v5 = vmul.f32 6.2831855, %v1791_v34  ;;  %v1779_v22 = vadd.f32 0.5, %v1763_v35 }
 0x53e   : > { %v1815_v38 = vmul.f32 6.2831855, %v1799_v21 }
 0x53f   : > { %2653 = vperm.xlu0 %3479, %v1826_v10   ;;  %v2200_v50 = vshrl.u32 %v2199_v45, 30  ;;  %v1823_v25 = vsub.f32 %v6246_v15, %v1807_v5  ;;  %v1795_v10 = vfloor.f32 %v1779_v22 }
 0x540   : > { %v1831_v58 = vsub.f32 %v6245_v24, %v1815_v38 }
 0x541   : > { %3478 = vset.pattern.permute.xlu1 %v6247_v54  ;;  %v2201_v44 = vshll.u32 %v2200_v50, 30  ;;  %v1811_v6 = vmul.f32 6.2831855, %v1795_v10  ;;  %v2224_v34 = vsub.s32 4, %v2200_v50 }
 0x542   : > { %2603 = vperm.xlu1 %3478, %v1816_v27   ;;  %v1813_v27 = vmul.f32 6.2831855, %v1797_v14 }
 0x543   : > { %2663 = vperm.xlu0 %3479, %v1828_v47   ;;  %v2202_v26 = vsub.s32 %v2198_v42, %v2201_v44  ;;  %v1827_v15 = vsub.f32 %v6238_v17, %v1811_v6  ;;  %v6248_v17 = vand.u32 2147483647, %v4778_v36  ;;  %v2225_v43 = vsel %vm2140_vm12, %v2224_v34, %v2200_v50 }
 0x544   : > { %v1829_v37 = vsub.f32 %v6241_v20, %v1813_v27 }
 0x545   : > { %v2204_v12 = vsub.s32 0, %v2202_v26  ;;  %vm2139_vm13 = vcmp.le.f32.partialorder %v6248_v17, 0.7853982 }
 0x546   : > { %2613 = vperm.xlu1 %3478, %v1818_v19  }
 0x547   : > { %2673 = vperm.xlu0 %3479, %v1830_v9   ;;  %v3099_v46 = vmin.u32 %v2204_v12, %v2202_v26 }
 0x549   : > { %v2206_v39 = vclz %v3099_v46  ;;  %v1978_v46 = vsub.s32 7, %v4174_v61 }
 0x54a   : > { %2618 = vperm.xlu1 %3478, %v1819_v62   ;;  %v2227_v62 = vsel %vm2139_vm13, 0, %v2225_v43 }
 0x54b   : > { %v3100_v1 = vadd.s32 4294967294, %v2206_v39  ;;  %v2231_v16 = vadd.s32 3, %v2227_v62  ;;  %v2335_v24 = vand.u32 3, %v2227_v62  ;;  %v4897_v27 = vrot.slane %v6233_v13, %v1978_v46 }
 0x54d   : > { %vm3101_vm11 = vcmp.lt.s32.totalorder %v3100_v1, 0  ;;  %v2232_v35 = vand.u32 3, %v2231_v16  ;;  %vm2340_vm15 = vcmp.eq.s32.totalorder %v2335_v24, 2  ;;  %vm2337_vm2 = vcmp.eq.s32.totalorder %v2335_v24, 0 }
 0x54e   : > { %2628 = vperm.xlu1 %3478, %v1821_v2   ;;  %v2209_v31 = vsel %vm3101_vm11, 0, %v3100_v1  ;;  %vm2336_vm4 = vcmp.lt.s32.totalorder %v2335_v24, 2  ;;  %v6250_v1 = vmov 0.0   ;;  %v6070_v24 = vmov 0.0|0.0  }
 0x54f   : > { %v2210_v23 = vsub.s32 32, %v2209_v31  ;;  %v2211_v47 = vshll.u32 %v2202_v26, %v2209_v31  ;;  %v2214_v28 = vsub.s32 4294967266, %v2209_v31  ;;  %vm2237_vm14 = vcmp.eq.s32.totalorder %v2232_v35, 2  ;;  %v6249_v26 = vld [vmem:[#allocation67_spill] sm:$0xff]  ;;  %3296 = vmatprep.subr.bf16.mxu1 %v6070_v24 }
 0x550   : > { %vm2234_vm1 = vcmp.eq.s32.totalorder %v2232_v35, 0  ;;  %vm2233_vm3 = vcmp.lt.s32.totalorder %v2232_v35, 2  ;;  %v4875_v12 = vadd.f32 1.0, %v6249_v26 }
 0x551   : > { %v2212_v54 = vshrl.u32 %v2194_v40, %v2210_v23  ;;  %v2215_v63 = vadd.s32 127, %v2214_v28  ;;  %v2345_v28 = vmul.f32 %v4897_v27, %v6233_v13 }
 0x552   : > { %2638 = vperm.xlu1 %3478, %v1823_v25  }
 0x553   : > { %v2213_v57 = vor.u32 %v2212_v54, %v2211_v47  ;;  %v2216_v19 = vshll.u32 %v2215_v63, 23 }
 0x555   : > { %v2217_v41 = vor.u32 4788187, %v2216_v19  ;;  %v2220_v33 = vcvt.s32.f32 %v2213_v57  ;;  %v3623_v19 = vmov 1.0|1.0  }
 0x556   : > { %2648 = vperm.xlu1 %3478, %v1825_v30  }
 0x557   : > { %v2218_v11 = vand.u32 2147483647, %v2217_v41 }
 0x559   : > { %v2221_v42 = vmul.f32 %v2220_v33, %v2218_v11 }
 0x55a   : > { %2658 = vperm.xlu1 %3478, %v1827_v15  }
 0x55b   : > { %v2222_v9 = vxor.u32 2147483648, %v2221_v42 }
 0x55d   : > { %v2223_v45 = vsel %vm2140_vm12, %v2222_v9, %v2221_v42 }
 0x55e   : > { %2668 = vperm.xlu1 %3478, %v1829_v37   ;;  %v2226_v20 = vsel %vm2139_vm13, %v4778_v36, %v2223_v45  ;;  %vm2364_vm13 = vcmask 1046528  }
 0x55f   : > { %3480 = vcosq.f32 %v2226_v20 }
 0x560   : > { %3482 = vsinq.f32 %v2226_v20 }
 0x562   : > { %2678 = vperm.xlu1 %3478, %v1831_v58  }
 0x569   : > { %v3481_v44 = vpop.eup %3480 }
 0x56a   : > { %v3483_v5 = vpop.eup %3482  ;;  %v2238_v7 = vxor.u32 2147483648, %v3481_v44 }
 0x56b   : > { %v2235_v2 = vxor.u32 2147483648, %v3483_v5 }
 0x56c   : > { %v2239_v8 = vsel %vm2237_vm14, %v2238_v7, %v3483_v5  ;;  %v2342_v22 = vsel %vm2340_vm15, %v2238_v7, %v3483_v5 }
 0x56d   : > { %v2236_v50 = vsel %vm2234_vm1, %v3481_v44, %v2235_v2  ;;  %v2339_v55 = vsel %vm2337_vm2, %v3481_v44, %v2235_v2 }
 0x56e   : > { %v2240_v4 = vsel %vm2233_vm3, %v2236_v50, %v2239_v8  ;;  %v2343_v10 = vsel %vm2336_vm4, %v2339_v55, %v2342_v22 }
 0x56f   : > { %v2241_v39 = vsel %vm2230_vm5, nan, %v2240_v4  ;;  %v2344_v14 = vsel %vm2230_vm5, nan, %v2343_v10 }
 0x570   : > { %v2347_v29 = vrot.slane %v2241_v39, 7  ;;  %v2351_v36 = vrot.slane %v2344_v14, 7 }
 0x572   : > { %v2349_v15 = vmul.f32 %v2347_v29, %v6233_v13  ;;  %v2353_v38 = vmul.f32 %v2351_v36, %v6233_v13 }
 0x574   : > { %v2355_v57 = vrot.slane %v2349_v15, 1 }
 0x575   : > { %v4878_v32 = vpop.xlane.xlu1 %1669  ;;  %v4880_v25 = vpop.xlane.xlu0 %1665 }
 0x576   : > { %vm1700_vm6 = vcmp.eq.f32.partialorder %v4878_v32, %v4875_v12  ;;  %vm1698_vm7 = vcmp.eq.f32.partialorder %v4880_v25, %v4875_v12  ;;  %v2363_v11 = vsel %vm2362_vm10, %v2345_v28, %v2355_v57 }
 0x577   : > { %v4894_v40 = vsel %vm1698_vm7, 1.0, %v6250_v1  ;;  %v4903_v21 = vsel %vm1700_vm6, 1.0, %v6250_v1  ;;  %v4959_v9 = vsel %vm2364_vm13, %v2363_v11, %v2353_v38  ;;  %v6272_v11 = vmov 0 }
 0x578   : > { %6251 = vst [vmem:[#allocation57_spill] sm:$0xff] %v4894_v40  ;;  %6255 = vst [vmem:[#allocation71_spill] sm:$0xff] %v4959_v9  ;;  %3226 = vmatprep.mubr.f32.mxu0 %v4959_v9 }
 0x579   : > { %v4885_v30 = vpop.xlane.xlu1 %1671  ;;  %v4887_v6 = vpop.xlane.xlu0 %1667 }
 0x57a   : > { %vm1701_vm8 = vcmp.eq.f32.partialorder %v4885_v30, %v4875_v12  ;;  %vm1699_vm9 = vcmp.eq.f32.partialorder %v4887_v6, %v4875_v12 }
 0x57b   : > { %v4909_v31 = vsel %vm1701_vm8, 1.0, %v6250_v1  ;;  %v4917_v47 = vsel %vm1699_vm9, 1.0, %v6250_v1  ;;  %vm3264_vm0 = vmpackc.low %vm1699_vm9, %vm1698_vm7 }
 0x57c   : > { %6252 = vst [vmem:[#allocation44_spill] sm:$0xff] %v4917_v47  ;;  %3265 = vmatprep.subr.msk.bf16.mxu0 %vm3264_vm0, %v3623_v19  ;;  %vm3268_vm14 = vmpackc.low %vm1701_vm8, %vm1700_vm6 }
 0x57d   : > { %v4923_v63 = vpop.xlane.xlu1 %1675  ;;  %v4925_v37 = vpop.xlane.xlu0 %1673  ;;  %3267 = vmatpush3.bf16.msk.msra.mxu0 %vm3264_vm0, %v3623_v19 }
 0x57e   : > { %vm1703_vm11 = vcmp.eq.f32.partialorder %v4923_v63, %v4875_v12  ;;  %vm1702_vm12 = vcmp.eq.f32.partialorder %v4925_v37, %v4875_v12  ;;  %3269 = vmatprep.subr.msk.bf16.mxu0 %vm3268_vm14, %v3623_v19 }
 0x57f   : > { %v4937_v41 = vsel %vm1703_vm11, 1.0, %v6250_v1  ;;  %v4944_v33 = vsel %vm1702_vm12, 1.0, %v6250_v1  ;;  %vm3272_vm2 = vmpackc.low %vm1703_vm11, %vm1702_vm12 }
 0x580   : > { %6253 = vst [vmem:[#allocation56_spill] sm:$0xff] %v4937_v41  ;;  %6254 = vst [vmem:[#allocation42_spill] sm:$0xff] %v4944_v33 }
 0x581   : > { %v4955_v42 = vpop.xlane.xlu1 %1679  ;;  %v4957_v17 = vpop.xlane.xlu0 %1677  ;;  %3271 = vmatpush3.bf16.msk.msra.mxu0 %vm3268_vm14, %v3623_v19 }
 0x582   : > { %vm1705_vm15 = vcmp.eq.f32.partialorder %v4955_v42, %v4875_v12  ;;  %vm1704_vm1 = vcmp.eq.f32.partialorder %v4957_v17, %v4875_v12  ;;  %3273 = vmatprep.subr.msk.bf16.mxu0 %vm3272_vm2, %v3623_v19 }
 0x583   : > { %v4970_v45 = vsel %vm1705_vm15, 1.0, %v6250_v1  ;;  %v4977_v34 = vsel %vm1704_vm1, 1.0, %v6250_v1  ;;  %vm3276_vm5 = vmpackc.low %vm1705_vm15, %vm1704_vm1  ;;  %vm1834_vm15 = vcmp.eq.f32.partialorder %v4878_v32, %v4723_v18  ;;  %vm1850_vm1 = vcmp.ge.f32.partialorder %v4878_v32, 1.0 }
 0x584   : > { %6256 = vst [vmem:[#allocation75_spill] sm:$0xff] %v4970_v45  ;;  %v6262_v32 = vmov 0 }
 0x585   : > { %v4988_v43 = vpop.xlane.xlu1 %1683  ;;  %v4990_v62 = vpop.xlane.xlu0 %1681  ;;  %3275 = vmatpush3.bf16.msk.msra.mxu0 %vm3272_vm2, %v3623_v19  ;;  %vm1832_vm2 = vcmp.eq.f32.partialorder %v4880_v25, %v4723_v18 }
 0x586   : > { %vm1707_vm3 = vcmp.eq.f32.partialorder %v4988_v43, %v4875_v12  ;;  %vm1706_vm4 = vcmp.eq.f32.partialorder %v4990_v62, %v4875_v12  ;;  %3277 = vmatprep.subr.msk.bf16.mxu0 %vm3276_vm5, %v3623_v19 }
 0x587   : > { %v5000_v16 = vsel %vm1707_vm3, 1.0, %v6250_v1  ;;  %v5004_v35 = vsel %vm1706_vm4, 1.0, %v6250_v1  ;;  %vm3280_vm8 = vmpackc.low %vm1707_vm3, %vm1706_vm4  ;;  %vm1848_vm3 = vcmp.ge.f32.partialorder %v4880_v25, 1.0  ;;  %vm1833_vm4 = vcmp.eq.f32.partialorder %v4887_v6, %v4723_v18 }
 0x588   : > { %6257 = vst [vmem:[#allocation27_spill] sm:$0xff] %v5004_v35  ;;  %v6264_v25 = vmov 0 }
 0x589   : > { %v5015_v44 = vpop.xlane.xlu1 %1687  ;;  %v5017_v5 = vpop.xlane.xlu0 %1685  ;;  %3279 = vmatpush3.bf16.msk.msra.mxu0 %vm3276_vm5, %v3623_v19  ;;  %vm1849_vm5 = vcmp.ge.f32.partialorder %v4887_v6, 1.0  ;;  %v6266_v6 = vmov 0 }
 0x58a   : > { %vm1709_vm6 = vcmp.eq.f32.partialorder %v5015_v44, %v4875_v12  ;;  %vm1708_vm7 = vcmp.eq.f32.partialorder %v5017_v5, %v4875_v12  ;;  %3281 = vmatprep.subr.msk.bf16.mxu0 %vm3280_vm8, %v3623_v19 }
 0x58b   : > { %v5027_v7 = vsel %vm1709_vm6, 1.0, %v6250_v1  ;;  %v5031_v2 = vsel %vm1708_vm7, 1.0, %v6250_v1  ;;  %vm3284_vm10 = vmpackc.low %vm1709_vm6, %vm1708_vm7  ;;  %vm2013_vm6 = vcmp.lt.s32.totalorder %v4470_v51, %v6231_v49 }
 0x58c   : > { %6258 = vst [vmem:[#allocation24_spill] sm:$0xff] %v5027_v7  ;;  %6259 = vst [vmem:[#allocation25_spill] sm:$0xff] %v5031_v2 }
 0x58d   : > { %v5039_v22 = vpop.xlane.xlu1 %1691  ;;  %v5041_v26 = vpop.xlane.xlu0 %1689  ;;  %3283 = vmatpush3.bf16.msk.msra.mxu0 %vm3280_vm8, %v3623_v19  ;;  %vm2014_vm8 = vcmp.lt.s32.totalorder %v4473_v0, %v6231_v49 }
 0x58e   : > { %vm1711_vm9 = vcmp.eq.f32.partialorder %v5039_v22, %v4875_v12  ;;  %vm1710_vm0 = vcmp.eq.f32.partialorder %v5041_v26, %v4875_v12  ;;  %3285 = vmatprep.subr.msk.bf16.mxu0 %vm3284_vm10, %v3623_v19 }
 0x58f   : > { %v5051_v50 = vsel %vm1711_vm9, 1.0, %v6250_v1  ;;  %v5055_v55 = vsel %vm1710_vm0, 1.0, %v6250_v1  ;;  %vm3288_vm13 = vmpackc.low %vm1711_vm9, %vm1710_vm0 }
 0x590   : > { %6260 = vst [vmem:[#allocation23_spill] sm:$0xff] %v5051_v50  ;;  %6261 = vst [vmem:[#allocation33_spill] sm:$0xff] %v5055_v55 }
 0x591   : > { %v5063_v10 = vpop.xlane.xlu1 %1695  ;;  %v5065_v46 = vpop.xlane.xlu0 %1693  ;;  %3287 = vmatpush3.bf16.msk.msra.mxu0 %vm3284_vm10, %v3623_v19  ;;  %vm5105_vm0 = vmand %vm1834_vm15, %vm1850_vm1  ;;  %vm1851_vm15 = vcmp.ge.f32.partialorder %v4885_v30, 1.0 }
 0x592   : > { %vm1713_vm11 = vcmp.eq.f32.partialorder %v5063_v10, %v4875_v12  ;;  %vm1712_vm12 = vcmp.eq.f32.partialorder %v5065_v46, %v4875_v12  ;;  %3289 = vmatprep.subr.msk.bf16.mxu0 %vm3288_vm13, %v3623_v19  ;;  %v6263_v32 = vsel %vm5105_vm0, 4294967295, %v6262_v32  ;;  %vm5109_vm10 = vmand %vm1832_vm2, %vm1848_vm3 }
 0x593   : > { %v5072_v39 = vsel %vm1713_vm11, 1.0, %v6250_v1  ;;  %v5076_v14 = vsel %vm1712_vm12, 1.0, %v6250_v1  ;;  %vm3292_vm14 = vmpackc.low %vm1713_vm11, %vm1712_vm12  ;;  %v6265_v25 = vsel %vm5109_vm10, 4294967295, %v6264_v25  ;;  %vm2012_vm12 = vcmp.lt.s32.totalorder %v4174_v61, %v6231_v49 }
 0x594   : > { %vm5113_vm11 = vmand %vm1833_vm4, %vm1849_vm5 }
 0x595   : > { %v1918_v36 = vpop.permute.xlu1 %1917  ;;  %3291 = vmatpush3.bf16.msk.msra.mxu0 %vm3288_vm13, %v3623_v19  ;;  %v6267_v6 = vsel %vm5113_vm11, 4294967295, %v6266_v6  ;;  %vm2447_vm11 = vcmp.gt.f32.partialorder %v4894_v40, 0.5 }
 0x596   : > { %3293 = vmatprep.subr.msk.bf16.mxu0 %vm3292_vm14, %v3623_v19  ;;  %vm1997_vm7 = vcmp.eq.f32.partialorder %v1918_v36, %v4897_v27  ;;  %vm1981_vm1 = vcmp.gt.f32.partialorder %v1918_v36, %v4897_v27 }
 0x597   : > { %vm2029_vm2 = vmand %vm1997_vm7, %vm2013_vm6  ;;  %vm2015_vm7 = vcmp.lt.s32.totalorder %v4476_v48, %v6231_v49 }
 0x598   : > { %vm5136_vm6 = vmor %vm1981_vm1, %vm2029_vm2  ;;  %vm2448_vm1 = vcmp.gt.f32.partialorder %v4917_v47, 0.5  ;;  %v6315_v47 = vld [vmem:[#allocation77_spill] sm:$0xff] }
 0x599   : > { %v5089_v15 = vpop.permute.xlu1 %1921  ;;  %v1914_v12 = vpop.permute.xlu0 %1913  ;;  %3295 = vmatpush3.bf16.msk.msra.mxu0 %vm3292_vm14, %v3623_v19  ;;  %vm1835_vm14 = vcmp.eq.f32.partialorder %v4885_v30, %v4723_v18  ;;  %v6270_v30 = vmov 0  ;;  %v5187_v58 = vsel %vm2448_vm1, %v1918_v36, -1e+30 }
 0x59a   : > { %vm1998_vm9 = vcmp.eq.f32.partialorder %v5089_v15, %v4897_v27  ;;  %vm1996_vm13 = vcmp.eq.f32.partialorder %v1914_v12, %v4897_v27  ;;  %vm1982_vm3 = vcmp.gt.f32.partialorder %v5089_v15, %v4897_v27  ;;  %vm1980_vm5 = vcmp.gt.f32.partialorder %v1914_v12, %v4897_v27  ;;  %vm5131_vm0 = vmand %vm1835_vm14, %vm1851_vm15 }
 0x59b   : > { %vm2030_vm4 = vmand %vm1998_vm9, %vm2014_vm8  ;;  %v6271_v30 = vsel %vm5136_vm6, 4294967295, %v6270_v30  ;;  %vm2451_vm9 = vcmp.gt.f32.partialorder %v4944_v33, 0.5  ;;  %v5149_v29 = vsel %vm2447_vm11, %v1914_v12, -1e+30  ;;  %vm1852_vm14 = vcmp.ge.f32.partialorder %v4925_v37, 1.0 }
 0x59c   : > { %vm2028_vm10 = vmand %vm1996_vm13, %vm2012_vm12  ;;  %vm1836_vm13 = vcmp.eq.f32.partialorder %v4925_v37, %v4723_v18  ;;  %v6279_v12 = vmov 0  ;;  %vm2016_vm11 = vcmp.lt.s32.totalorder %v4479_v53, %v6231_v49 }
 0x59d   : > { %v5120_v28 = vpop.permute.xlu1 %1925  ;;  %v5129_v38 = vpop.permute.xlu0 %1949  ;;  %vm5145_vm12 = vmor %vm1982_vm3, %vm2030_vm4  ;;  %vm6287_vm4 = vcmp.eq.f32.partialorder %v4923_v63, %v4723_v18 }
 0x59e   : > { %vm1999_vm8 = vcmp.eq.f32.partialorder %v5120_v28, %v4897_v27  ;;  %v6273_v11 = vsel %vm5145_vm12, 4294967295, %v6272_v11  ;;  %vm5158_vm15 = vmor %vm1980_vm5, %vm2028_vm10  ;;  %vm6286_vm10 = vcmp.ge.f32.partialorder %v4923_v63, 1.0  ;;  %v6304_v63 = vmov 0 }
 0x59f   : > { %vm5167_vm2 = vmand %vm1999_vm8, %vm2015_vm7  ;;  %vm2452_vm7 = vcmp.gt.f32.partialorder %v4937_v41, 0.5  ;;  %v6295_v41 = vmov 0 }
 0x5a0   : > { %vm5183_vm8 = vmand %vm1836_vm13, %vm1852_vm14  ;;  %vm6283_vm14 = vcmp.gt.f32.partialorder %v5120_v28, %v4897_v27 }
 0x5a1   : > { %v1930_v19 = vpop.permute.xlu1 %1929  ;;  %v6280_v12 = vsel %vm5183_vm8, 4294967295, %v6279_v12  ;;  %v5200_v23 = vpop.permute.xlu0 %1957  ;;  %vm5209_vm1 = vmor %vm6283_vm14, %vm5167_vm2  ;;  %vm6290_vm2 = vcmp.lt.s32.totalorder %v4496_v56, %v6231_v49  ;;  %vm6291_vm14 = vcmp.eq.f32.partialorder %v5129_v38, %v4897_v27 }
 0x5a2   : > { %v5151_v4 = vsel %vm2451_vm9, %v1930_v19, -1e+30  ;;  %vm6282_vm9 = vnez %v6265_v25  ;;  %vm2000_vm13 = vcmp.eq.f32.partialorder %v1930_v19, %v4897_v27  ;;  %vm5220_vm12 = vmand %vm6287_vm4, %vm6286_vm10  ;;  %vm1984_vm6 = vcmp.gt.f32.partialorder %v1930_v19, %v4897_v27 }
 0x5a3   : > { %vm2037_vm3 = vmand %vm6291_vm14, %vm6290_vm2  ;;  %vm1854_vm4 = vcmp.ge.f32.partialorder %v4957_v17, 1.0  ;;  %v6300_v19 = vmov 0 }
 0x5a4   : > { %vm5235_vm5 = vmand %vm2000_vm13, %vm2016_vm11  ;;  %vm6307_vm13 = vnez %v6271_v30  ;;  %v6313_v30 = vmov 0 }
 0x5a5   : > { %v1934_v37 = vpop.permute.xlu1 %1933  ;;  %vm6294_vm10 = vmand %vm6282_vm9, %vm5158_vm15  ;;  %v5282_v25 = vpop.permute.xlu0 %1965  ;;  %vm6306_vm9 = vnez %v6267_v6 }
 0x5a6   : > { %v5202_v54 = vsel %vm2452_vm7, %v1934_v37, -1e+30  ;;  %vm1989_vm7 = vcmp.gt.f32.partialorder %v5129_v38, %v4897_v27  ;;  %v3082_v24 = vsel %vm6294_vm10, 1.0, %v6250_v1  ;;  %vm5276_vm15 = vmor %vm1984_vm6, %vm5235_vm5  ;;  %vm6299_vm10 = vcmp.eq.f32.partialorder %v4957_v17, %v4723_v18 }
 0x5a7   : > { %vm5262_vm2 = vmor %vm1989_vm7, %vm2037_vm3  ;;  %vm6302_vm6 = vcmp.ge.f32.partialorder %v4988_v43, 1.0  ;;  %vm6303_vm5 = vcmp.eq.f32.partialorder %v4988_v43, %v4723_v18  ;;  %vm6310_vm14 = vcmp.eq.f32.partialorder %v1934_v37, %v4897_v27  ;;  %v6311_v43 = vld [vmem:[#allocation85_spill] sm:$0xff] }
 0x5a8   : > { %v6296_v41 = vsel %vm5262_vm2, 4294967295, %v6295_v41  ;;  %vm5292_vm8 = vmand %vm6299_vm10, %vm1854_vm4  ;;  %vm6309_vm10 = vcmp.lt.s32.totalorder %v4482_v60, %v6231_v49  ;;  %vm6312_vm4 = vcmp.gt.f32.partialorder %v1934_v37, %v4897_v27  ;;  %v6323_v37 = vmov 0 }
 0x5a9   : > { %v5241_v20 = vpop.permute.xlu1 %1937  ;;  %v6301_v19 = vsel %vm5292_vm8, 4294967295, %v6300_v19  ;;  %vm5301_vm3 = vmand %vm6303_vm5, %vm6302_vm6  ;;  %vm6316_vm5 = vnez %v6280_v12  ;;  %vm6333_vm6 = vcmp.lt.s32.totalorder %v4508_v3, %v6231_v49 }
 0x5aa   : > { %v6305_v63 = vsel %vm5301_vm3, 4294967295, %v6304_v63  ;;  %vm6308_vm7 = vmand %vm6306_vm9, %vm6307_vm13  ;;  %vm6317_vm13 = vcmp.lt.s32.totalorder %v4502_v52, %v6231_v49  ;;  %vm6318_vm9 = vcmp.eq.f32.partialorder %v5200_v23, %v4897_v27  ;;  %v5415_v52 = vpop.permute.xlu0 %1973 }
 0x5ab   : > { %v3083_v17 = vsel %vm6308_vm7, 1.0, %v6250_v1  ;;  %vm2033_vm11 = vmand %vm6310_vm14, %vm6309_vm10  ;;  %vm6321_vm7 = vcmp.ge.f32.partialorder %v5015_v44, 1.0  ;;  %vm6322_vm14 = vcmp.eq.f32.partialorder %v5015_v44, %v4723_v18  ;;  %v6328_v44 = vld [vmem:[#allocation78_spill] sm:$0xff] }
 0x5ac   : > { %v2108_v6 = vadd.f32 %v3083_v17, %v3082_v24  ;;  %vm5330_vm8 = vmor %vm6312_vm4, %vm2033_vm11 }
 0x5ad   : > { %v5321_v40 = vpop.permute.xlu1 %1941  ;;  %v6314_v30 = vsel %vm5330_vm8, 4294967295, %v6313_v30  ;;  %vm5357_vm3 = vmand %vm6318_vm9, %vm6317_vm13  ;;  %vm6325_vm13 = vnez %v6263_v32  ;;  %vm6326_vm9 = vnez %v6273_v11  ;;  %v6331_v32 = vmov 0 }
 0x5ae   : > { %vm5368_vm10 = vmand %vm6322_vm14, %vm6321_vm7  ;;  %vm6334_vm7 = vcmp.eq.f32.partialorder %v5282_v25, %v4897_v27  ;;  %vm6338_vm14 = vcmp.lt.s32.totalorder %v4485_v59, %v6231_v49 }
 0x5af   : > { %v6324_v37 = vsel %vm5368_vm10, 4294967295, %v6323_v37  ;;  %vm6327_vm11 = vmand %vm6325_vm13, %vm6326_vm9  ;;  %vm6329_vm10 = vcmp.ge.f32.partialorder %v4955_v42, 1.0 }
 0x5b0   : > { %v3084_v17 = vsel %vm6327_vm11, 1.0, %v6250_v1  ;;  %vm6330_vm11 = vcmp.eq.f32.partialorder %v4955_v42, %v4723_v18  ;;  %vm5411_vm8 = vmand %vm6334_vm7, %vm6333_vm6  ;;  %vm6339_vm6 = vcmp.eq.f32.partialorder %v5241_v20, %v4897_v27 }
 0x5b1   : > { %v5388_v9 = vpop.permute.xlu1 %1945  ;;  %vm5396_vm13 = vmand %vm6330_vm11, %vm6329_vm10  ;;  %v2109_v11 = vadd.f32 %v3084_v17, %v2108_v6  ;;  %v6344_v17 = vld [vmem:[#allocation80_spill] sm:$0xff]  ;;  %vm6345_vm10 = vcmp.ge.f32.partialorder %v4990_v62, 1.0 }
 0x5b2   : > { %v6332_v32 = vsel %vm5396_vm13, 4294967295, %v6331_v32  ;;  %vm6337_vm11 = vmand %vm5131_vm0, %vm5209_vm1  ;;  %vm1993_vm0 = vcmp.gt.f32.partialorder %v5282_v25, %v4897_v27  ;;  %vm6340_vm1 = vcmp.gt.f32.partialorder %v5241_v20, %v4897_v27  ;;  %vm6346_vm13 = vcmp.eq.f32.partialorder %v4990_v62, %v4723_v18 }
 0x5b3   : > { %v3085_v6 = vsel %vm6337_vm11, 1.0, %v6250_v1  ;;  %vm2034_vm7 = vmand %vm6339_vm6, %vm6338_vm14  ;;  %vm6343_vm14 = vcmp.gt.f32.partialorder %v4970_v45, 0.5  ;;  %vm2003_vm6 = vcmp.eq.f32.partialorder %v5321_v40, %v4897_v27 }
 0x5b4   : > { %vm5440_vm11 = vmor %vm6340_vm1, %vm2034_vm7  ;;  %v5447_v36 = vsel %vm6343_vm14, %v5321_v40, -1e+30  ;;  %vm6349_vm7 = vcmp.ge.f32.partialorder %v5039_v22, 1.0  ;;  %vm6350_vm1 = vcmp.eq.f32.partialorder %v5039_v22, %v4723_v18  ;;  %vm6353_vm14 = vcmp.gt.f32.partialorder %v4909_v31, 0.5 }
 0x5b5   : > { %vm5456_vm9 = vmand %vm6346_vm13, %vm6345_vm10  ;;  %v5472_v56 = vsel %vm6353_vm14, %v5120_v28, -1e+30  ;;  %vm6355_vm10 = vcmp.gt.f32.partialorder %v5200_v23, %v4897_v27  ;;  %v6356_v22 = vmov 0  ;;  %vm2011_vm14 = vcmp.eq.f32.partialorder %v5415_v52, %v4897_v27  ;;  %v1954_v28 = vpop.permute.xlu1 %1953 }
 0x5b6   : > { %vm5465_vm4 = vmand %vm6350_vm1, %vm6349_vm7  ;;  %v2110_v12 = vadd.f32 %v3085_v6, %v2109_v11  ;;  %vm6361_vm1 = vcmp.gt.f32.partialorder %v5004_v35, 0.5  ;;  %v2482_v33 = vmax.f32 %v5472_v56, %v5447_v36 }
 0x5b7   : > { %vm6354_vm13 = vmand %vm6316_vm5, %vm5276_vm15  ;;  %vm6358_vm15 = vnez %v6305_v63  ;;  %v5510_v24 = vsel %vm6361_vm1, %v5388_v9, -1e+30  ;;  %vm6362_vm5 = vnez %v6314_v30  ;;  %vm1987_vm1 = vcmp.gt.f32.partialorder %v5321_v40, %v4897_v27 }
 0x5b8   : > { %v3086_v62 = vsel %vm6354_vm13, 1.0, %v6250_v1  ;;  %vm5485_vm7 = vmor %vm6355_vm10, %vm5357_vm3  ;;  %vm6359_vm13 = vcmp.gt.f32.partialorder %v5000_v16, 0.5  ;;  %vm6360_vm3 = vnez %v6301_v19  ;;  %v6364_v19 = vmax.f32 %v5187_v58, %v5202_v54 }
 0x5b9   : > { %v6357_v22 = vsel %vm5485_vm7, 4294967295, %v6356_v22  ;;  %v5499_v8 = vsel %vm6359_vm13, %v5129_v38, -1e+30  ;;  %vm2066_vm10 = vmand %vm6360_vm3, %vm5440_vm11  ;;  %v6369_v30 = vmov 0  ;;  %v2111_v57 = vadd.f32 %v3086_v62, %v2110_v12  ;;  %v1962_v12 = vpop.permute.xlu1 %1961 }
 0x5ba   : > { %vm6363_vm13 = vmand %vm5220_vm12, %vm6362_vm5  ;;  %v2484_v11 = vmax.f32 %v6364_v19, %v5499_v8  ;;  %vm6367_vm12 = vcmp.ge.f32.partialorder %v5017_v5, 1.0  ;;  %vm6368_vm5 = vcmp.eq.f32.partialorder %v5017_v5, %v4723_v18 }
 0x5bb   : > { %v3087_v38 = vsel %vm6363_vm13, 1.0, %v6250_v1  ;;  %vm5527_vm11 = vmor %vm1993_vm0, %vm5411_vm8  ;;  %vm6371_vm8 = vcmp.gt.f32.partialorder %v4903_v21, 0.5  ;;  %vm6372_vm0 = vcmp.gt.f32.partialorder %v5027_v7, 0.5  ;;  %vm6373_vm13 = vcmp.gt.f32.partialorder %v4977_v34, 0.5 }
 0x5bc   : > { %vm5540_vm3 = vmand %vm6368_vm5, %vm6367_vm12  ;;  %v5547_v42 = vsel %vm6371_vm8, %v5089_v15, -1e+30  ;;  %v5552_v19 = vsel %vm6372_vm0, %v5200_v23, -1e+30  ;;  %v5557_v35 = vsel %vm6373_vm13, %v5241_v20, -1e+30  ;;  %vm6374_vm12 = vcmp.lt.s32.totalorder %v6311_v43, %v6231_v49 }
 0x5bd   : > { %v6370_v30 = vsel %vm5540_vm3, 4294967295, %v6369_v30  ;;  %vm5565_vm5 = vmand %vm2011_vm14, %vm6374_vm12  ;;  %vm6377_vm8 = vcmp.gt.f32.partialorder %v5051_v50, 0.5  ;;  %v3088_v15 = vsel %vm2066_vm10, 1.0, %v6250_v1  ;;  %vm6378_vm0 = vcmp.lt.s32.totalorder %v6315_v47, %v6231_v49 }
 0x5be   : > { %v5572_v23 = vsel %vm6377_vm8, %v5282_v25, -1e+30  ;;  %vm2035_vm13 = vmand %vm2003_vm6, %vm6378_vm0  ;;  %v6379_v20 = vmax.f32 %v5149_v29, %v5151_v4  ;;  %v2112_v25 = vadd.f32 %v3087_v38, %v2111_v57  ;;  %vm1988_vm6 = vcmp.gt.f32.partialorder %v5388_v9, %v4897_v27 }
 0x5bf   : > { %vm2051_vm8 = vmor %vm1987_vm1, %vm2035_vm13  ;;  %vm6381_vm0 = vcmp.gt.f32.partialorder %v5031_v2, 0.5  ;;  %vm6382_vm14 = vcmp.gt.f32.partialorder %v5055_v55, 0.5  ;;  %vm6383_vm3 = vcmp.ge.f32.partialorder %v5041_v26, 1.0  ;;  %vm6384_vm12 = vcmp.eq.f32.partialorder %v5041_v26, %v4723_v18 }
 0x5c0   : > { %v2483_v62 = vmax.f32 %v6379_v20, %v5510_v24  ;;  %v5598_v50 = vsel %vm6381_vm0, %v1954_v28, -1e+30  ;;  %v5602_v20 = vsel %vm6382_vm14, %v1962_v12, -1e+30  ;;  %vm5609_vm7 = vmand %vm6384_vm12, %vm6383_vm3  ;;  %v6385_v38 = vmov 0 }
 0x5c1   : > { %v6386_v38 = vsel %vm5609_vm7, 4294967295, %v6385_v38  ;;  %v2488_v40 = vmax.f32 %v2484_v11, %v5572_v23  ;;  %v2481_v57 = vmax.f32 %v5547_v42, %v5557_v35  ;;  %vm6387_vm1 = vnez %v6332_v32 }
 0x5c2   : > { %vm2067_vm13 = vmand %vm6387_vm1, %vm2051_vm8  ;;  %v2486_v55 = vmax.f32 %v2482_v33, %v5552_v19  ;;  %v2487_v2 = vmax.f32 %v2483_v62, %v5602_v20  ;;  %v2113_v7 = vadd.f32 %v3088_v15, %v2112_v25  ;;  %vm6388_vm3 = vcmp.lt.s32.totalorder %v6328_v44, %v6231_v49  ;;  %v1970_v33 = vpop.permute.xlu1 %1969 }
 0x5c3   : > { %v3089_v26 = vsel %vm2067_vm13, 1.0, %v6250_v1  ;;  %vm6389_vm12 = vcmp.eq.f32.partialorder %v5388_v9, %v4897_v27  ;;  %vm2006_vm10 = vcmp.eq.f32.partialorder %v1954_v28, %v4897_v27  ;;  %vm1990_vm1 = vcmp.gt.f32.partialorder %v1954_v28, %v4897_v27  ;;  %v6403_v28 = vld [vmem:[#allocation84_spill] sm:$0xff] }
 0x5c4   : > { %vm2036_vm0 = vmand %vm6389_vm12, %vm6388_vm3  ;;  %v2485_v32 = vmax.f32 %v2481_v57, %v5598_v50  ;;  %v2491_v11 = vmax.f32 %v2487_v2, %v2488_v40  ;;  %vm2461_vm14 = vcmp.gt.f32.partialorder %v5076_v14, 0.5  ;;  %vm6390_vm13 = vcmp.ge.f32.partialorder %v5065_v46, 1.0 }
 0x5c5   : > { %vm2052_vm8 = vmor %vm1988_vm6, %vm2036_vm0  ;;  %vm6391_vm7 = vcmp.eq.f32.partialorder %v5065_v46, %v4723_v18  ;;  %vm6394_vm3 = vcmp.gt.f32.partialorder %v5072_v39, 0.5  ;;  %v2114_v2 = vadd.f32 %v3089_v26, %v2113_v7  ;;  %v6395_v46 = vld [vmem:[#allocation82_spill] sm:$0xff]  ;;  %v5655_v62 = vsel %vm2461_vm14, %v1970_v33, -1e+30 }
 0x5c6   : > { %vm5638_vm2 = vmand %vm6391_vm7, %vm6390_vm13  ;;  %v5649_v9 = vsel %vm6394_vm3, %v5415_v52, -1e+30  ;;  %vm2024_vm7 = vcmp.lt.s32.totalorder %v6395_v46, %v6231_v49  ;;  %vm6396_vm0 = vcmp.gt.f32.partialorder %v5415_v52, %v4897_v27  ;;  %v6397_v25 = vmov 0 }
 0x5c7   : > { %vm2068_vm12 = vmand %vm5456_vm9, %vm2052_vm8  ;;  %vm6399_vm3 = vcmp.lt.s32.totalorder %v6344_v17, %v6231_v49  ;;  %vm2008_vm14 = vcmp.eq.f32.partialorder %v1962_v12, %v4897_v27  ;;  %v2489_v3 = vmax.f32 %v2485_v32, %v5655_v62  ;;  %v2490_v7 = vmax.f32 %v2486_v55, %v5649_v9 }
 0x5c8   : > { %vm5662_vm13 = vmor %vm6396_vm0, %vm5565_vm5  ;;  %v3090_v40 = vsel %vm2068_vm12, 1.0, %v6250_v1  ;;  %vm1992_vm8 = vcmp.gt.f32.partialorder %v1962_v12, %v4897_v27  ;;  %vm6400_vm12 = vnez %v6296_v41  ;;  %vm2010_vm6 = vcmp.eq.f32.partialorder %v1970_v33, %v4897_v27 }
 0x5c9   : > { %v6398_v25 = vsel %vm5662_vm13, 4294967295, %v6397_v25  ;;  %vm2038_vm9 = vmand %vm2006_vm10, %vm6399_vm3  ;;  %v2115_v5 = vadd.f32 %v3090_v40, %v2114_v2  ;;  %vm6402_vm10 = vnez %v6370_v30  ;;  %v2492_v57 = vmax.f32 %v2489_v3, %v2490_v7 }
 0x5ca   : > { %vm2054_vm5 = vmor %vm1990_vm1, %vm2038_vm9  ;;  %vm2026_vm9 = vcmp.lt.s32.totalorder %v6403_v28, %v6231_v49  ;;  %v2129_v41 = vmax.f32 %v6233_v13, 1e-30 }
 0x5cb   : > { %vm6401_vm0 = vmand %vm6358_vm15, %vm6400_vm12  ;;  %vm1994_vm15 = vcmp.gt.f32.partialorder %v1970_v33, %v4897_v27  ;;  %v2493_v63 = vmax.f32 %v2491_v11, %v2492_v57 }
 0x5cc   : > { %v3091_v52 = vsel %vm6401_vm0, 1.0, %v6250_v1  ;;  %vm2070_vm3 = vmand %vm6402_vm10, %vm2054_vm5  ;;  %vm6404_vm5 = vnez %v6386_v38  ;;  %vm6405_vm0 = vnez %v6324_v37  ;;  %3484 = vlog2.f32 %v2129_v41 }
 0x5cd   : > { %v3092_v26 = vsel %vm2070_vm3, 1.0, %v6250_v1  ;;  %v2116_v55 = vadd.f32 %v3091_v52, %v2115_v5  ;;  %vm2040_vm1 = vmand %vm2008_vm14, %vm2024_vm7  ;;  %vm6406_vm7 = vnez %v6357_v22  ;;  %v2494_v32 = vrot.slane %v2493_v63, 4 }
 0x5ce   : > { %vm2056_vm13 = vmor %vm1992_vm8, %vm2040_vm1  ;;  %vm1847_vm8 = vcmp.eq.f32.partialorder %v5063_v10, %v4723_v18  ;;  %vm1863_vm3 = vcmp.ge.f32.partialorder %v5063_v10, 1.0 }
 0x5cf   : > { %v2117_v30 = vadd.f32 %v3092_v26, %v2116_v55  ;;  %vm2072_vm12 = vmand %vm6404_vm5, %vm2056_vm13  ;;  %v2495_v37 = vmax.f32 %v2493_v63, %v2494_v32  ;;  %v6412_v55 = vcvt.s32.f32 %v4473_v0  ;;  %v6413_v63 = vcvt.s32.f32 %v4479_v53 }
 0x5d0   : > { %vm6407_vm14 = vmand %vm6405_vm0, %vm6406_vm7  ;;  %v3094_v49 = vsel %vm2072_vm12, 1.0, %v6250_v1  ;;  %v6415_v32 = vcvt.s32.f32 %v4485_v59 }
 0x5d1   : > { %v3093_v12 = vsel %vm6407_vm14, 1.0, %v6250_v1  ;;  %vm2042_vm10 = vmand %vm2010_vm6, %vm2026_vm9  ;;  %v2496_v11 = vrot.slane %v2495_v37, 2  ;;  %vm3625_vm9 = vmmov 0  }
 0x5d2   : > { %v2118_v27 = vadd.f32 %v3093_v12, %v2117_v30  ;;  %vm2058_vm1 = vmor %vm1994_vm15, %vm2042_vm10  ;;  %3261 = vmatprep.mubr.msk.f32.mxu1 %vm3625_vm9, %v6250_v1  ;;  %vm6409_vm15 = vnez %v6398_v25  ;;  %v6414_v12 = vcvt.s32.f32 %v4482_v60 }
 0x5d3   : > { %vm2074_vm13 = vmand %vm5638_vm2, %vm2058_vm1  ;;  %v2497_v33 = vmax.f32 %v2495_v37, %v2496_v11  ;;  %v6419_v11 = vld [vmem:[#allocation79_spill] sm:$0xff] }
 0x5d4   : > { %v2119_v38 = vadd.f32 %v3094_v49, %v2118_v27  ;;  %vm1911_vm5 = vmand %vm1847_vm8, %vm1863_vm3  ;;  %v3096_v18 = vsel %vm2074_vm13, 1.0, %v6250_v1 }
 0x5d5   : > { %vm6408_vm6 = vmand %vm5465_vm4, %vm5527_vm11  ;;  %v2498_v40 = vrot.slane %v2497_v33, 1 }
 0x5d6   : > { %v3095_v22 = vsel %vm6408_vm6, 1.0, %v6250_v1  ;;  %vm2075_vm12 = vmand %vm1911_vm5, %vm6409_vm15  ;;  %v3485_v7 = vpop.eup %3484 }
 0x5d7   : > { %v2120_v10 = vadd.f32 %v3095_v22, %v2119_v38  ;;  %v3097_v2 = vsel %vm2075_vm12, 1.0, %v6250_v1  ;;  %v2499_v3 = vmax.f32 %v2497_v33, %v2498_v40  ;;  %v2131_v5 = vmul.f32 0.6931472, %v3485_v7 }
 0x5d8   : > { %v6418_v22 = vcvt.s32.f32 %v6328_v44 }
 0x5d9   : > { %v2121_v15 = vadd.f32 %v3096_v18, %v2120_v10  ;;  %vm2500_vm2 = vcmp.ge.f32.partialorder %v5149_v29, %v2499_v3  ;;  %vm2501_vm4 = vcmp.ge.f32.partialorder %v5187_v58, %v2499_v3  ;;  %vm2502_vm11 = vcmp.ge.f32.partialorder %v5547_v42, %v2499_v3 }
 0x5da   : > { %vm2503_vm0 = vcmp.ge.f32.partialorder %v5472_v56, %v2499_v3  ;;  %vm2504_vm7 = vcmp.ge.f32.partialorder %v5151_v4, %v2499_v3  ;;  %vm2505_vm14 = vcmp.ge.f32.partialorder %v5202_v54, %v2499_v3  ;;  %vm2506_vm10 = vcmp.ge.f32.partialorder %v5557_v35, %v2499_v3 }
 0x5db   : > { %v2122_v45 = vadd.f32 %v3097_v2, %v2121_v15  ;;  %vm2507_vm8 = vcmp.ge.f32.partialorder %v5447_v36, %v2499_v3  ;;  %vm2508_vm3 = vcmp.ge.f32.partialorder %v5510_v24, %v2499_v3  ;;  %vm2509_vm1 = vcmp.ge.f32.partialorder %v5499_v8, %v2499_v3 }
 0x5dc   : > { %vm2510_vm13 = vcmp.ge.f32.partialorder %v5598_v50, %v2499_v3  ;;  %vm2511_vm5 = vcmp.ge.f32.partialorder %v5552_v19, %v2499_v3  ;;  %vm2512_vm6 = vcmp.ge.f32.partialorder %v5602_v20, %v2499_v3  ;;  %v6410_v4 = vcvt.s32.f32 %v4174_v61 }
 0x5dd   : > { %v2123_v6 = vrot.slane %v2122_v45, 4  ;;  %v6411_v35 = vcvt.s32.f32 %v4470_v51  ;;  %v2518_v41 = vsel %vm2502_vm11, %v6412_v55, 128.0  ;;  %v2520_v30 = vsel %vm2504_vm7, %v6413_v63, 128.0 }
 0x5de   : > { %v2516_v54 = vsel %vm2500_vm2, %v6410_v4, 128.0  ;;  %v2521_v49 = vsel %vm2505_vm14, %v6414_v12, 128.0  ;;  %v2522_v29 = vsel %vm2506_vm10, %v6415_v32, 128.0  ;;  %vm2513_vm9 = vcmp.ge.f32.partialorder %v5572_v23, %v2499_v3 }
 0x5df   : > { %v2124_v25 = vadd.f32 %v2123_v6, %v2122_v45  ;;  %v2517_v26 = vsel %vm2501_vm4, %v6411_v35, 128.0  ;;  %v6416_v58 = vcvt.s32.f32 %v4476_v48  ;;  %v6417_v42 = vcvt.s32.f32 %v6315_v47  ;;  %v6422_v6 = vld [vmem:[#allocation81_spill] sm:$0xff] }
 0x5e0   : > { %vm2514_vm15 = vcmp.ge.f32.partialorder %v5655_v62, %v2499_v3  ;;  %vm2515_vm12 = vcmp.ge.f32.partialorder %v5649_v9, %v2499_v3  ;;  %v2524_v18 = vsel %vm2508_vm3, %v6418_v22, 128.0  ;;  %v6420_v10 = vcvt.s32.f32 %v6419_v11  ;;  %v5798_v9 = vpop.permute.xlu0 %2608 }
 0x5e1   : > { %v2125_v52 = vrot.slane %v2124_v25, 2  ;;  %v2519_v37 = vsel %vm2503_vm0, %v6416_v58, 128.0  ;;  %v2523_v38 = vsel %vm2507_vm8, %v6417_v42, 128.0  ;;  %v2532_v15 = vmin.f32 %v2516_v54, %v2520_v30  ;;  %v5794_v42 = vpop.permute.xlu1 %2603 }
 0x5e2   : > { %v2525_v56 = vsel %vm2509_vm1, %v6420_v10, 128.0  ;;  %v2533_v2 = vmin.f32 %v2517_v26, %v2521_v49  ;;  %v2534_v40 = vmin.f32 %v2518_v41, %v2522_v29  ;;  %v6421_v36 = vcvt.s32.f32 %v6344_v17  ;;  %v6425_v26 = vld [vmem:[#allocation83_spill] sm:$0xff] }
 0x5e3   : > { %v2126_v57 = vadd.f32 %v2125_v52, %v2124_v25  ;;  %v6423_v7 = vcvt.s32.f32 %v6422_v6  ;;  %v6424_v25 = vcvt.s32.f32 %v6395_v46  ;;  %v2535_v52 = vmin.f32 %v2519_v37, %v2523_v38 }
 0x5e4   : > { %v2526_v45 = vsel %vm2510_vm13, %v6421_v36, 128.0  ;;  %v2536_v4 = vmin.f32 %v2532_v15, %v2524_v18  ;;  %v2537_v54 = vmin.f32 %v2533_v2, %v2525_v56  ;;  %v6426_v55 = vcvt.s32.f32 %v6425_v26 }
 0x5e5   : > { %v2127_v27 = vrot.slane %v2126_v57, 1  ;;  %v2527_v24 = vsel %vm2511_vm5, %v6423_v7, 128.0  ;;  %v2528_v8 = vsel %vm2512_vm6, %v6424_v25, 128.0  ;;  %v2538_v35 = vmin.f32 %v2534_v40, %v2526_v45  ;;  %v5796_v18 = vpop.permute.xlu1 %2613  ;;  %v5806_v7 = vpop.permute.xlu0 %2623 }
 0x5e6   : > { %v2529_v50 = vsel %vm2513_vm9, %v6426_v55, 128.0  ;;  %v6427_v41 = vcvt.s32.f32 %v6403_v28  ;;  %v6428_v63 = vcvt.s32.f32 %v6311_v43  ;;  %v2539_v30 = vmin.f32 %v2535_v52, %v2527_v24 }
 0x5e7   : > { %v2128_v33 = vadd.f32 %v2127_v27, %v2126_v57  ;;  %v2540_v49 = vmin.f32 %v2536_v4, %v2528_v8  ;;  %v2541_v32 = vmin.f32 %v2537_v54, %v2529_v50  ;;  %v2357_v3 = vrot.slane %v6233_v13, 7 }
 0x5e8   : > { %v2530_v19 = vsel %vm2514_vm15, %v6427_v41, 128.0  ;;  %v2531_v20 = vsel %vm2515_vm12, %v6428_v63, 128.0  ;;  %vm2132_vm2 = vcmp.gt.f32.partialorder %v6233_v13, 0.0  ;;  %vm2366_vm4 = vcmask 1040384  }
 0x5e9   : > { %v2133_v57 = vadd.f32 1.0, %v2128_v33  ;;  %v2542_v29 = vmin.f32 %v2538_v35, %v2530_v19  ;;  %v2543_v27 = vmin.f32 %v2539_v30, %v2531_v20  ;;  %v2544_v37 = vmin.f32 %v2540_v49, %v2541_v32  ;;  %v5802_v15 = vpop.permute.xlu1 %2618  ;;  %v5828_v55 = vpop.permute.xlu0 %2633 }
 0x5ea   : > { %v2367_v40 = vsel %vm2366_vm4, %v2357_v3, 1.0  ;;  %vm2368_vm11 = vcmask 1041408   ;;  %vm2370_vm0 = vcmask 1042432   ;;  %v6429_v13 = vcvt.s32.f32 %v4174_v61 }
 0x5eb   : > { %v2134_v12 = vmul.f32 %v2133_v57, %v2131_v5  ;;  %v2545_v23 = vmin.f32 %v2542_v29, %v2543_v27  ;;  %v6430_v8 = vcvt.s32.f32 %v4473_v0  ;;  %v6431_v4 = vcvt.s32.f32 %v4476_v48  ;;  %v6436_v29 = vld [vmem:[#allocation71_spill] sm:$0xff] }
 0x5ec   : > { %v6432_v61 = vcvt.s32.f32 %v4470_v51  ;;  %v6433_v50 = vcvt.s32.f32 %v4479_v53  ;;  %v6434_v51 = vcvt.s32.f32 %v4482_v60  ;;  %v6435_v53 = vcvt.s32.f32 %v4485_v59 }
 0x5ed   : > { %v2135_v58 = vmul.f32 1.442695, %v2134_v12  ;;  %v2546_v38 = vmin.f32 %v2544_v37, %v2545_v23  ;;  %v5817_v52 = vpop.permute.xlu1 %2628  ;;  %v5847_v32 = vpop.permute.xlu0 %2643  ;;  %v2832_v27 = vrot.slane %v6436_v29, 6 }
 0x5ef   : > { %3486 = vpow2.f32 %v2135_v58  ;;  %v2547_v62 = vrot.slane %v2546_v38, 4  ;;  %v6437_v58 = vcvt.s32.f32 %v6315_v47 }
 0x5f1   : > { %v2548_v22 = vmin.f32 %v2546_v38, %v2547_v62  ;;  %v5839_v63 = vpop.permute.xlu1 %2638 }
 0x5f3   : > { %v2549_v10 = vrot.slane %v2548_v22, 2 }
 0x5f5   : > { %v2550_v5 = vmin.f32 %v2548_v22, %v2549_v10  ;;  %v6438_v10 = vcvt.s32.f32 %v6328_v44 }
 0x5f7   : > { %v2551_v33 = vrot.slane %v2550_v5, 1 }
 0x5f9   : > { %v3487_v56 = vpop.eup %3486  ;;  %v5804_v45 = vmin.f32 %v2550_v5, %v2551_v33  ;;  %v5861_v5 = vpop.permute.xlu1 %2648 }
 0x5fa   : > { %v2137_v2 = vsel %vm2132_vm2, %v3487_v56, 0.0  ;;  %v6439_v56 = vcvt.s32.f32 %v6419_v11  ;;  %v6441_v11 = vcvt.s32.f32 %v6422_v6  ;;  %v6443_v6 = vcvt.s32.f32 %v6425_v26 }
 0x5fb   : > { %v2360_v36 = vrot.slane %v2137_v2, 5  ;;  %vm2553_vm7 = vcmp.eq.f32.partialorder %v6429_v13, %v5804_v45  ;;  %vm2555_vm14 = vcmp.eq.f32.partialorder %v6430_v8, %v5804_v45  ;;  %vm2556_vm10 = vcmp.eq.f32.partialorder %v6431_v4, %v5804_v45 }
 0x5fc   : > { %v3123_v25 = vsel %vm2553_vm7, 1.0, %v6250_v1  ;;  %vm2554_vm8 = vcmp.eq.f32.partialorder %v6432_v61, %v5804_v45  ;;  %v3125_v54 = vsel %vm2555_vm14, 1.0, %v6250_v1  ;;  %vm2557_vm3 = vcmp.eq.f32.partialorder %v6433_v50, %v5804_v45 }
 0x5fd   : > { %v2369_v24 = vsel %vm2368_vm11, %v2367_v40, %v2360_v36  ;;  %v2681_v57 = vmul.f32 %v3123_v25, %v5794_v42  ;;  %v3124_v35 = vsel %vm2554_vm8, 1.0, %v6250_v1  ;;  %v3126_v41 = vsel %vm2556_vm10, 1.0, %v6250_v1  ;;  %v5871_v36 = vpop.permute.xlu0 %2653  ;;  %v5882_v4 = vpop.permute.xlu1 %2658 }
 0x5fe   : > { %3227 = vmatmul.mubr.msk.f32.vlgmr.msra.gmra.mrb[0].mxu0 %vm2370_vm0, %v2369_v24  ;;  %v2682_v0 = vmul.f32 %v3124_v35, %v5798_v9  ;;  %v2683_v48 = vmul.f32 %v3125_v54, %v5796_v18  ;;  %vm2558_vm1 = vcmp.eq.f32.partialorder %v6434_v51, %v5804_v45  ;;  %v3127_v20 = vsel %vm2557_vm3, 1.0, %v6250_v1 }
 0x5ff   : > { %v2684_v30 = vmul.f32 %v3126_v41, %v5802_v15  ;;  %vm2559_vm13 = vcmp.eq.f32.partialorder %v6435_v53, %v5804_v45  ;;  %v3128_v49 = vsel %vm2558_vm1, 1.0, %v6250_v1  ;;  %v2371_v60 = vsel %vm2370_vm0, %v2369_v24, 0.0 }
 0x600   : > { %v2697_v19 = vadd.f32 %v2682_v0, %v2681_v57  ;;  %vm2560_vm5 = vcmp.eq.f32.partialorder %v6437_v58, %v5804_v45  ;;  %v2685_v23 = vmul.f32 %v3127_v20, %v5806_v7  ;;  %v3129_v38 = vsel %vm2559_vm13, 1.0, %v6250_v1 }
 0x601   : > { %v2833_v62 = vrot.slane %v2371_v60, 6  ;;  %v2686_v59 = vmul.f32 %v3128_v49, %v5817_v52  ;;  %vm2561_vm6 = vcmp.eq.f32.partialorder %v6438_v10, %v5804_v45  ;;  %v3130_v3 = vsel %vm2560_vm5, 1.0, %v6250_v1  ;;  %v5890_v50 = vpop.permute.xlu0 %2663 }
 0x602   : > { %v2698_v12 = vadd.f32 %v2697_v19, %v2683_v48  ;;  %vm2562_vm9 = vcmp.eq.f32.partialorder %v6439_v56, %v5804_v45  ;;  %v2687_v2 = vmul.f32 %v3129_v38, %v5828_v55  ;;  %v3131_v40 = vsel %vm2561_vm6, 1.0, %v6250_v1 }
 0x603   : > { %v5864_v47 = vsel %vm2368_vm11, %v2832_v27, %v2833_v62  ;;  %v2688_v44 = vmul.f32 %v3130_v3, %v5839_v63  ;;  %v6440_v13 = vcvt.s32.f32 %v6344_v17  ;;  %v3132_v25 = vsel %vm2562_vm9, 1.0, %v6250_v1 }
 0x604   : > { %v2699_v37 = vadd.f32 %v2698_v12, %v2684_v30  ;;  %vm2564_vm12 = vcmp.eq.f32.partialorder %v6441_v11, %v5804_v45  ;;  %v2689_v57 = vmul.f32 %v3131_v40, %v5847_v32  ;;  %v2690_v54 = vmul.f32 %v3132_v25, %v5861_v5  ;;  %v5901_v30 = vpop.permute.xlu1 %2668 }
 0x605   : > { %vm2563_vm15 = vcmp.eq.f32.partialorder %v6440_v13, %v5804_v45  ;;  %v6442_v17 = vcvt.s32.f32 %v6395_v46  ;;  %v3134_v0 = vsel %vm2564_vm12, 1.0, %v6250_v1  ;;  %vm2566_vm4 = vcmp.eq.f32.partialorder %v6443_v6, %v5804_v45  ;;  %v5909_v27 = vpop.permute.xlu0 %2673 }
 0x606   : > { %v2700_v22 = vadd.f32 %v2699_v37, %v2685_v23  ;;  %v3133_v61 = vsel %vm2563_vm15, 1.0, %v6250_v1  ;;  %v2692_v19 = vmul.f32 %v3134_v0, %v5882_v4  ;;  %v6444_v46 = vcvt.s32.f32 %v6403_v28 }
 0x607   : > { %vm2565_vm2 = vcmp.eq.f32.partialorder %v6442_v17, %v5804_v45  ;;  %v2691_v48 = vmul.f32 %v3133_v61, %v5871_v36  ;;  %v3136_v12 = vsel %vm2566_vm4, 1.0, %v6250_v1  ;;  %v6445_v26 = vcvt.s32.f32 %v6311_v43 }
 0x608   : > { %v2701_v33 = vadd.f32 %v2700_v22, %v2686_v59  ;;  %v3135_v51 = vsel %vm2565_vm2, 1.0, %v6250_v1  ;;  %vm2567_vm11 = vcmp.eq.f32.partialorder %v6444_v46, %v5804_v45  ;;  %v2694_v60 = vmul.f32 %v3136_v12, %v5901_v30  ;;  %v5914_v38 = vpop.permute.xlu1 %2678 }
 0x609   : > { %vm2568_vm0 = vcmp.eq.f32.partialorder %v6445_v26, %v5804_v45  ;;  %v2693_v49 = vmul.f32 %v3135_v51, %v5890_v50  ;;  %v3137_v29 = vsel %vm2567_vm11, 1.0, %v6250_v1  ;;  %v6447_v51 = vld [vmem:[#allocation57_spill] sm:$0xff]  ;;  %v6449_v12 = vmov 0.0|0.0  }
 0x60a   : > { %v2702_v24 = vadd.f32 %v2701_v33, %v2687_v2  ;;  %v3138_v28 = vsel %vm2568_vm0, 1.0, %v6250_v1  ;;  %v2695_v23 = vmul.f32 %v3137_v29, %v5909_v27 }
 0x60b   : > { %v2696_v43 = vmul.f32 %v3138_v28, %v5914_v38 }
 0x60c   : > { %v2703_v8 = vadd.f32 %v2702_v24, %v2688_v44 }
 0x60e   : > { %v2704_v35 = vadd.f32 %v2703_v8, %v2689_v57 }
 0x610   : > { %v2705_v41 = vadd.f32 %v2704_v35, %v2690_v54 }
 0x612   : > { %v2706_v20 = vadd.f32 %v2705_v41, %v2691_v48 }
 0x614   : > { %v2707_v53 = vadd.f32 %v2706_v20, %v2692_v19 }
 0x616   : > { %v2708_v58 = vadd.f32 %v2707_v53, %v2693_v49 }
 0x618   : > { %v2709_v37 = vadd.f32 %v2708_v58, %v2694_v60 }
 0x61a   : > { %v2710_v45 = vadd.f32 %v2709_v37, %v2695_v23 }
 0x61c   : > { %v2711_v62 = vadd.f32 %v2710_v45, %v2696_v43 }
 0x61e   : > { %v2712_v59 = vrot.slane %v2711_v62, 4 }
 0x620   : > { %v2713_v22 = vadd.f32 %v2712_v59, %v2711_v62 }
 0x622   : > { %v2714_v10 = vrot.slane %v2713_v22, 2 }
 0x624   : > { %v2715_v3 = vadd.f32 %v2714_v10, %v2713_v22 }
 0x626   : > { %v2716_v56 = vrot.slane %v2715_v3, 1 }
 0x628   : > { %v5917_v33 = vadd.f32 %v2716_v56, %v2715_v3 }
 0x62a   : > { %v2718_v2 = vsub.f32 %v5794_v42, %v5917_v33  ;;  %v2719_v40 = vsub.f32 %v5798_v9, %v5917_v33  ;;  %v2720_v44 = vsub.f32 %v5796_v18, %v5917_v33  ;;  %v2721_v24 = vsub.f32 %v5802_v15, %v5917_v33 }
 0x62b   : > { %v2722_v13 = vsub.f32 %v5806_v7, %v5917_v33  ;;  %v2723_v61 = vsub.f32 %v5817_v52, %v5917_v33  ;;  %v2724_v42 = vsub.f32 %v5828_v55, %v5917_v33  ;;  %v2725_v18 = vsub.f32 %v5839_v63, %v5917_v33 }
 0x62c   : > { %v2734_v25 = vand.u32 2147483647, %v2718_v2  ;;  %v2735_v11 = vand.u32 2147483647, %v2719_v40  ;;  %v2736_v8 = vand.u32 2147483647, %v2720_v44  ;;  %v2726_v15 = vsub.f32 %v5847_v32, %v5917_v33 }
 0x62d   : > { %v2737_v57 = vand.u32 2147483647, %v2721_v24  ;;  %v2738_v9 = vand.u32 2147483647, %v2722_v13  ;;  %v2727_v35 = vsub.f32 %v5861_v5, %v5917_v33  ;;  %v2728_v55 = vsub.f32 %v5871_v36, %v5917_v33  ;;  %v6446_v5 = vld [vmem:[#allocation44_spill] sm:$0xff] }
 0x62e   : > { %vm2750_vm7 = vcmp.gt.f32.partialorder %v2734_v25, 3.1415927  ;;  %vm2751_vm14 = vcmp.gt.f32.partialorder %v2735_v11, 3.1415927  ;;  %v2766_v7 = vsub.f32 6.2831855, %v2734_v25  ;;  %v6448_v19 = vpack.c.bf16 %v6446_v5, %v6447_v51 }
 0x62f   : > { %v2767_v54 = vsub.f32 6.2831855, %v2735_v11  ;;  %vm2752_vm10 = vcmp.gt.f32.partialorder %v2736_v8, 3.1415927  ;;  %vm2753_vm8 = vcmp.gt.f32.partialorder %v2737_v57, 3.1415927  ;;  %v2729_v46 = vsub.f32 %v5882_v4, %v5917_v33 }
 0x630   : > { %v2768_v52 = vsub.f32 6.2831855, %v2736_v8  ;;  %v2782_v17 = vsel %vm2750_vm7, %v2766_v7, %v2734_v25  ;;  %v2769_v6 = vsub.f32 6.2831855, %v2737_v57  ;;  %v2739_v41 = vand.u32 2147483647, %v2723_v61 }
 0x631   : > { %v2783_v0 = vsel %vm2751_vm14, %v2767_v54, %v2735_v11  ;;  %vm2798_vm3 = vcmp.gt.f32.partialorder %v2782_v17, 1.5707964  ;;  %vm2754_vm13 = vcmp.gt.f32.partialorder %v2738_v9, 3.1415927  ;;  %v2770_v48 = vsub.f32 6.2831855, %v2738_v9 }
 0x632   : > { %vm2799_vm1 = vcmp.gt.f32.partialorder %v2783_v0, 1.5707964  ;;  %v2784_v63 = vsel %vm2752_vm10, %v2768_v52, %v2736_v8  ;;  %v2785_v32 = vsel %vm2753_vm8, %v2769_v6, %v2737_v57  ;;  %vm2755_vm9 = vcmp.gt.f32.partialorder %v2739_v41, 3.1415927  ;;  %v6454_v25 = vld [vmem:[#allocation75_spill] sm:$0xff]  ;;  %v6458_v54 = vld [vmem:[#allocation24_spill] sm:$0xff] }
 0x633   : > { %vm3298_vm5 = vmpackc.low %vm2799_vm1, %vm2798_vm3  ;;  %vm2800_vm6 = vcmp.gt.f32.partialorder %v2784_v63, 1.5707964  ;;  %vm2801_vm15 = vcmp.gt.f32.partialorder %v2785_v32, 1.5707964  ;;  %v2771_v20 = vsub.f32 6.2831855, %v2739_v41  ;;  %v2786_v26 = vsel %vm2754_vm13, %v2770_v48, %v2738_v9 }
 0x634   : > { %3299 = vmatpush3.bf16.msk.msra.mxu1 %vm3298_vm5, %v6448_v19  ;;  %v2740_v36 = vand.u32 2147483647, %v2724_v42  ;;  %v2741_v53 = vand.u32 2147483647, %v2725_v18  ;;  %v2742_v49 = vand.u32 2147483647, %v2726_v15  ;;  %vm3302_vm4 = vmpackc.low %vm2801_vm15, %vm2800_vm6  ;;  %v2730_v37 = vsub.f32 %v5890_v50, %v5917_v33 }
 0x635   : > { %3300 = vmatprep.subr.bf16.mxu1 %v6449_v12  ;;  %v2743_v29 = vand.u32 2147483647, %v2727_v35  ;;  %v2787_v60 = vsel %vm2755_vm9, %v2771_v20, %v2739_v41  ;;  %vm2802_vm12 = vcmp.gt.f32.partialorder %v2786_v26, 1.5707964  ;;  %v6450_v4 = vpack.c.bf16 %v4909_v31, %v4903_v21  ;;  %v6451_v21 = vld [vmem:[#allocation56_spill] sm:$0xff]  ;;  %v6452_v31 = vld [vmem:[#allocation42_spill] sm:$0xff] }
 0x636   : > { %vm2756_vm2 = vcmp.gt.f32.partialorder %v2740_v36, 3.1415927  ;;  %v2772_v58 = vsub.f32 6.2831855, %v2740_v36  ;;  %vm2803_vm11 = vcmp.gt.f32.partialorder %v2787_v60, 1.5707964  ;;  %v2731_v45 = vsub.f32 %v5901_v30, %v5917_v33 }
 0x637   : > { %vm2757_vm0 = vcmp.gt.f32.partialorder %v2741_v53, 3.1415927  ;;  %v2773_v28 = vsub.f32 6.2831855, %v2741_v53  ;;  %vm2758_vm7 = vcmp.gt.f32.partialorder %v2742_v49, 3.1415927  ;;  %v2732_v50 = vsub.f32 %v5909_v27, %v5917_v33  ;;  %vm3306_vm10 = vmpackc.low %vm2803_vm11, %vm2802_vm12 }
 0x638   : > { %3303 = vmatpush3.bf16.msk.msra.mxu1 %vm3302_vm4, %v6450_v4  ;;  %v2788_v23 = vsel %vm2756_vm2, %v2772_v58, %v2740_v36  ;;  %v2774_v43 = vsub.f32 6.2831855, %v2742_v49  ;;  %vm2759_vm14 = vcmp.gt.f32.partialorder %v2743_v29, 3.1415927  ;;  %v2775_v59 = vsub.f32 6.2831855, %v2743_v29 }
 0x639   : > { %3304 = vmatprep.subr.bf16.mxu1 %v6449_v12  ;;  %v2789_v62 = vsel %vm2757_vm0, %v2773_v28, %v2741_v53  ;;  %v2744_v22 = vand.u32 2147483647, %v2728_v55  ;;  %v2745_v10 = vand.u32 2147483647, %v2729_v46  ;;  %vm2804_vm8 = vcmp.gt.f32.partialorder %v2788_v23, 1.5707964 }
 0x63a   : > { %vm2805_vm3 = vcmp.gt.f32.partialorder %v2789_v62, 1.5707964  ;;  %v6453_v3 = vpack.c.bf16 %v6451_v21, %v6452_v31  ;;  %v2790_v30 = vsel %vm2758_vm7, %v2774_v43, %v2742_v49  ;;  %v2791_v56 = vsel %vm2759_vm14, %v2775_v59, %v2743_v29  ;;  %v6459_v35 = vld [vmem:[#allocation25_spill] sm:$0xff]  ;;  %v6461_v17 = vld [vmem:[#allocation23_spill] sm:$0xff] }
 0x63b   : > { %v2776_v2 = vsub.f32 6.2831855, %v2744_v22  ;;  %v2746_v40 = vand.u32 2147483647, %v2730_v37  ;;  %vm2760_vm1 = vcmp.gt.f32.partialorder %v2744_v22, 3.1415927  ;;  %v2733_v27 = vsub.f32 %v5914_v38, %v5917_v33  ;;  %vm3310_vm5 = vmpackc.low %vm2805_vm3, %vm2804_vm8 }
 0x63c   : > { %3307 = vmatpush3.bf16.msk.msra.mxu1 %vm3306_vm10, %v6453_v3  ;;  %v2777_v44 = vsub.f32 6.2831855, %v2745_v10  ;;  %v2747_v24 = vand.u32 2147483647, %v2731_v45  ;;  %vm2761_vm13 = vcmp.gt.f32.partialorder %v2745_v10, 3.1415927  ;;  %v6455_v11 = vpack.c.bf16 %v6454_v25, %v4977_v34 }
 0x63d   : > { %3308 = vmatprep.subr.bf16.mxu1 %v6449_v12  ;;  %v2748_v13 = vand.u32 2147483647, %v2732_v50  ;;  %vm2806_vm6 = vcmp.gt.f32.partialorder %v2790_v30, 1.5707964  ;;  %vm2807_vm9 = vcmp.gt.f32.partialorder %v2791_v56, 1.5707964  ;;  %v2792_v8 = vsel %vm2760_vm1, %v2776_v2, %v2744_v22 }
 0x63e   : > { %v2793_v57 = vsel %vm2761_vm13, %v2777_v44, %v2745_v10  ;;  %v2778_v61 = vsub.f32 6.2831855, %v2746_v40  ;;  %v2779_v42 = vsub.f32 6.2831855, %v2747_v24  ;;  %v2749_v9 = vand.u32 2147483647, %v2733_v27  ;;  %vm3314_vm2 = vmpackc.low %vm2807_vm9, %vm2806_vm6 }
 0x63f   : > { %vm2762_vm15 = vcmp.gt.f32.partialorder %v2746_v40, 3.1415927  ;;  %vm2763_vm12 = vcmp.gt.f32.partialorder %v2747_v24, 3.1415927  ;;  %v6456_v38 = vld [vmem:[#allocation27_spill] sm:$0xff]  ;;  %v6460_v52 = vpack.c.bf16 %v6458_v54, %v6459_v35  ;;  %v6462_v0 = vld [vmem:[#allocation33_spill] sm:$0xff]  ;;  %v6464_v41 = vpack.c.bf16 %v5072_v39, %v5076_v14 }
 0x640   : > { %3311 = vmatpush3.bf16.msk.msra.mxu1 %vm3310_vm5, %v6455_v11  ;;  %v6457_v33 = vpack.c.bf16 %v5000_v16, %v6456_v38  ;;  %vm2808_vm4 = vcmp.gt.f32.partialorder %v2792_v8, 1.5707964  ;;  %vm2809_vm11 = vcmp.gt.f32.partialorder %v2793_v57, 1.5707964  ;;  %v2780_v34 = vsub.f32 6.2831855, %v2748_v13 }
 0x641   : > { %3312 = vmatprep.subr.bf16.mxu1 %v6449_v12  ;;  %v2794_v18 = vsel %vm2762_vm15, %v2778_v61, %v2746_v40  ;;  %v2795_v15 = vsel %vm2763_vm12, %v2779_v42, %v2747_v24  ;;  %v2781_v7 = vsub.f32 6.2831855, %v2749_v9  ;;  %vm2764_vm0 = vcmp.gt.f32.partialorder %v2748_v13, 3.1415927  ;;  %vm3318_vm14 = vmpackc.low %vm2809_vm11, %vm2808_vm4  ;;  %v6465_v20 = vld [vmem:[#allocation63_spill] sm:$0xff] }
 0x642   : > { %vm2765_vm7 = vcmp.gt.f32.partialorder %v2749_v9, 3.1415927  ;;  %vm2810_vm10 = vcmp.gt.f32.partialorder %v2794_v18, 1.5707964  ;;  %vm2811_vm8 = vcmp.gt.f32.partialorder %v2795_v15, 1.5707964  ;;  %v2796_v16 = vsel %vm2764_vm0, %v2780_v34, %v2748_v13 }
 0x643   : > { %v2797_v55 = vsel %vm2765_vm7, %v2781_v7, %v2749_v9  ;;  %vm3322_vm3 = vmpackc.low %vm2811_vm8, %vm2810_vm10  ;;  %v6463_v6 = vpack.c.bf16 %v6461_v17, %v6462_v0  ;;  %vm2812_vm1 = vcmp.gt.f32.partialorder %v2796_v16, 1.5707964 }
 0x644   : > { %3315 = vmatpush3.bf16.msk.msra.mxu1 %vm3314_vm2, %v6457_v33  ;;  %vm2813_vm13 = vcmp.gt.f32.partialorder %v2797_v55, 1.5707964 }
 0x645   : > { %3316 = vmatprep.subr.bf16.mxu1 %v6449_v12  ;;  %vm3326_vm5 = vmpackc.low %vm2813_vm13, %vm2812_vm1 }
 0x648   : > { %3319 = vmatpush3.bf16.msk.msra.mxu1 %vm3318_vm14, %v6460_v52 }
 0x649   : > { %3320 = vmatprep.subr.bf16.mxu1 %v6449_v12 }
 0x64c   : > { %3323 = vmatpush3.bf16.msk.msra.mxu1 %vm3322_vm3, %v6463_v6 }
 0x64d   : > { %3324 = vmatprep.subr.bf16.mxu1 %v6449_v12 }
 0x650   : > { %3327 = vmatpush3.bf16.msk.msra.mxu1 %vm3326_vm5, %v6464_v41 }
 0x653   : > { %3262 = vmatmul.mubr.f32.vlgmr.msra.gmra.mrb[0].mxu1 %v5864_v47 }
 0x6d1   : > { %v3228_v63 = vpop.f32.mrb[0].mxu0 }
 0x6d2   : > { %v2926_v32 = vmax.f32 %v3228_v63, 1e-12  ;;  %v2953_v48 = vmin.f32 %v3228_v63, 1.0  ;;  %vm2955_vm6 = vcmp.gt.f32.partialorder %v3228_v63, 0.5  ;;  %v2438_v5 = vpop.f32.mrb[1].mxu0 }
 0x6d3   : > { %v3155_v51 = vsel %vm2955_vm6, 1.0, %v6250_v1 }
 0x6d4   : > { %3488 = vrcp.f32 %v2926_v32  ;;  %2954 = vst [vmem:[%s4522_s3 + $0x6] sm:$0x4] %v2953_v48  ;;  %2958 = vst [vmem:[%s4522_s3 + $0x8] sm:$0x2] %v3155_v51 }
 0x6de   : > { %v3489_v19 = vpop.eup %3488 }
 0x6df   : > { %v2931_v36 = vrot.slane %v3489_v19, %v6465_v20  ;;  %v2940_v62 = vrot.slane %v3489_v19, 2  ;;  %v2949_v22 = vrot.slane %v3489_v19, 1 }
 0x6e1   : > { %v2932_v46 = vmul.f32 %v2931_v36, %v2438_v5 }
 0x6e3   : > { %2933 = vst [vmem:[%s4522_s3] sm:$0x3f] %v2932_v46 }
 0x726   : > { %v2902_v12 = vpop.f32.mrb[0].mxu1 }
 0x727   : > { %v2907_v39 = vrot.slane %v2902_v12, 2  ;;  %v3263_v14 = vpop.f32.mrb[1].mxu1  ;;  %v2915_v60 = vrot.slane %v2902_v12, 6  ;;  %v2921_v1 = vrot.slane %v2902_v12, 7 }
 0x729   : > { %v2909_v26 = vsub.f32 %v3228_v63, %v2907_v39  ;;  %v2914_v47 = vsub.f32 %v2438_v5, %v2907_v39 }
 0x72b   : > { %v2911_v53 = vrot.slane %v2909_v26, 6  ;;  %v2918_v49 = vrot.slane %v2914_v47, 4  ;;  %v2923_v29 = vrot.slane %v2914_v47, 5 }
 0x72d   : > { %vm2913_vm9 = vcmp.le.f32.partialorder %v2902_v12, %v2911_v53 }
 0x72e   : > { %v2920_v58 = vsel %vm2913_vm9, %v2915_v60, %v2918_v49  ;;  %v2925_v28 = vsel %vm2913_vm9, %v2921_v1, %v2923_v29 }
 0x72f   : > { %v2934_v37 = vmul.f32 2.0, %v2920_v58  ;;  %v2944_v4 = vmul.f32 2.0, %v2925_v28 }
 0x731   : > { %v2936_v23 = vrot.slane %v2934_v37, 4  ;;  %v2946_v43 = vrot.slane %v2944_v4, 3 }
 0x733   : > { %v2938_v45 = vsub.f32 %v2438_v5, %v2936_v23  ;;  %v2948_v59 = vsub.f32 %v2438_v5, %v2946_v43 }
 0x735   : > { %v2942_v10 = vmul.f32 %v2940_v62, %v2938_v45  ;;  %v2951_v50 = vmul.f32 %v2949_v22, %v2948_v59 }
 0x737   : > { %2943 = vst [vmem:[%s4522_s3] sm:$0x40] %v2942_v10  ;;  %2952 = vst [vmem:[%s4522_s3] sm:$0x80] %v2951_v50 }
 0x738 PF: > { %p18_p6 = scmp.ge.s32.totalorder %s3666_s18, 4   ;;  %s6466_s14 = smov %s3576_s15 }
 0x739   : > { %s6467_s15 = smov %s3580_s0  ;;  %s6468_s0 = smov %s3676_s21 }
 0x73a   : > { %s6469_s16 = smov %s3666_s18  ;;  %20 = sbr.rel (!%p18_p6) target bundleno = 18 (0x12), region = 83 }
 0x741   :  { %2980 = vsyncpa [#allocation6], 1 }
 0x742   :  { %2982 = vsyncpa [#allocation6 + $0x1], 1 }

</bundles_post_ra>
